<compile_context>
chip_gen: v7x
topology: tpu7x:2x2x1
jax: 0.10.0
libtpu: 0.0.40
codegen_flags: <defaults>
</compile_context>

<pallas_src>
import functools

import jax
import jax.numpy as jnp
from jax.experimental import pallas as pl
from jax.experimental.pallas import tpu as pltpu

EPS = 1e-5
NEG_SLOPE = 0.01                 # nn.LeakyReLU default
LANE = 128                       # TPU lane width (channel padding target)
VMEM_LIMIT = 48 * 1024 * 1024    # safe on v5e/v6e (128 MiB) and v7x (64 MiB)


def _round_up(x, m):
    return (x + m - 1) // m * m


def _cdiv(a, b):
    return -(-a // b)


# ------------------------------ Pallas kernel --------------------------------

def _conv_kernel(*refs, kh, kw, ho, wo, has_res):
    """One padded image per grid step: LeakyReLU + KHxKW stride-1 conv as
    kh*kw shifted (Ho*Wo, Cin) @ (Cin, Cout) MXU matmuls, f32 accumulation,
    optional fused residual add, bf16 store."""
    if has_res:
        x_ref, w_ref, r_ref, o_ref = refs
    else:
        x_ref, w_ref, o_ref = refs
        r_ref = None

    cp = x_ref.shape[-1]
    cop = o_ref.shape[-1]

    # LeakyReLU once over the whole (Hp, Wp, Cp) image.  BN scale is folded
    # into the weights and BN bias into the input (shift trick), so spatial /
    # channel zero padding stays exactly zero post-activation.
    a = x_ref[0]                                   # (Hp, Wp, Cp) bf16
    a = jnp.where(a >= 0, a, a * NEG_SLOPE)

    acc = jnp.zeros((ho * wo, cop), jnp.float32)
    for i in range(kh):                            # static unroll (<= 9 taps)
        for j in range(kw):
            win = a[i:i + ho, j:j + wo, :].reshape(ho * wo, cp)
            acc = acc + jnp.dot(win, w_ref[i * kw + j],
                                preferred_element_type=jnp.float32)

    out = acc.reshape(ho, wo, cop)
    if r_ref is not None:
        out = out + r_ref[0].astype(jnp.float32)
    o_ref[0] = out.astype(o_ref.dtype)


def _conv_call(xp, wt, kh, kw, residual, ho, wo):
    """xp: (N, Hp, Wp, Cp) bf16, wt: (kh*kw, Cp, Cop) bf16,
    residual: optional (N, ho, wo, Cop) bf16.  Returns (N, ho, wo, Cop) bf16."""
    n, hp, wp, cp = xp.shape
    taps, _, cop = wt.shape
    assert taps == kh * kw
    assert hp >= ho + kh - 1 and wp >= wo + kw - 1

    kernel = functools.partial(_conv_kernel, kh=kh, kw=kw, ho=ho, wo=wo,
                               has_res=residual is not None)

    in_specs = [
        # One padded image per grid step.
        pl.BlockSpec((1, hp, wp, cp), lambda b: (b, 0, 0, 0)),
        # Full weights, constant block index -> DMA'd once, resident in VMEM.
        pl.BlockSpec((taps, cp, cop), lambda b: (0, 0, 0)),
    ]
    args = [xp, wt]
    bytes_accessed = xp.size * 2 + wt.size * 2 + n * ho * wo * cop * 2
    if residual is not None:
        in_specs.append(pl.BlockSpec((1, ho, wo, cop), lambda b: (b, 0, 0, 0)))
        args.append(residual)
        bytes_accessed += residual.size * 2

    return pl.pallas_call(
        kernel,
        out_shape=jax.ShapeDtypeStruct((n, ho, wo, cop), jnp.bfloat16),
        grid_spec=pltpu.PrefetchScalarGridSpec(
            num_scalar_prefetch=0,
            grid=(n,),
            in_specs=in_specs,
            out_specs=pl.BlockSpec((1, ho, wo, cop), lambda b: (b, 0, 0, 0)),
        ),
        compiler_params=pltpu.CompilerParams(
            dimension_semantics=("parallel",),   # batch -> v7x megacore split
            vmem_limit_bytes=VMEM_LIMIT),
        cost_estimate=pl.CostEstimate(
            flops=2 * n * ho * wo * taps * cp * cop,
            transcendentals=0,
            bytes_accessed=bytes_accessed),
    )(*args)


# ------------------------------ layer wrapper --------------------------------

def _space_to_depth(xp, wt, s):
    """Polyphase rearrange so a stride-s conv becomes a stride-1 conv.
    xp: (N, Hp, Wp, C) already spatially zero-padded; wt: (KH, KW, C, Co)."""
    n, hp, wp, c = xp.shape
    kh, kw, _, co = wt.shape
    h2, w2 = _cdiv(hp, s), _cdiv(wp, s)
    xp = jnp.pad(xp, ((0, 0), (0, h2 * s - hp), (0, w2 * s - wp), (0, 0)))
    xp = xp.reshape(n, h2, s, w2, s, c)
    xp = xp.transpose(0, 1, 3, 2, 4, 5).reshape(n, h2, w2, s * s * c)

    kh2, kw2 = _cdiv(kh, s), _cdiv(kw, s)
    wt = jnp.pad(wt, ((0, kh2 * s - kh), (0, kw2 * s - kw), (0, 0), (0, 0)))
    wt = wt.reshape(kh2, s, kw2, s, c, co)
    wt = wt.transpose(0, 2, 1, 3, 4, 5).reshape(kh2, kw2, s * s * c, co)
    return xp, wt


def conv_bn_lrelu(x, bn, w_hwio, stride, padding, residual=None):
    """leaky_relu(batchnorm_eval(x)) -> conv2d(stride, padding) [+ residual].

    NHWC in, NHWC bf16 out.  The matmuls, activation and residual add run in a
    single Pallas kernel per conv; the wrapper only does cheap XLA-fused
    shift / pad / polyphase glue (~1x activation size vs 9x im2col before)."""
    gamma, beta, mean, var = bn
    scale = gamma / jnp.sqrt(var + EPS)          # (Cin,)
    bias = beta - mean * scale                   # (Cin,)

    # LeakyReLU positive homogeneity: lrelu(x*s + b) = s * lrelu(x + b/s) for
    # s > 0, so the BN scale is folded into the conv weights (per input
    # channel) and the bias into the input.  Requires scale > 0.
    # TODO(synk): checkpoints with gamma <= 0 would need the per-channel scale
    # applied inside the kernel instead of this weight fold.
    try:
        assert bool(jnp.all(scale > 0.0)), "BN scale must be > 0 for the fold"
    except jax.errors.ConcretizationTypeError:
        pass  # traced params: positivity is a documented requirement

    kh, kw, cin, cout = w_hwio.shape

    # 1x1 conv with stride > 1: subsample in the wrapper (pointwise BN /
    # LeakyReLU commute with subsampling); the conv becomes stride 1.
    if kh == 1 and kw == 1 and stride > 1:
        x = x[:, ::stride, ::stride, :]
        stride = 1

    n, h, wsp, _ = x.shape
    ho = (h + 2 * padding - kh) // stride + 1
    wo = (wsp + 2 * padding - kw) // stride + 1

    # BN bias shift + spatial zero padding (zeros stay zeros post-activation).
    x_shift = (x.astype(jnp.float32) + (bias / scale)).astype(jnp.bfloat16)
    xp = jnp.pad(x_shift,
                 ((0, 0), (padding, padding), (padding, padding), (0, 0)))
    wt = w_hwio.astype(jnp.float32) * scale[None, None, :, None]

    if stride > 1:                                # 3x3 stride-2 conv1
        xp, wt = _space_to_depth(xp, wt, stride)
        kh, kw = wt.shape[0], wt.shape[1]

    # Channel padding to the lane width; weights -> (taps, Cp, Cop) bf16.
    c_eff = xp.shape[-1]
    cp = _round_up(c_eff, LANE)
    cop = _round_up(cout, LANE)
    xp = jnp.pad(xp, ((0, 0), (0, 0), (0, 0), (0, cp - c_eff)))
    wt = jnp.pad(wt, ((0, 0), (0, 0), (0, cp - c_eff), (0, cop - cout)))
    wt = wt.reshape(kh * kw, cp, cop).astype(jnp.bfloat16)

    r = None
    if residual is not None:
        r = jnp.pad(residual.astype(jnp.bfloat16),
                    ((0, 0), (0, 0), (0, 0),
                     (0, cop - residual.shape[-1])))

    out = _conv_call(xp, wt, kh, kw, r, ho, wo)   # (N, ho, wo, Cop) bf16
    return out[..., :cout]


def wide_res_unit(x, p):
    """_WideResUnit forward.  x: NHWC."""
    h1 = conv_bn_lrelu(x, p["bn1"], p["conv1"], stride=p["stride"], padding=1)
    # Dropout(drop_rate=0.0) -> identity.
    # TODO(synk): nonzero drop_rate would need pltpu.prng_* based masking.
    if "i_conv" in p:
        shortcut = conv_bn_lrelu(x, p["i_bn"], p["i_conv"],
                                 stride=p["stride"], padding=0)
    else:
        shortcut = x
    # conv2 (3x3, stride 1) with the residual add fused into its kernel.
    return conv_bn_lrelu(h1, p["bn2"], p["conv2"], stride=1, padding=1,
                         residual=shortcut)


def wide_block(x_nchw, params):
    """_WideBlock forward: sequence of _WideResUnits.  I/O in NCHW."""
    x = jnp.transpose(x_nchw, (0, 2, 3, 1))                      # -> NHWC
    for p in params:
        x = wide_res_unit(x, p)
    return jnp.transpose(x, (0, 3, 1, 2)).astype(jnp.float32)    # -> NCHW


# --------------------------- deterministic params ---------------------------

def _init_bn(key, c):
    k1, k2, k3, k4 = jax.random.split(key, 4)
    gamma = jax.random.uniform(k1, (c,), jnp.float32, 0.5, 1.5)
    beta = 0.1 * jax.random.normal(k2, (c,), jnp.float32)
    mean = 0.1 * jax.random.normal(k3, (c,), jnp.float32)
    var = jax.random.uniform(k4, (c,), jnp.float32, 0.5, 1.5)
    return (gamma, beta, mean, var)


def _init_conv(key, kh, kw, cin, cout):
    fan_in = kh * kw * cin
    return jax.random.normal(key, (kh, kw, cin, cout), jnp.float32) / jnp.sqrt(
        jnp.float32(fan_in))


def init_unit_params(key, cin, cout, stride):
    keys = jax.random.split(key, 7)
    p = {
        "stride": stride,
        "bn1": _init_bn(keys[0], cin),
        "conv1": _init_conv(keys[1], 3, 3, cin, cout),
        "bn2": _init_bn(keys[2], cout),
        "conv2": _init_conv(keys[3], 3, 3, cout, cout),
    }
    if cin != cout or stride != 1:
        p["i_bn"] = _init_bn(keys[4], cin)
        p["i_conv"] = _init_conv(keys[5], 1, 1, cin, cout)
    return p


def init_wide_block_params(key, input_channel, channel_width, block_depth,
                           down_sample):
    params = []
    keys = jax.random.split(key, block_depth)
    for i in range(block_depth):
        if i == 0:
            params.append(init_unit_params(keys[i], input_channel,
                                           channel_width,
                                           stride=int(1 + down_sample)))
        else:
            params.append(init_unit_params(keys[i], channel_width,
                                           channel_width, stride=1))
    return params


# ------------------------------ pure-JAX reference ---------------------------

def _bn_lrelu_ref(x, gamma, beta, mean, var):
    y = (x - mean) / jnp.sqrt(var + EPS) * gamma + beta
    return jnp.where(y >= 0.0, y, NEG_SLOPE * y)


def _conv_ref(x, w, stride, padding):
    return jax.lax.conv_general_dilated(
        x, w, (stride, stride), [(padding, padding)] * 2,
        dimension_numbers=("NHWC", "HWIO", "NHWC"))


def _unit_ref(x, p):
    a1 = _bn_lrelu_ref(x, *p["bn1"])
    h1 = _conv_ref(a1, p["conv1"], p["stride"], 1)
    a2 = _bn_lrelu_ref(h1, *p["bn2"])
    h2 = _conv_ref(a2, p["conv2"], 1, 1)
    if "i_conv" in p:
        s = _bn_lrelu_ref(x, *p["i_bn"])
        x = _conv_ref(s, p["i_conv"], p["stride"], 0)
    return h2 + x


def wide_block_ref(x_nchw, params):
    x = jnp.transpose(x_nchw, (0, 2, 3, 1)).astype(jnp.float32)
    for p in params:
        x = _unit_ref(x, p)
    return jnp.transpose(x, (0, 3, 1, 2))


# ----------------------------------- main ------------------------------------

if __name__ == "__main__":
    key = jax.random.PRNGKey(0)
    kx, kp = jax.random.split(key)

    # Small config: _WideBlock(input_channel=4, channel_width=8,
    #                          block_depth=2, down_sample=True, drop_rate=0.0)
    input_channel, channel_width, block_depth, down_sample = 4, 8, 2, True
    x = jax.random.normal(kx, (2, input_channel, 16, 16), jnp.float32)  # NCHW

    params = init_wide_block_params(kp, input_channel, channel_width,
                                    block_depth, down_sample)

    fwd = jax.jit(functools.partial(wide_block, params=params))
    out = jax.block_until_ready(fwd(x))

    # Correctness check against a pure-JAX/XLA f32 reference.  Tolerance is
    # scaled for bf16 MXU operands / bf16 inter-layer activations (f32 acc).
    ref = jax.block_until_ready(wide_block_ref(x, params))
    assert out.shape == ref.shape == (2, channel_width, 8, 8), out.shape
    err = float(jnp.max(jnp.abs(out - ref)))
    tol = 3e-2 * max(1.0, float(jnp.max(jnp.abs(ref))))
    assert err < tol, (err, tol)

    print("KERNEL_OK")
</pallas_src>

<mosaic_0001>
module attributes {stable_mosaic.version = 11 : i64} {
  func.func @_conv_kernel(%arg0: i32, %arg1: memref<1x8x8x128xbf16, #tpu.memory_space<vmem>>, %arg2: memref<1x128x128xbf16, #tpu.memory_space<vmem>>, %arg3: memref<1x8x8x128xbf16, #tpu.memory_space<vmem>>) attributes {dimension_semantics = [#tpu.dimension_semantics<parallel>], iteration_bounds = array<i64: 2>, scalar_prefetch = 0 : i64, scratch_operands = 0 : i64, tpu.core_type = #tpu.core_type<tc>, window_params = [{transform_indices = @transform_0, window_bounds = array<i64: 1, 8, 8, 128>}, {pipeline_mode = #tpu.pipeline_mode<synchronous>, transform_indices = @transform_1, window_bounds = array<i64: 1, 128, 128>}, {transform_indices = @transform_2, window_bounds = array<i64: 1, 8, 8, 128>}]} {
    %c0 = arith.constant 0 : index
    %c0_0 = arith.constant 0 : index
    %c0_1 = arith.constant 0 : index
    %c0_2 = arith.constant 0 : index
    %0 = vector.load %arg1[%c0, %c0_0, %c0_1, %c0_2] : memref<1x8x8x128xbf16, #tpu.memory_space<vmem>>, vector<1x8x8x128xbf16>
    %1 = vector.shape_cast %0 : vector<1x8x8x128xbf16> to vector<8x8x128xbf16>
    %cst = arith.constant 0.000000e+00 : bf16
    %2 = vector.broadcast %cst : bf16 to vector<8x8x128xbf16>
    %3 = arith.cmpf oge, %1, %2 : vector<8x8x128xbf16>
    %cst_3 = arith.constant 1.000980e-02 : bf16
    %4 = vector.broadcast %cst_3 : bf16 to vector<8x8x128xbf16>
    %5 = arith.mulf %1, %4 : vector<8x8x128xbf16>
    %6 = arith.select %3, %1, %5 : vector<8x8x128xi1>, vector<8x8x128xbf16>
    %cst_4 = arith.constant 0.000000e+00 : f32
    %7 = vector.broadcast %cst_4 : f32 to vector<64x128xf32>
    %8 = vector.shape_cast %6 : vector<8x8x128xbf16> to vector<64x128xbf16>
    %c0_5 = arith.constant 0 : index
    %c0_6 = arith.constant 0 : index
    %c0_7 = arith.constant 0 : index
    %9 = vector.load %arg2[%c0_5, %c0_6, %c0_7] : memref<1x128x128xbf16, #tpu.memory_space<vmem>>, vector<1x128x128xbf16>
    %10 = vector.shape_cast %9 : vector<1x128x128xbf16> to vector<128x128xbf16>
    %cst_8 = arith.constant dense<0.000000e+00> : vector<64x128xf32>
    %11 = tpu.matmul %8, %10, %cst_8 {dimension_numbers = #tpu.dot_dimension_numbers<[1], [0], [0], [1], [0, 0, 1, 1], [], []>} : vector<64x128xbf16>, vector<128x128xbf16>, vector<64x128xf32> -> vector<64x128xf32>
    %12 = arith.addf %7, %11 : vector<64x128xf32>
    %13 = vector.shape_cast %12 : vector<64x128xf32> to vector<8x8x128xf32>
    %14 = arith.truncf %13 : vector<8x8x128xf32> to vector<8x8x128xbf16>
    %c0_9 = arith.constant 0 : index
    %c0_10 = arith.constant 0 : index
    %c0_11 = arith.constant 0 : index
    %c0_12 = arith.constant 0 : index
    %15 = vector.load %arg3[%c0_9, %c0_10, %c0_11, %c0_12] : memref<1x8x8x128xbf16, #tpu.memory_space<vmem>>, vector<1x8x8x128xbf16>
    %16 = vector.shape_cast %15 : vector<1x8x8x128xbf16> to vector<8x8x128xbf16>
    %17 = vector.shape_cast %14 : vector<8x8x128xbf16> to vector<1x8x8x128xbf16>
    tpu.vector_store %arg3[%c0_9, %c0_10, %c0_11, %c0_12], %17 {strides = array<i32>} : memref<1x8x8x128xbf16, #tpu.memory_space<vmem>>, vector<1x8x8x128xbf16>,
    return
  }
  func.func @transform_0(%arg0: i32) -> (i32, i32, i32, i32) {
    %c0_i32 = arith.constant 0 : i32
    %c0_i32_0 = arith.constant 0 : i32
    %c0_i32_1 = arith.constant 0 : i32
    %c0_i32_2 = arith.constant 0 : i32
    return %arg0, %c0_i32, %c0_i32_0, %c0_i32_1 : i32, i32, i32, i32
  }
  func.func @transform_1(%arg0: i32) -> (i32, i32, i32) {
    %c0_i32 = arith.constant 0 : i32
    %c0_i32_0 = arith.constant 0 : i32
    %c0_i32_1 = arith.constant 0 : i32
    %c0_i32_2 = arith.constant 0 : i32
    return %c0_i32, %c0_i32_0, %c0_i32_1 : i32, i32, i32
  }
  func.func @transform_2(%arg0: i32) -> (i32, i32, i32, i32) {
    %c0_i32 = arith.constant 0 : i32
    %c0_i32_0 = arith.constant 0 : i32
    %c0_i32_1 = arith.constant 0 : i32
    %c0_i32_2 = arith.constant 0 : i32
    return %arg0, %c0_i32, %c0_i32_0, %c0_i32_1 : i32, i32, i32, i32
  }
}

module attributes {stable_mosaic.version = 11 : i64} {
  func.func @_conv_kernel(%arg0: i32, %arg1: memref<1x9x9x128xbf16, #tpu.memory_space<vmem>>, %arg2: memref<4x128x128xbf16, #tpu.memory_space<vmem>>, %arg3: memref<1x8x8x128xbf16, #tpu.memory_space<vmem>>) attributes {dimension_semantics = [#tpu.dimension_semantics<parallel>], iteration_bounds = array<i64: 2>, scalar_prefetch = 0 : i64, scratch_operands = 0 : i64, tpu.core_type = #tpu.core_type<tc>, window_params = [{transform_indices = @transform_0, window_bounds = array<i64: 1, 9, 9, 128>}, {pipeline_mode = #tpu.pipeline_mode<synchronous>, transform_indices = @transform_1, window_bounds = array<i64: 4, 128, 128>}, {transform_indices = @transform_2, window_bounds = array<i64: 1, 8, 8, 128>}]} {
    %c0 = arith.constant 0 : index
    %c0_0 = arith.constant 0 : index
    %c0_1 = arith.constant 0 : index
    %c0_2 = arith.constant 0 : index
    %0 = vector.load %arg1[%c0, %c0_0, %c0_1, %c0_2] : memref<1x9x9x128xbf16, #tpu.memory_space<vmem>>, vector<1x9x9x128xbf16>
    %1 = vector.shape_cast %0 : vector<1x9x9x128xbf16> to vector<9x9x128xbf16>
    %cst = arith.constant 0.000000e+00 : bf16
    %2 = vector.broadcast %cst : bf16 to vector<9x9x128xbf16>
    %3 = arith.cmpf oge, %1, %2 : vector<9x9x128xbf16>
    %cst_3 = arith.constant 1.000980e-02 : bf16
    %4 = vector.broadcast %cst_3 : bf16 to vector<9x9x128xbf16>
    %5 = arith.mulf %1, %4 : vector<9x9x128xbf16>
    %6 = arith.select %3, %1, %5 : vector<9x9x128xi1>, vector<9x9x128xbf16>
    %cst_4 = arith.constant 0.000000e+00 : f32
    %7 = vector.broadcast %cst_4 : f32 to vector<64x128xf32>
    %8 = vector.extract_strided_slice %6 {offsets = [0, 0, 0], sizes = [8, 8, 128], strides = [1, 1, 1]} : vector<9x9x128xbf16> to vector<8x8x128xbf16>
    %9 = vector.shape_cast %8 : vector<8x8x128xbf16> to vector<64x128xbf16>
    %c0_5 = arith.constant 0 : index
    %c0_6 = arith.constant 0 : index
    %c0_7 = arith.constant 0 : index
    %10 = vector.load %arg2[%c0_5, %c0_6, %c0_7] : memref<4x128x128xbf16, #tpu.memory_space<vmem>>, vector<1x128x128xbf16>
    %11 = vector.shape_cast %10 : vector<1x128x128xbf16> to vector<128x128xbf16>
    %cst_8 = arith.constant dense<0.000000e+00> : vector<64x128xf32>
    %12 = tpu.matmul %9, %11, %cst_8 {dimension_numbers = #tpu.dot_dimension_numbers<[1], [0], [0], [1], [0, 0, 1, 1], [], []>} : vector<64x128xbf16>, vector<128x128xbf16>, vector<64x128xf32> -> vector<64x128xf32>
    %13 = arith.addf %7, %12 : vector<64x128xf32>
    %14 = vector.extract_strided_slice %6 {offsets = [0, 1, 0], sizes = [8, 8, 128], strides = [1, 1, 1]} : vector<9x9x128xbf16> to vector<8x8x128xbf16>
    %15 = vector.shape_cast %14 : vector<8x8x128xbf16> to vector<64x128xbf16>
    %c1 = arith.constant 1 : index
    %c0_9 = arith.constant 0 : index
    %c0_10 = arith.constant 0 : index
    %16 = vector.load %arg2[%c1, %c0_9, %c0_10] : memref<4x128x128xbf16, #tpu.memory_space<vmem>>, vector<1x128x128xbf16>
    %17 = vector.shape_cast %16 : vector<1x128x128xbf16> to vector<128x128xbf16>
    %cst_11 = arith.constant dense<0.000000e+00> : vector<64x128xf32>
    %18 = tpu.matmul %15, %17, %cst_11 {dimension_numbers = #tpu.dot_dimension_numbers<[1], [0], [0], [1], [0, 0, 1, 1], [], []>} : vector<64x128xbf16>, vector<128x128xbf16>, vector<64x128xf32> -> vector<64x128xf32>
    %19 = arith.addf %13, %18 : vector<64x128xf32>
    %20 = vector.extract_strided_slice %6 {offsets = [1, 0, 0], sizes = [8, 8, 128], strides = [1, 1, 1]} : vector<9x9x128xbf16> to vector<8x8x128xbf16>
    %21 = vector.shape_cast %20 : vector<8x8x128xbf16> to vector<64x128xbf16>
    %c2 = arith.constant 2 : index
    %c0_12 = arith.constant 0 : index
    %c0_13 = arith.constant 0 : index
    %22 = vector.load %arg2[%c2, %c0_12, %c0_13] : memref<4x128x128xbf16, #tpu.memory_space<vmem>>, vector<1x128x128xbf16>
    %23 = vector.shape_cast %22 : vector<1x128x128xbf16> to vector<128x128xbf16>
    %cst_14 = arith.constant dense<0.000000e+00> : vector<64x128xf32>
    %24 = tpu.matmul %21, %23, %cst_14 {dimension_numbers = #tpu.dot_dimension_numbers<[1], [0], [0], [1], [0, 0, 1, 1], [], []>} : vector<64x128xbf16>, vector<128x128xbf16>, vector<64x128xf32> -> vector<64x128xf32>
    %25 = arith.addf %19, %24 : vector<64x128xf32>
    %26 = vector.extract_strided_slice %6 {offsets = [1, 1, 0], sizes = [8, 8, 128], strides = [1, 1, 1]} : vector<9x9x128xbf16> to vector<8x8x128xbf16>
    %27 = vector.shape_cast %26 : vector<8x8x128xbf16> to vector<64x128xbf16>
    %c3 = arith.constant 3 : index
    %c0_15 = arith.constant 0 : index
    %c0_16 = arith.constant 0 : index
    %28 = vector.load %arg2[%c3, %c0_15, %c0_16] : memref<4x128x128xbf16, #tpu.memory_space<vmem>>, vector<1x128x128xbf16>
    %29 = vector.shape_cast %28 : vector<1x128x128xbf16> to vector<128x128xbf16>
    %cst_17 = arith.constant dense<0.000000e+00> : vector<64x128xf32>
    %30 = tpu.matmul %27, %29, %cst_17 {dimension_numbers = #tpu.dot_dimension_numbers<[1], [0], [0], [1], [0, 0, 1, 1], [], []>} : vector<64x128xbf16>, vector<128x128xbf16>, vector<64x128xf32> -> vector<64x128xf32>
    %31 = arith.addf %25, %30 : vector<64x128xf32>
    %32 = vector.shape_cast %31 : vector<64x128xf32> to vector<8x8x128xf32>
    %33 = arith.truncf %32 : vector<8x8x128xf32> to vector<8x8x128xbf16>
    %c0_18 = arith.constant 0 : index
    %c0_19 = arith.constant 0 : index
    %c0_20 = arith.constant 0 : index
    %c0_21 = arith.constant 0 : index
    %34 = vector.load %arg3[%c0_18, %c0_19, %c0_20, %c0_21] : memref<1x8x8x128xbf16, #tpu.memory_space<vmem>>, vector<1x8x8x128xbf16>
    %35 = vector.shape_cast %34 : vector<1x8x8x128xbf16> to vector<8x8x128xbf16>
    %36 = vector.shape_cast %33 : vector<8x8x128xbf16> to vector<1x8x8x128xbf16>
    tpu.vector_store %arg3[%c0_18, %c0_19, %c0_20, %c0_21], %36 {strides = array<i32>} : memref<1x8x8x128xbf16, #tpu.memory_space<vmem>>, vector<1x8x8x128xbf16>,
    return
  }
  func.func @transform_0(%arg0: i32) -> (i32, i32, i32, i32) {
    %c0_i32 = arith.constant 0 : i32
    %c0_i32_0 = arith.constant 0 : i32
    %c0_i32_1 = arith.constant 0 : i32
    %c0_i32_2 = arith.constant 0 : i32
    return %arg0, %c0_i32, %c0_i32_0, %c0_i32_1 : i32, i32, i32, i32
  }
  func.func @transform_1(%arg0: i32) -> (i32, i32, i32) {
    %c0_i32 = arith.constant 0 : i32
    %c0_i32_0 = arith.constant 0 : i32
    %c0_i32_1 = arith.constant 0 : i32
    %c0_i32_2 = arith.constant 0 : i32
    return %c0_i32, %c0_i32_0, %c0_i32_1 : i32, i32, i32
  }
  func.func @transform_2(%arg0: i32) -> (i32, i32, i32, i32) {
    %c0_i32 = arith.constant 0 : i32
    %c0_i32_0 = arith.constant 0 : i32
    %c0_i32_1 = arith.constant 0 : i32
    %c0_i32_2 = arith.constant 0 : i32
    return %arg0, %c0_i32, %c0_i32_0, %c0_i32_1 : i32, i32, i32, i32
  }
}

module attributes {stable_mosaic.version = 11 : i64} {
  func.func @_conv_kernel(%arg0: i32, %arg1: memref<1x10x10x128xbf16, #tpu.memory_space<vmem>>, %arg2: memref<9x128x128xbf16, #tpu.memory_space<vmem>>, %arg3: memref<1x8x8x128xbf16, #tpu.memory_space<vmem>>) attributes {dimension_semantics = [#tpu.dimension_semantics<parallel>], iteration_bounds = array<i64: 2>, scalar_prefetch = 0 : i64, scratch_operands = 0 : i64, tpu.core_type = #tpu.core_type<tc>, window_params = [{transform_indices = @transform_0, window_bounds = array<i64: 1, 10, 10, 128>}, {pipeline_mode = #tpu.pipeline_mode<synchronous>, transform_indices = @transform_1, window_bounds = array<i64: 9, 128, 128>}, {transform_indices = @transform_2, window_bounds = array<i64: 1, 8, 8, 128>}]} {
    %c0 = arith.constant 0 : index
    %c0_0 = arith.constant 0 : index
    %c0_1 = arith.constant 0 : index
    %c0_2 = arith.constant 0 : index
    %0 = vector.load %arg1[%c0, %c0_0, %c0_1, %c0_2] : memref<1x10x10x128xbf16, #tpu.memory_space<vmem>>, vector<1x10x10x128xbf16>
    %1 = vector.shape_cast %0 : vector<1x10x10x128xbf16> to vector<10x10x128xbf16>
    %cst = arith.constant 0.000000e+00 : bf16
    %2 = vector.broadcast %cst : bf16 to vector<10x10x128xbf16>
    %3 = arith.cmpf oge, %1, %2 : vector<10x10x128xbf16>
    %cst_3 = arith.constant 1.000980e-02 : bf16
    %4 = vector.broadcast %cst_3 : bf16 to vector<10x10x128xbf16>
    %5 = arith.mulf %1, %4 : vector<10x10x128xbf16>
    %6 = arith.select %3, %1, %5 : vector<10x10x128xi1>, vector<10x10x128xbf16>
    %cst_4 = arith.constant 0.000000e+00 : f32
    %7 = vector.broadcast %cst_4 : f32 to vector<64x128xf32>
    %8 = vector.extract_strided_slice %6 {offsets = [0, 0, 0], sizes = [8, 8, 128], strides = [1, 1, 1]} : vector<10x10x128xbf16> to vector<8x8x128xbf16>
    %9 = vector.shape_cast %8 : vector<8x8x128xbf16> to vector<64x128xbf16>
    %c0_5 = arith.constant 0 : index
    %c0_6 = arith.constant 0 : index
    %c0_7 = arith.constant 0 : index
    %10 = vector.load %arg2[%c0_5, %c0_6, %c0_7] : memref<9x128x128xbf16, #tpu.memory_space<vmem>>, vector<1x128x128xbf16>
    %11 = vector.shape_cast %10 : vector<1x128x128xbf16> to vector<128x128xbf16>
    %cst_8 = arith.constant dense<0.000000e+00> : vector<64x128xf32>
    %12 = tpu.matmul %9, %11, %cst_8 {dimension_numbers = #tpu.dot_dimension_numbers<[1], [0], [0], [1], [0, 0, 1, 1], [], []>} : vector<64x128xbf16>, vector<128x128xbf16>, vector<64x128xf32> -> vector<64x128xf32>
    %13 = arith.addf %7, %12 : vector<64x128xf32>
    %14 = vector.extract_strided_slice %6 {offsets = [0, 1, 0], sizes = [8, 8, 128], strides = [1, 1, 1]} : vector<10x10x128xbf16> to vector<8x8x128xbf16>
    %15 = vector.shape_cast %14 : vector<8x8x128xbf16> to vector<64x128xbf16>
    %c1 = arith.constant 1 : index
    %c0_9 = arith.constant 0 : index
    %c0_10 = arith.constant 0 : index
    %16 = vector.load %arg2[%c1, %c0_9, %c0_10] : memref<9x128x128xbf16, #tpu.memory_space<vmem>>, vector<1x128x128xbf16>
    %17 = vector.shape_cast %16 : vector<1x128x128xbf16> to vector<128x128xbf16>
    %cst_11 = arith.constant dense<0.000000e+00> : vector<64x128xf32>
    %18 = tpu.matmul %15, %17, %cst_11 {dimension_numbers = #tpu.dot_dimension_numbers<[1], [0], [0], [1], [0, 0, 1, 1], [], []>} : vector<64x128xbf16>, vector<128x128xbf16>, vector<64x128xf32> -> vector<64x128xf32>
    %19 = arith.addf %13, %18 : vector<64x128xf32>
    %20 = vector.extract_strided_slice %6 {offsets = [0, 2, 0], sizes = [8, 8, 128], strides = [1, 1, 1]} : vector<10x10x128xbf16> to vector<8x8x128xbf16>
    %21 = vector.shape_cast %20 : vector<8x8x128xbf16> to vector<64x128xbf16>
    %c2 = arith.constant 2 : index
    %c0_12 = arith.constant 0 : index
    %c0_13 = arith.constant 0 : index
    %22 = vector.load %arg2[%c2, %c0_12, %c0_13] : memref<9x128x128xbf16, #tpu.memory_space<vmem>>, vector<1x128x128xbf16>
    %23 = vector.shape_cast %22 : vector<1x128x128xbf16> to vector<128x128xbf16>
    %cst_14 = arith.constant dense<0.000000e+00> : vector<64x128xf32>
    %24 = tpu.matmul %21, %23, %cst_14 {dimension_numbers = #tpu.dot_dimension_numbers<[1], [0], [0], [1], [0, 0, 1, 1], [], []>} : vector<64x128xbf16>, vector<128x128xbf16>, vector<64x128xf32> -> vector<64x128xf32>
    %25 = arith.addf %19, %24 : vector<64x128xf32>
    %26 = vector.extract_strided_slice %6 {offsets = [1, 0, 0], sizes = [8, 8, 128], strides = [1, 1, 1]} : vector<10x10x128xbf16> to vector<8x8x128xbf16>
    %27 = vector.shape_cast %26 : vector<8x8x128xbf16> to vector<64x128xbf16>
    %c3 = arith.constant 3 : index
    %c0_15 = arith.constant 0 : index
    %c0_16 = arith.constant 0 : index
    %28 = vector.load %arg2[%c3, %c0_15, %c0_16] : memref<9x128x128xbf16, #tpu.memory_space<vmem>>, vector<1x128x128xbf16>
    %29 = vector.shape_cast %28 : vector<1x128x128xbf16> to vector<128x128xbf16>
    %cst_17 = arith.constant dense<0.000000e+00> : vector<64x128xf32>
    %30 = tpu.matmul %27, %29, %cst_17 {dimension_numbers = #tpu.dot_dimension_numbers<[1], [0], [0], [1], [0, 0, 1, 1], [], []>} : vector<64x128xbf16>, vector<128x128xbf16>, vector<64x128xf32> -> vector<64x128xf32>
    %31 = arith.addf %25, %30 : vector<64x128xf32>
    %32 = vector.extract_strided_slice %6 {offsets = [1, 1, 0], sizes = [8, 8, 128], strides = [1, 1, 1]} : vector<10x10x128xbf16> to vector<8x8x128xbf16>
    %33 = vector.shape_cast %32 : vector<8x8x128xbf16> to vector<64x128xbf16>
    %c4 = arith.constant 4 : index
    %c0_18 = arith.constant 0 : index
    %c0_19 = arith.constant 0 : index
    %34 = vector.load %arg2[%c4, %c0_18, %c0_19] : memref<9x128x128xbf16, #tpu.memory_space<vmem>>, vector<1x128x128xbf16>
    %35 = vector.shape_cast %34 : vector<1x128x128xbf16> to vector<128x128xbf16>
    %cst_20 = arith.constant dense<0.000000e+00> : vector<64x128xf32>
    %36 = tpu.matmul %33, %35, %cst_20 {dimension_numbers = #tpu.dot_dimension_numbers<[1], [0], [0], [1], [0, 0, 1, 1], [], []>} : vector<64x128xbf16>, vector<128x128xbf16>, vector<64x128xf32> -> vector<64x128xf32>
    %37 = arith.addf %31, %36 : vector<64x128xf32>
    %38 = vector.extract_strided_slice %6 {offsets = [1, 2, 0], sizes = [8, 8, 128], strides = [1, 1, 1]} : vector<10x10x128xbf16> to vector<8x8x128xbf16>
    %39 = vector.shape_cast %38 : vector<8x8x128xbf16> to vector<64x128xbf16>
    %c5 = arith.constant 5 : index
    %c0_21 = arith.constant 0 : index
    %c0_22 = arith.constant 0 : index
    %40 = vector.load %arg2[%c5, %c0_21, %c0_22] : memref<9x128x128xbf16, #tpu.memory_space<vmem>>, vector<1x128x128xbf16>
    %41 = vector.shape_cast %40 : vector<1x128x128xbf16> to vector<128x128xbf16>
    %cst_23 = arith.constant dense<0.000000e+00> : vector<64x128xf32>
    %42 = tpu.matmul %39, %41, %cst_23 {dimension_numbers = #tpu.dot_dimension_numbers<[1], [0], [0], [1], [0, 0, 1, 1], [], []>} : vector<64x128xbf16>, vector<128x128xbf16>, vector<64x128xf32> -> vector<64x128xf32>
    %43 = arith.addf %37, %42 : vector<64x128xf32>
    %44 = vector.extract_strided_slice %6 {offsets = [2, 0, 0], sizes = [8, 8, 128], strides = [1, 1, 1]} : vector<10x10x128xbf16> to vector<8x8x128xbf16>
    %45 = vector.shape_cast %44 : vector<8x8x128xbf16> to vector<64x128xbf16>
    %c6 = arith.constant 6 : index
    %c0_24 = arith.constant 0 : index
    %c0_25 = arith.constant 0 : index
    %46 = vector.load %arg2[%c6, %c0_24, %c0_25] : memref<9x128x128xbf16, #tpu.memory_space<vmem>>, vector<1x128x128xbf16>
    %47 = vector.shape_cast %46 : vector<1x128x128xbf16> to vector<128x128xbf16>
    %cst_26 = arith.constant dense<0.000000e+00> : vector<64x128xf32>
    %48 = tpu.matmul %45, %47, %cst_26 {dimension_numbers = #tpu.dot_dimension_numbers<[1], [0], [0], [1], [0, 0, 1, 1], [], []>} : vector<64x128xbf16>, vector<128x128xbf16>, vector<64x128xf32> -> vector<64x128xf32>
    %49 = arith.addf %43, %48 : vector<64x128xf32>
    %50 = vector.extract_strided_slice %6 {offsets = [2, 1, 0], sizes = [8, 8, 128], strides = [1, 1, 1]} : vector<10x10x128xbf16> to vector<8x8x128xbf16>
    %51 = vector.shape_cast %50 : vector<8x8x128xbf16> to vector<64x128xbf16>
    %c7 = arith.constant 7 : index
    %c0_27 = arith.constant 0 : index
    %c0_28 = arith.constant 0 : index
    %52 = vector.load %arg2[%c7, %c0_27, %c0_28] : memref<9x128x128xbf16, #tpu.memory_space<vmem>>, vector<1x128x128xbf16>
    %53 = vector.shape_cast %52 : vector<1x128x128xbf16> to vector<128x128xbf16>
    %cst_29 = arith.constant dense<0.000000e+00> : vector<64x128xf32>
    %54 = tpu.matmul %51, %53, %cst_29 {dimension_numbers = #tpu.dot_dimension_numbers<[1], [0], [0], [1], [0, 0, 1, 1], [], []>} : vector<64x128xbf16>, vector<128x128xbf16>, vector<64x128xf32> -> vector<64x128xf32>
    %55 = arith.addf %49, %54 : vector<64x128xf32>
    %56 = vector.extract_strided_slice %6 {offsets = [2, 2, 0], sizes = [8, 8, 128], strides = [1, 1, 1]} : vector<10x10x128xbf16> to vector<8x8x128xbf16>
    %57 = vector.shape_cast %56 : vector<8x8x128xbf16> to vector<64x128xbf16>
    %c8 = arith.constant 8 : index
    %c0_30 = arith.constant 0 : index
    %c0_31 = arith.constant 0 : index
    %58 = vector.load %arg2[%c8, %c0_30, %c0_31] : memref<9x128x128xbf16, #tpu.memory_space<vmem>>, vector<1x128x128xbf16>
    %59 = vector.shape_cast %58 : vector<1x128x128xbf16> to vector<128x128xbf16>
    %cst_32 = arith.constant dense<0.000000e+00> : vector<64x128xf32>
    %60 = tpu.matmul %57, %59, %cst_32 {dimension_numbers = #tpu.dot_dimension_numbers<[1], [0], [0], [1], [0, 0, 1, 1], [], []>} : vector<64x128xbf16>, vector<128x128xbf16>, vector<64x128xf32> -> vector<64x128xf32>
    %61 = arith.addf %55, %60 : vector<64x128xf32>
    %62 = vector.shape_cast %61 : vector<64x128xf32> to vector<8x8x128xf32>
    %63 = arith.truncf %62 : vector<8x8x128xf32> to vector<8x8x128xbf16>
    %c0_33 = arith.constant 0 : index
    %c0_34 = arith.constant 0 : index
    %c0_35 = arith.constant 0 : index
    %c0_36 = arith.constant 0 : index
    %64 = vector.load %arg3[%c0_33, %c0_34, %c0_35, %c0_36] : memref<1x8x8x128xbf16, #tpu.memory_space<vmem>>, vector<1x8x8x128xbf16>
    %65 = vector.shape_cast %64 : vector<1x8x8x128xbf16> to vector<8x8x128xbf16>
    %66 = vector.shape_cast %63 : vector<8x8x128xbf16> to vector<1x8x8x128xbf16>
    tpu.vector_store %arg3[%c0_33, %c0_34, %c0_35, %c0_36], %66 {strides = array<i32>} : memref<1x8x8x128xbf16, #tpu.memory_space<vmem>>, vector<1x8x8x128xbf16>,
    return
  }
  func.func @transform_0(%arg0: i32) -> (i32, i32, i32, i32) {
    %c0_i32 = arith.constant 0 : i32
    %c0_i32_0 = arith.constant 0 : i32
    %c0_i32_1 = arith.constant 0 : i32
    %c0_i32_2 = arith.constant 0 : i32
    return %arg0, %c0_i32, %c0_i32_0, %c0_i32_1 : i32, i32, i32, i32
  }
  func.func @transform_1(%arg0: i32) -> (i32, i32, i32) {
    %c0_i32 = arith.constant 0 : i32
    %c0_i32_0 = arith.constant 0 : i32
    %c0_i32_1 = arith.constant 0 : i32
    %c0_i32_2 = arith.constant 0 : i32
    return %c0_i32, %c0_i32_0, %c0_i32_1 : i32, i32, i32
  }
  func.func @transform_2(%arg0: i32) -> (i32, i32, i32, i32) {
    %c0_i32 = arith.constant 0 : i32
    %c0_i32_0 = arith.constant 0 : i32
    %c0_i32_1 = arith.constant 0 : i32
    %c0_i32_2 = arith.constant 0 : i32
    return %arg0, %c0_i32, %c0_i32_0, %c0_i32_1 : i32, i32, i32, i32
  }
}

module attributes {stable_mosaic.version = 11 : i64} {
  func.func @_conv_kernel(%arg0: i32, %arg1: memref<1x10x10x128xbf16, #tpu.memory_space<vmem>>, %arg2: memref<9x128x128xbf16, #tpu.memory_space<vmem>>, %arg3: memref<1x8x8x128xbf16, #tpu.memory_space<vmem>>, %arg4: memref<1x8x8x128xbf16, #tpu.memory_space<vmem>>) attributes {dimension_semantics = [#tpu.dimension_semantics<parallel>], iteration_bounds = array<i64: 2>, scalar_prefetch = 0 : i64, scratch_operands = 0 : i64, tpu.core_type = #tpu.core_type<tc>, window_params = [{transform_indices = @transform_0, window_bounds = array<i64: 1, 10, 10, 128>}, {pipeline_mode = #tpu.pipeline_mode<synchronous>, transform_indices = @transform_1, window_bounds = array<i64: 9, 128, 128>}, {transform_indices = @transform_2, window_bounds = array<i64: 1, 8, 8, 128>}, {transform_indices = @transform_3, window_bounds = array<i64: 1, 8, 8, 128>}]} {
    %c0 = arith.constant 0 : index
    %c0_0 = arith.constant 0 : index
    %c0_1 = arith.constant 0 : index
    %c0_2 = arith.constant 0 : index
    %0 = vector.load %arg1[%c0, %c0_0, %c0_1, %c0_2] : memref<1x10x10x128xbf16, #tpu.memory_space<vmem>>, vector<1x10x10x128xbf16>
    %1 = vector.shape_cast %0 : vector<1x10x10x128xbf16> to vector<10x10x128xbf16>
    %cst = arith.constant 0.000000e+00 : bf16
    %2 = vector.broadcast %cst : bf16 to vector<10x10x128xbf16>
    %3 = arith.cmpf oge, %1, %2 : vector<10x10x128xbf16>
    %cst_3 = arith.constant 1.000980e-02 : bf16
    %4 = vector.broadcast %cst_3 : bf16 to vector<10x10x128xbf16>
    %5 = arith.mulf %1, %4 : vector<10x10x128xbf16>
    %6 = arith.select %3, %1, %5 : vector<10x10x128xi1>, vector<10x10x128xbf16>
    %cst_4 = arith.constant 0.000000e+00 : f32
    %7 = vector.broadcast %cst_4 : f32 to vector<64x128xf32>
    %8 = vector.extract_strided_slice %6 {offsets = [0, 0, 0], sizes = [8, 8, 128], strides = [1, 1, 1]} : vector<10x10x128xbf16> to vector<8x8x128xbf16>
    %9 = vector.shape_cast %8 : vector<8x8x128xbf16> to vector<64x128xbf16>
    %c0_5 = arith.constant 0 : index
    %c0_6 = arith.constant 0 : index
    %c0_7 = arith.constant 0 : index
    %10 = vector.load %arg2[%c0_5, %c0_6, %c0_7] : memref<9x128x128xbf16, #tpu.memory_space<vmem>>, vector<1x128x128xbf16>
    %11 = vector.shape_cast %10 : vector<1x128x128xbf16> to vector<128x128xbf16>
    %cst_8 = arith.constant dense<0.000000e+00> : vector<64x128xf32>
    %12 = tpu.matmul %9, %11, %cst_8 {dimension_numbers = #tpu.dot_dimension_numbers<[1], [0], [0], [1], [0, 0, 1, 1], [], []>} : vector<64x128xbf16>, vector<128x128xbf16>, vector<64x128xf32> -> vector<64x128xf32>
    %13 = arith.addf %7, %12 : vector<64x128xf32>
    %14 = vector.extract_strided_slice %6 {offsets = [0, 1, 0], sizes = [8, 8, 128], strides = [1, 1, 1]} : vector<10x10x128xbf16> to vector<8x8x128xbf16>
    %15 = vector.shape_cast %14 : vector<8x8x128xbf16> to vector<64x128xbf16>
    %c1 = arith.constant 1 : index
    %c0_9 = arith.constant 0 : index
    %c0_10 = arith.constant 0 : index
    %16 = vector.load %arg2[%c1, %c0_9, %c0_10] : memref<9x128x128xbf16, #tpu.memory_space<vmem>>, vector<1x128x128xbf16>
    %17 = vector.shape_cast %16 : vector<1x128x128xbf16> to vector<128x128xbf16>
    %cst_11 = arith.constant dense<0.000000e+00> : vector<64x128xf32>
    %18 = tpu.matmul %15, %17, %cst_11 {dimension_numbers = #tpu.dot_dimension_numbers<[1], [0], [0], [1], [0, 0, 1, 1], [], []>} : vector<64x128xbf16>, vector<128x128xbf16>, vector<64x128xf32> -> vector<64x128xf32>
    %19 = arith.addf %13, %18 : vector<64x128xf32>
    %20 = vector.extract_strided_slice %6 {offsets = [0, 2, 0], sizes = [8, 8, 128], strides = [1, 1, 1]} : vector<10x10x128xbf16> to vector<8x8x128xbf16>
    %21 = vector.shape_cast %20 : vector<8x8x128xbf16> to vector<64x128xbf16>
    %c2 = arith.constant 2 : index
    %c0_12 = arith.constant 0 : index
    %c0_13 = arith.constant 0 : index
    %22 = vector.load %arg2[%c2, %c0_12, %c0_13] : memref<9x128x128xbf16, #tpu.memory_space<vmem>>, vector<1x128x128xbf16>
    %23 = vector.shape_cast %22 : vector<1x128x128xbf16> to vector<128x128xbf16>
    %cst_14 = arith.constant dense<0.000000e+00> : vector<64x128xf32>
    %24 = tpu.matmul %21, %23, %cst_14 {dimension_numbers = #tpu.dot_dimension_numbers<[1], [0], [0], [1], [0, 0, 1, 1], [], []>} : vector<64x128xbf16>, vector<128x128xbf16>, vector<64x128xf32> -> vector<64x128xf32>
    %25 = arith.addf %19, %24 : vector<64x128xf32>
    %26 = vector.extract_strided_slice %6 {offsets = [1, 0, 0], sizes = [8, 8, 128], strides = [1, 1, 1]} : vector<10x10x128xbf16> to vector<8x8x128xbf16>
    %27 = vector.shape_cast %26 : vector<8x8x128xbf16> to vector<64x128xbf16>
    %c3 = arith.constant 3 : index
    %c0_15 = arith.constant 0 : index
    %c0_16 = arith.constant 0 : index
    %28 = vector.load %arg2[%c3, %c0_15, %c0_16] : memref<9x128x128xbf16, #tpu.memory_space<vmem>>, vector<1x128x128xbf16>
    %29 = vector.shape_cast %28 : vector<1x128x128xbf16> to vector<128x128xbf16>
    %cst_17 = arith.constant dense<0.000000e+00> : vector<64x128xf32>
    %30 = tpu.matmul %27, %29, %cst_17 {dimension_numbers = #tpu.dot_dimension_numbers<[1], [0], [0], [1], [0, 0, 1, 1], [], []>} : vector<64x128xbf16>, vector<128x128xbf16>, vector<64x128xf32> -> vector<64x128xf32>
    %31 = arith.addf %25, %30 : vector<64x128xf32>
    %32 = vector.extract_strided_slice %6 {offsets = [1, 1, 0], sizes = [8, 8, 128], strides = [1, 1, 1]} : vector<10x10x128xbf16> to vector<8x8x128xbf16>
    %33 = vector.shape_cast %32 : vector<8x8x128xbf16> to vector<64x128xbf16>
    %c4 = arith.constant 4 : index
    %c0_18 = arith.constant 0 : index
    %c0_19 = arith.constant 0 : index
    %34 = vector.load %arg2[%c4, %c0_18, %c0_19] : memref<9x128x128xbf16, #tpu.memory_space<vmem>>, vector<1x128x128xbf16>
    %35 = vector.shape_cast %34 : vector<1x128x128xbf16> to vector<128x128xbf16>
    %cst_20 = arith.constant dense<0.000000e+00> : vector<64x128xf32>
    %36 = tpu.matmul %33, %35, %cst_20 {dimension_numbers = #tpu.dot_dimension_numbers<[1], [0], [0], [1], [0, 0, 1, 1], [], []>} : vector<64x128xbf16>, vector<128x128xbf16>, vector<64x128xf32> -> vector<64x128xf32>
    %37 = arith.addf %31, %36 : vector<64x128xf32>
    %38 = vector.extract_strided_slice %6 {offsets = [1, 2, 0], sizes = [8, 8, 128], strides = [1, 1, 1]} : vector<10x10x128xbf16> to vector<8x8x128xbf16>
    %39 = vector.shape_cast %38 : vector<8x8x128xbf16> to vector<64x128xbf16>
    %c5 = arith.constant 5 : index
    %c0_21 = arith.constant 0 : index
    %c0_22 = arith.constant 0 : index
    %40 = vector.load %arg2[%c5, %c0_21, %c0_22] : memref<9x128x128xbf16, #tpu.memory_space<vmem>>, vector<1x128x128xbf16>
    %41 = vector.shape_cast %40 : vector<1x128x128xbf16> to vector<128x128xbf16>
    %cst_23 = arith.constant dense<0.000000e+00> : vector<64x128xf32>
    %42 = tpu.matmul %39, %41, %cst_23 {dimension_numbers = #tpu.dot_dimension_numbers<[1], [0], [0], [1], [0, 0, 1, 1], [], []>} : vector<64x128xbf16>, vector<128x128xbf16>, vector<64x128xf32> -> vector<64x128xf32>
    %43 = arith.addf %37, %42 : vector<64x128xf32>
    %44 = vector.extract_strided_slice %6 {offsets = [2, 0, 0], sizes = [8, 8, 128], strides = [1, 1, 1]} : vector<10x10x128xbf16> to vector<8x8x128xbf16>
    %45 = vector.shape_cast %44 : vector<8x8x128xbf16> to vector<64x128xbf16>
    %c6 = arith.constant 6 : index
    %c0_24 = arith.constant 0 : index
    %c0_25 = arith.constant 0 : index
    %46 = vector.load %arg2[%c6, %c0_24, %c0_25] : memref<9x128x128xbf16, #tpu.memory_space<vmem>>, vector<1x128x128xbf16>
    %47 = vector.shape_cast %46 : vector<1x128x128xbf16> to vector<128x128xbf16>
    %cst_26 = arith.constant dense<0.000000e+00> : vector<64x128xf32>
    %48 = tpu.matmul %45, %47, %cst_26 {dimension_numbers = #tpu.dot_dimension_numbers<[1], [0], [0], [1], [0, 0, 1, 1], [], []>} : vector<64x128xbf16>, vector<128x128xbf16>, vector<64x128xf32> -> vector<64x128xf32>
    %49 = arith.addf %43, %48 : vector<64x128xf32>
    %50 = vector.extract_strided_slice %6 {offsets = [2, 1, 0], sizes = [8, 8, 128], strides = [1, 1, 1]} : vector<10x10x128xbf16> to vector<8x8x128xbf16>
    %51 = vector.shape_cast %50 : vector<8x8x128xbf16> to vector<64x128xbf16>
    %c7 = arith.constant 7 : index
    %c0_27 = arith.constant 0 : index
    %c0_28 = arith.constant 0 : index
    %52 = vector.load %arg2[%c7, %c0_27, %c0_28] : memref<9x128x128xbf16, #tpu.memory_space<vmem>>, vector<1x128x128xbf16>
    %53 = vector.shape_cast %52 : vector<1x128x128xbf16> to vector<128x128xbf16>
    %cst_29 = arith.constant dense<0.000000e+00> : vector<64x128xf32>
    %54 = tpu.matmul %51, %53, %cst_29 {dimension_numbers = #tpu.dot_dimension_numbers<[1], [0], [0], [1], [0, 0, 1, 1], [], []>} : vector<64x128xbf16>, vector<128x128xbf16>, vector<64x128xf32> -> vector<64x128xf32>
    %55 = arith.addf %49, %54 : vector<64x128xf32>
    %56 = vector.extract_strided_slice %6 {offsets = [2, 2, 0], sizes = [8, 8, 128], strides = [1, 1, 1]} : vector<10x10x128xbf16> to vector<8x8x128xbf16>
    %57 = vector.shape_cast %56 : vector<8x8x128xbf16> to vector<64x128xbf16>
    %c8 = arith.constant 8 : index
    %c0_30 = arith.constant 0 : index
    %c0_31 = arith.constant 0 : index
    %58 = vector.load %arg2[%c8, %c0_30, %c0_31] : memref<9x128x128xbf16, #tpu.memory_space<vmem>>, vector<1x128x128xbf16>
    %59 = vector.shape_cast %58 : vector<1x128x128xbf16> to vector<128x128xbf16>
    %cst_32 = arith.constant dense<0.000000e+00> : vector<64x128xf32>
    %60 = tpu.matmul %57, %59, %cst_32 {dimension_numbers = #tpu.dot_dimension_numbers<[1], [0], [0], [1], [0, 0, 1, 1], [], []>} : vector<64x128xbf16>, vector<128x128xbf16>, vector<64x128xf32> -> vector<64x128xf32>
    %61 = arith.addf %55, %60 : vector<64x128xf32>
    %62 = vector.shape_cast %61 : vector<64x128xf32> to vector<8x8x128xf32>
    %c0_33 = arith.constant 0 : index
    %c0_34 = arith.constant 0 : index
    %c0_35 = arith.constant 0 : index
    %c0_36 = arith.constant 0 : index
    %63 = vector.load %arg3[%c0_33, %c0_34, %c0_35, %c0_36] : memref<1x8x8x128xbf16, #tpu.memory_space<vmem>>, vector<1x8x8x128xbf16>
    %64 = vector.shape_cast %63 : vector<1x8x8x128xbf16> to vector<8x8x128xbf16>
    %65 = arith.extf %64 : vector<8x8x128xbf16> to vector<8x8x128xf32>
    %66 = arith.addf %62, %65 : vector<8x8x128xf32>
    %67 = arith.truncf %66 : vector<8x8x128xf32> to vector<8x8x128xbf16>
    %c0_37 = arith.constant 0 : index
    %c0_38 = arith.constant 0 : index
    %c0_39 = arith.constant 0 : index
    %c0_40 = arith.constant 0 : index
    %68 = vector.load %arg4[%c0_37, %c0_38, %c0_39, %c0_40] : memref<1x8x8x128xbf16, #tpu.memory_space<vmem>>, vector<1x8x8x128xbf16>
    %69 = vector.shape_cast %68 : vector<1x8x8x128xbf16> to vector<8x8x128xbf16>
    %70 = vector.shape_cast %67 : vector<8x8x128xbf16> to vector<1x8x8x128xbf16>
    tpu.vector_store %arg4[%c0_37, %c0_38, %c0_39, %c0_40], %70 {strides = array<i32>} : memref<1x8x8x128xbf16, #tpu.memory_space<vmem>>, vector<1x8x8x128xbf16>,
    return
  }
  func.func @transform_0(%arg0: i32) -> (i32, i32, i32, i32) {
    %c0_i32 = arith.constant 0 : i32
    %c0_i32_0 = arith.constant 0 : i32
    %c0_i32_1 = arith.constant 0 : i32
    %c0_i32_2 = arith.constant 0 : i32
    return %arg0, %c0_i32, %c0_i32_0, %c0_i32_1 : i32, i32, i32, i32
  }
  func.func @transform_1(%arg0: i32) -> (i32, i32, i32) {
    %c0_i32 = arith.constant 0 : i32
    %c0_i32_0 = arith.constant 0 : i32
    %c0_i32_1 = arith.constant 0 : i32
    %c0_i32_2 = arith.constant 0 : i32
    return %c0_i32, %c0_i32_0, %c0_i32_1 : i32, i32, i32
  }
  func.func @transform_2(%arg0: i32) -> (i32, i32, i32, i32) {
    %c0_i32 = arith.constant 0 : i32
    %c0_i32_0 = arith.constant 0 : i32
    %c0_i32_1 = arith.constant 0 : i32
    %c0_i32_2 = arith.constant 0 : i32
    return %arg0, %c0_i32, %c0_i32_0, %c0_i32_1 : i32, i32, i32, i32
  }
  func.func @transform_3(%arg0: i32) -> (i32, i32, i32, i32) {
    %c0_i32 = arith.constant 0 : i32
    %c0_i32_0 = arith.constant 0 : i32
    %c0_i32_1 = arith.constant 0 : i32
    %c0_i32_2 = arith.constant 0 : i32
    return %arg0, %c0_i32, %c0_i32_0, %c0_i32_1 : i32, i32, i32, i32
  }
}

</mosaic_0001>

<bundles_post_ra>
// kernel: wide_block.6
= control target key start
LH: loop header
LB: loop body
LE: loop exit
PB: predicated region body
PF: predicated region fallthrough
CT: control target
= control target key end

     0   :  { %s541_s9 = smov 0   ;;  %s599_s0 = inlined_call_operand.vmem [shape: bf16[2,8,8,128], index: 0, kind: input, shape index: {}]   ;;  %s600_s1 = inlined_call_operand.vmem [shape: bf16[1,128,128], index: 1, kind: input, shape index: {}]   ;;  %s601_s2 = inlined_call_operand.vmem [shape: bf16[2,8,8,128], index: 2, kind: output, shape index: {}]  }
   0x1 LB: > { %s402_s10 = sadd.s32 4294967295, %s524_s9   ;;  %p406_p0 = scmp.ge.s32.totalorder %s524_s9, 1  ;;  %s524_s9 = sphi %s541_s9, %s12_s9  }
   0x2   : > { %p112_p1 = scmp.lt.s32.totalorder %s524_s9, 3 }
   0x4   : > { %p113_p2 = pnand %p406_p0, %p112_p1 }
   0x5   : > { %v510_v0 = vld [vmem:[%s600_s1] sm:$0xff] (!%p113_p2)   ;;  %p134_p3 = scmp.lt.s32.totalorder (!%p113_p2), %s402_s10, 1  ;;  %v511_v1 = vld [vmem:[%s600_s1 + $0x8] sm:$0xff] (!%p113_p2)   ;;  %v512_v2 = vld [vmem:[%s600_s1 + $0x10] sm:$0xff] (!%p113_p2)  }
   0x6   : > { %116 = sbr.rel (%p113_p2) target bundleno = 256 (0x100), region = 28  ;;  %462 = vmatprep.subr.bf16.mxu0 (!%p113_p2), %v510_v0  ;;  %486 = vmatprep.subr.bf16.mxu1 (!%p113_p2), %v510_v0  ;;  %v513_v3 = vld [vmem:[%s600_s1 + $0x18] sm:$0xff] (!%p113_p2)   ;;  %v514_v14 = vld [vmem:[%s600_s1 + $0x20] sm:$0xff] (!%p113_p2)   ;;  %v515_v19 = vld [vmem:[%s600_s1 + $0x28] sm:$0xff] (!%p113_p2)  }
   0x7   : > { %463 = vmatpush3.bf16.msra.mxu0 (!%p113_p2), %v510_v0  ;;  %494 = vmatpush3.bf16.msra.mxu1 (!%p113_p2), %v510_v0  ;;  %v516_v20 = vld [vmem:[%s600_s1 + $0x30] sm:$0xff] (!%p113_p2)   ;;  %v517_v29 = vld [vmem:[%s600_s1 + $0x38] sm:$0xff] (!%p113_p2)  }
   0x8   : > { %464 = vmatprep.subr.bf16.mxu0 (!%p113_p2), %v511_v1  ;;  %487 = vmatprep.subr.bf16.mxu1 (!%p113_p2), %v511_v1 }
   0xb   : > { %465 = vmatpush3.bf16.msra.mxu0 (!%p113_p2), %v511_v1  ;;  %495 = vmatpush3.bf16.msra.mxu1 (!%p113_p2), %v511_v1 }
   0xc   : > { %466 = vmatprep.subr.bf16.mxu0 (!%p113_p2), %v512_v2  ;;  %488 = vmatprep.subr.bf16.mxu1 (!%p113_p2), %v512_v2 }
   0xd   : > { %s603_s10 = smov (!%p134_p3, %s402_s10), 1 }
   0xe   : > { %s425_s17 = sshll.u32 %s603_s10, 5 }
   0xf   : > { %s566_s20 = scalar_lea.vmem %s599_s0, %s425_s17  ;;  %467 = vmatpush3.bf16.msra.mxu0 %v512_v2  ;;  %496 = vmatpush3.bf16.msra.mxu1 %v512_v2  ;;  %s143_s5 = scalar_lea.vmem %s601_s2, %s425_s17 }
  0x10   : > { %v146_v4 = vld [vmem:[%s566_s20] sm:$0xf]  ;;  %v147_v5 = vld [vmem:[%s566_s20 + $0x4] sm:$0xf]  ;;  %v150_v6 = vld [vmem:[%s566_s20 + $0x10] sm:$0xf]  ;;  %468 = vmatprep.subr.bf16.mxu0 %v513_v3  ;;  %489 = vmatprep.subr.bf16.mxu1 %v513_v3 }
  0x11   : > { %vm154_vm0 = vcmp.ge.bf16.partialorder %v146_v4, 0  ;;  %vm155_vm1 = vcmp.ge.bf16.partialorder %v147_v5, 0  ;;  %v162_v7 = vmul.bf16 1009007652, %v146_v4  ;;  %v163_v8 = vmul.bf16 1009007652, %v147_v5 }
  0x12   : > { %v151_v9 = vld [vmem:[%s566_s20 + $0x14] sm:$0xf]  ;;  %vm158_vm2 = vcmp.ge.bf16.partialorder %v150_v6, 0  ;;  %v166_v10 = vmul.bf16 1009007652, %v150_v6 }
  0x13   : > { %v170_v11 = vsel %vm154_vm0, %v146_v4, %v162_v7  ;;  %v171_v12 = vsel %vm155_vm1, %v147_v5, %v163_v8  ;;  %vm159_vm3 = vcmp.ge.bf16.partialorder %v151_v9, 0  ;;  %v167_v13 = vmul.bf16 1009007652, %v151_v9  ;;  %469 = vmatpush3.bf16.msra.mxu0 %v513_v3  ;;  %497 = vmatpush3.bf16.msra.mxu1 %v513_v3  ;;  %v148_v21 = vld [vmem:[%s566_s20 + $0x8] sm:$0xf] }
  0x14   : > { %v411_v15 = vcombine.low %v170_v11, %v171_v12  ;;  %v174_v16 = vsel %vm158_vm2, %v150_v6, %v166_v10  ;;  %470 = vmatprep.subr.bf16.mxu0 %v514_v14  ;;  %490 = vmatprep.subr.bf16.mxu1 %v514_v14  ;;  %v149_v22 = vld [vmem:[%s566_s20 + $0xc] sm:$0xf]  ;;  %v152_v23 = vld [vmem:[%s566_s20 + $0x18] sm:$0xf]  ;;  %v153_v24 = vld [vmem:[%s566_s20 + $0x1c] sm:$0xf] }
  0x15   : > { %v175_v17 = vsel %vm159_vm3, %v151_v9, %v167_v13  ;;  %vm156_vm4 = vcmp.ge.bf16.partialorder %v148_v21, 0  ;;  %v164_v25 = vmul.bf16 1009007652, %v148_v21  ;;  %v165_v26 = vmul.bf16 1009007652, %v149_v22 }
  0x16   : > { %478 = vmatprep.mubr.bf16.mxu0 %v411_v15  ;;  %v413_v18 = vcombine.low %v174_v16, %v175_v17  ;;  %v168_v27 = vmul.bf16 1009007652, %v152_v23  ;;  %v169_v28 = vmul.bf16 1009007652, %v153_v24  ;;  %vm157_vm5 = vcmp.ge.bf16.partialorder %v149_v22, 0 }
  0x17   : > { %471 = vmatpush3.bf16.msra.mxu0 %v514_v14  ;;  %498 = vmatpush3.bf16.msra.mxu1 %v514_v14  ;;  %vm160_vm6 = vcmp.ge.bf16.partialorder %v152_v23, 0  ;;  %vm161_vm7 = vcmp.ge.bf16.partialorder %v153_v24, 0  ;;  %v172_v30 = vsel %vm156_vm4, %v148_v21, %v164_v25  ;;  %v173_v31 = vsel %vm157_vm5, %v149_v22, %v165_v26 }
  0x18   : > { %482 = vmatprep.mubr.bf16.mxu1 %v413_v18  ;;  %472 = vmatprep.subr.bf16.mxu0 %v515_v19  ;;  %v176_v32 = vsel %vm160_vm6, %v152_v23, %v168_v27  ;;  %v177_v33 = vsel %vm161_vm7, %v153_v24, %v169_v28  ;;  %v412_v34 = vcombine.low %v172_v30, %v173_v31 }
  0x19   : > { %491 = vmatprep.subr.bf16.mxu1 %v515_v19  ;;  %v414_v35 = vcombine.low %v176_v32, %v177_v33 }
  0x1b   : > { %473 = vmatpush3.bf16.msra.mxu0 %v515_v19  ;;  %499 = vmatpush3.bf16.msra.mxu1 %v515_v19 }
  0x1c   : > { %474 = vmatprep.subr.bf16.mxu0 %v516_v20  ;;  %492 = vmatprep.subr.bf16.mxu1 %v516_v20 }
  0x1f   : > { %475 = vmatpush3.bf16.msra.mxu0 %v516_v20  ;;  %500 = vmatpush3.bf16.msra.mxu1 %v516_v20 }
  0x20   : > { %476 = vmatprep.subr.bf16.mxu0 %v517_v29  ;;  %493 = vmatprep.subr.bf16.mxu1 %v517_v29 }
  0x23   : > { %477 = vmatpush3.bf16.msra.mxu0 %v517_v29  ;;  %501 = vmatpush3.bf16.msra.mxu1 %v517_v29 }
  0x26   : > { %479 = vmatmul.mubr.bf16.vlgmr.msra.gmra.mrb[0].mxu0 %v412_v34  ;;  %483 = vmatmul.mubr.bf16.vlgmr.msra.gmra.mrb[0].mxu1 %v414_v35 }
  0xf9   : > { %v480_v36 = vpop.f32.mrb[0].mxu0  ;;  %v484_v37 = vpop.f32.mrb[0].mxu1 }
  0xfa   : > { %v300_v38 = vpop.f32.mrb[1].mxu0  ;;  %v316_v39 = vpop.f32.mrb[1].mxu1 }
  0xfb   : > { %v481_v40 = vpop.f32.mrb[2].mxu0  ;;  %v485_v41 = vpop.f32.mrb[2].mxu1 }
  0xfc   : > { %v435_v42 = vpack.c.bf16 %v481_v40, %v480_v36  ;;  %v445_v43 = vpack.c.bf16 %v485_v41, %v484_v37  ;;  %v303_v44 = vpop.f32.mrb[3].mxu0  ;;  %v319_v45 = vpop.f32.mrb[3].mxu1 }
  0xfd   : > { %v430_v46 = vpack.c.bf16 %v303_v44, %v300_v38  ;;  %v440_v47 = vpack.c.bf16 %v319_v45, %v316_v39 }
  0xfe   : > { %447 = vst [vmem:[%s143_s5 + $0x8] sm:$0xff] %v435_v42   ;;  %449 = vst [vmem:[%s143_s5 + $0x18] sm:$0xff] %v445_v43  }
  0xff   : > { %431 = vst [vmem:[%s143_s5] sm:$0xff] %v430_v46   ;;  %448 = vst [vmem:[%s143_s5 + $0x10] sm:$0xff] %v440_v47  }
 0x100 PF: > { %s12_s9 = sadd.s32 1, %s524_s9  }
 0x101   : > { %p9_p4 = scmp.ge.s32.totalorder %s12_s9, 4  }
 0x103   :  { %11 = sbr.rel (!%p9_p4) target bundleno = 1 (0x1), region = 58 }

// kernel: wide_block.5
= control target key start
LH: loop header
LB: loop body
LE: loop exit
PB: predicated region body
PF: predicated region fallthrough
CT: control target
= control target key end

     0   :  { %s1374_s9 = smov 0   ;;  %s1613_s0 = inlined_call_operand.vmem [shape: bf16[2,9,9,128], index: 0, kind: input, shape index: {}]   ;;  %s1614_s1 = inlined_call_operand.vmem [shape: bf16[4,128,128], index: 1, kind: input, shape index: {}]   ;;  %s1615_s2 = inlined_call_operand.vmem [shape: bf16[2,8,8,128], index: 2, kind: output, shape index: {}]  }
   0x1 LB: > { %s1012_s10 = sadd.s32 4294967295, %s1357_s9   ;;  %p1016_p0 = scmp.ge.s32.totalorder %s1357_s9, 1  ;;  %s1357_s9 = sphi %s1374_s9, %s12_s9  }
   0x2   : > { %p112_p1 = scmp.lt.s32.totalorder %s1357_s9, 3 }
   0x4   : > { %p113_p2 = pnand %p1016_p0, %p112_p1 }
   0x5   : > { %v1319_v0 = vld [vmem:[%s1614_s1 + $0x40] sm:$0xff] (!%p113_p2)   ;;  %p134_p3 = scmp.lt.s32.totalorder (!%p113_p2), %s1012_s10, 1  ;;  %v1321_v2 = vld [vmem:[%s1614_s1 + $0x48] sm:$0xff] (!%p113_p2)   ;;  %v1323_v4 = vld [vmem:[%s1614_s1 + $0x50] sm:$0xff] (!%p113_p2)   ;;  %vm234_vm6 = vsmask.f32 (!%p113_p2), 3328 }
   0x6   : > { %116 = sbr.rel (%p113_p2) target bundleno = 303 (0x12f), region = 28  ;;  %v1320_v1 = vld [vmem:[%s1614_s1 + $0x80] sm:$0xff] (!%p113_p2)   ;;  %1190 = vmatprep.subr.bf16.mxu1 (!%p113_p2), %v1319_v0  ;;  %v1322_v3 = vld [vmem:[%s1614_s1 + $0x88] sm:$0xff] (!%p113_p2)   ;;  %v1324_v5 = vld [vmem:[%s1614_s1 + $0x90] sm:$0xff] (!%p113_p2)   ;;  %vm235_vm7 = vsmask.f32 (!%p113_p2), 7440 }
   0x7   : > { %1238 = vmatprep.subr.bf16.mxu0 (!%p113_p2), %v1320_v1  ;;  %1191 = vmatpush3.bf16.msra.mxu1 (!%p113_p2), %v1319_v0  ;;  %v1325_v6 = vld [vmem:[%s1614_s1 + $0x58] sm:$0xff] (!%p113_p2)   ;;  %v1327_v8 = vld [vmem:[%s1614_s1 + $0x60] sm:$0xff] (!%p113_p2)   ;;  %v1329_v10 = vld [vmem:[%s1614_s1 + $0x68] sm:$0xff] (!%p113_p2)  }
   0x8   : > { %1239 = vmatpush3.bf16.msra.mxu0 (!%p113_p2), %v1320_v1  ;;  %1192 = vmatprep.subr.bf16.mxu1 (!%p113_p2), %v1321_v2  ;;  %v1326_v7 = vld [vmem:[%s1614_s1 + $0x98] sm:$0xff] (!%p113_p2)   ;;  %v1328_v9 = vld [vmem:[%s1614_s1 + $0xa0] sm:$0xff] (!%p113_p2)   ;;  %v1330_v11 = vld [vmem:[%s1614_s1 + $0xa8] sm:$0xff] (!%p113_p2)  }
   0x9   : > { %1240 = vmatprep.subr.bf16.mxu0 (!%p113_p2), %v1322_v3  ;;  %v1331_v18 = vld [vmem:[%s1614_s1 + $0x70] sm:$0xff] (!%p113_p2)   ;;  %v1333_v31 = vld [vmem:[%s1614_s1 + $0x78] sm:$0xff] (!%p113_p2)   ;;  %v1467_v50 = vld [vmem:[%s1614_s1] sm:$0xff] (!%p113_p2)  }
   0xa   : > { %v1332_v19 = vld [vmem:[%s1614_s1 + $0xb0] sm:$0xff] (!%p113_p2)   ;;  %v1334_v40 = vld [vmem:[%s1614_s1 + $0xb8] sm:$0xff] (!%p113_p2)   ;;  %v1336_v56 = vld [vmem:[%s1614_s1 + $0xc0] sm:$0xff] (!%p113_p2)  }
   0xb   : > { %1193 = vmatpush3.bf16.msra.mxu1 (!%p113_p2), %v1321_v2  ;;  %vm1477_vm8 = vmor (!%p113_p2), %vm234_vm6, %vm235_vm7 }
   0xc   : > { %1241 = vmatpush3.bf16.msra.mxu0 (!%p113_p2), %v1322_v3  ;;  %1194 = vmatprep.subr.bf16.mxu1 (!%p113_p2), %v1323_v4 }
   0xd   : > { %s1619_s10 = smov (!%p134_p3, %s1012_s10), 1  ;;  %1242 = vmatprep.subr.bf16.mxu0 %v1324_v5 }
   0xe   : > { %s1310_s27 = smul.u32 72, %s1619_s10 }
   0xf   : > { %1195 = vmatpush3.bf16.msra.mxu1 %v1323_v4 }
  0x10   : > { %1243 = vmatpush3.bf16.msra.mxu0 %v1324_v5  ;;  %1196 = vmatprep.subr.bf16.mxu1 %v1325_v6  ;;  %s1418_s6 = scalar_lea.vmem %s1613_s0, %s1310_s27  ;;  %s1118_s27 = sshll.u32 %s1619_s10, 5 }
  0x11   : > { %1244 = vmatprep.subr.bf16.mxu0 %v1326_v7  ;;  %v146_v12 = vld [vmem:[%s1418_s6] sm:$0xf]  ;;  %v147_v13 = vld [vmem:[%s1418_s6 + $0x4] sm:$0x1]  ;;  %v148_v14 = vld [vmem:[%s1418_s6 + $0x8] sm:$0xf]  ;;  %s143_s30 = scalar_lea.vmem %s1615_s2, %s1118_s27 }
  0x12   : > { %v149_v15 = vld [vmem:[%s1418_s6 + $0xc] sm:$0x1]  ;;  %v150_v16 = vld [vmem:[%s1418_s6 + $0x10] sm:$0xf]  ;;  %v151_v17 = vld [vmem:[%s1418_s6 + $0x14] sm:$0x1] }
  0x13   : > { %1197 = vmatpush3.bf16.msra.mxu1 %v1325_v6  ;;  %vm164_vm0 = vcmp.ge.bf16.partialorder %v146_v12, 0  ;;  %vm165_vm1 = vcmp.ge.bf16.partialorder %v147_v13, 0  ;;  %vm166_vm2 = vcmp.ge.bf16.partialorder %v148_v14, 0  ;;  %vm167_vm3 = vcmp.ge.bf16.partialorder %v149_v15, 0  ;;  %v152_v39 = vld [vmem:[%s1418_s6 + $0x18] sm:$0xf] }
  0x14   : > { %1245 = vmatpush3.bf16.msra.mxu0 %v1326_v7  ;;  %1198 = vmatprep.subr.bf16.mxu1 %v1327_v8  ;;  %vm168_vm4 = vcmp.ge.bf16.partialorder %v150_v16, 0  ;;  %vm169_vm5 = vcmp.ge.bf16.partialorder %v151_v17, 0  ;;  %v182_v20 = vmul.bf16 1009007652, %v146_v12  ;;  %v183_v21 = vmul.bf16 1009007652, %v147_v13 }
  0x15   : > { %1246 = vmatprep.subr.bf16.mxu0 %v1328_v9  ;;  %v184_v22 = vmul.bf16 1009007652, %v148_v14  ;;  %v185_v23 = vmul.bf16 1009007652, %v149_v15  ;;  %v186_v24 = vmul.bf16 1009007652, %v150_v16 }
  0x16   : > { %v187_v25 = vmul.bf16 1009007652, %v151_v17  ;;  %v1439_v26 = vsel %vm164_vm0, %v146_v12, %v182_v20  ;;  %v201_v27 = vsel %vm165_vm1, %v147_v13, %v183_v21  ;;  %v153_v45 = vld [vmem:[%s1418_s6 + $0x1c] sm:$0x1]  ;;  %v154_v51 = vld [vmem:[%s1418_s6 + $0x20] sm:$0xf] }
  0x17   : > { %1199 = vmatpush3.bf16.msra.mxu1 %v1327_v8  ;;  %v1443_v28 = vsel %vm166_vm2, %v148_v14, %v184_v22  ;;  %v203_v29 = vsel %vm167_vm3, %v149_v15, %v185_v23  ;;  %v1447_v30 = vsel %vm168_vm4, %v150_v16, %v186_v24  ;;  %v238_v32 = vshrl.u32 %v1439_v26, 16 }
  0x18   : > { %1247 = vmatpush3.bf16.msra.mxu0 %v1328_v9  ;;  %1200 = vmatprep.subr.bf16.mxu1 %v1329_v10  ;;  %v241_v33 = vshll.u32 %v1439_v26, 16  ;;  %v247_v34 = vshll.u32 %v201_v27, 16  ;;  %v252_v35 = vshrl.u32 %v1443_v28, 16  ;;  %v255_v36 = vshll.u32 %v1443_v28, 16  ;;  %v155_v27 = vld [vmem:[%s1418_s6 + $0x24] sm:$0x1] }
  0x19   : > { %1248 = vmatprep.subr.bf16.mxu0 %v1330_v11  ;;  %v261_v37 = vshll.u32 %v203_v29, 16  ;;  %v266_v38 = vshrl.u32 %v1447_v30, 16  ;;  %v205_v41 = vsel %vm169_vm5, %v151_v17, %v187_v25  ;;  %v240_v42 = vrot.slane %v238_v32, 4  ;;  %v1338_v17 = vld [vmem:[%s1614_s1 + $0xc8] sm:$0xff]   ;;  %v1340_v25 = vld [vmem:[%s1614_s1 + $0xd0] sm:$0xff]  }
  0x1a   : > { %v243_v43 = vrot.slane %v241_v33, 5  ;;  %v269_v44 = vshll.u32 %v1447_v30, 16  ;;  %v249_v46 = vrot.slane %v247_v34, 5  ;;  %v254_v47 = vrot.slane %v252_v35, 4  ;;  %v156_v32 = vld [vmem:[%s1418_s6 + $0x28] sm:$0xf] }
  0x1b   : > { %1201 = vmatpush3.bf16.msra.mxu1 %v1329_v10  ;;  %v257_v48 = vrot.slane %v255_v36, 5  ;;  %v268_v49 = vrot.slane %v266_v38, 4  ;;  %v263_v53 = vrot.slane %v261_v37, 5  ;;  %v1076_v55 = vcombine.low %v1443_v28, %v1447_v30  ;;  %v157_v33 = vld [vmem:[%s1418_s6 + $0x2c] sm:$0x1]  ;;  %v1342_v38 = vld [vmem:[%s1614_s1 + $0xd8] sm:$0xff]  }
  0x1c   : > { %1249 = vmatpush3.bf16.msra.mxu0 %v1330_v11  ;;  %1202 = vmatprep.subr.bf16.mxu1 %v1331_v18  ;;  %v244_v52 = vor.u32 %v243_v43, %v240_v42  ;;  %v271_v54 = vrot.slane %v269_v44, 5  ;;  %vm170_vm9 = vcmp.ge.bf16.partialorder %v152_v39, 0  ;;  %vm171_vm10 = vcmp.ge.bf16.partialorder %v153_v45, 0  ;;  %v158_v37 = vld [vmem:[%s1418_s6 + $0x30] sm:$0xf] }
  0x1d   : > { %1250 = vmatprep.subr.bf16.mxu0 %v1332_v19  ;;  %v258_v58 = vor.u32 %v257_v48, %v254_v47  ;;  %v188_v59 = vmul.bf16 1009007652, %v152_v39  ;;  %v275_v62 = vshll.u32 %v205_v41, 16  ;;  %1254 = vmatprep.mubr.bf16.mxu0 %v1076_v55  ;;  %v189_v63 = vmul.bf16 1009007652, %v153_v45  ;;  %v1344_v55 = vld [vmem:[%s1614_s1 + $0xe0] sm:$0xff]  }
  0x1e   : > { %v245_v60 = vrot.slane %v244_v52, 4  ;;  %v272_v61 = vor.u32 %v271_v54, %v268_v49  ;;  %vm172_vm11 = vcmp.ge.bf16.partialorder %v154_v51, 0  ;;  %v190_v2 = vmul.bf16 1009007652, %v154_v51  ;;  %v159_v43 = vld [vmem:[%s1418_s6 + $0x34] sm:$0x1] }
  0x1f   : > { %1203 = vmatpush3.bf16.msra.mxu1 %v1331_v18  ;;  %v259_v0 = vrot.slane %v258_v58, 4  ;;  %v1481_v1 = vsel %vm170_vm9, %v152_v39, %v188_v59  ;;  %v207_v4 = vsel %vm171_vm10, %v153_v45, %v189_v63  ;;  %v277_v10 = vrot.slane %v275_v62, 5  ;;  %v160_v44 = vld [vmem:[%s1418_s6 + $0x38] sm:$0xf]  ;;  %v161_v49 = vld [vmem:[%s1418_s6 + $0x3c] sm:$0x1] }
  0x20   : > { %1251 = vmatpush3.bf16.msra.mxu0 %v1332_v19  ;;  %1204 = vmatprep.subr.bf16.mxu1 %v1333_v31  ;;  %v250_v3 = vsel %vm1477_vm8, %v245_v60, %v249_v46  ;;  %v280_v5 = vshrl.u32 %v1481_v1, 16  ;;  %v283_v7 = vshll.u32 %v1481_v1, 16  ;;  %v289_v8 = vshll.u32 %v207_v4, 16  ;;  %v1341_v4 = vld [vmem:[%s1614_s1 + $0x18] sm:$0xff]  }
  0x21   : > { %1252 = vmatprep.subr.bf16.mxu0 %v1334_v40  ;;  %v1488_v6 = vsel %vm1477_vm8, %v259_v0, %v263_v53  ;;  %v1492_v9 = vsel %vm172_vm11, %v154_v51, %v190_v2  ;;  %v273_v14 = vrot.slane %v272_v61, 4  ;;  %vm173_vm12 = vcmp.ge.bf16.partialorder %v155_v27, 0  ;;  %v1339_v51 = vld [vmem:[%s1614_s1 + $0x10] sm:$0xff]   ;;  %v162_v61 = vld [vmem:[%s1418_s6 + $0x40] sm:$0xf] }
  0x22   : > { %v1036_v11 = vcombine.low %v250_v3, %v1488_v6  ;;  %v282_v12 = vrot.slane %v280_v5, 4  ;;  %v294_v13 = vshrl.u32 %v1492_v9, 16  ;;  %v285_v15 = vrot.slane %v283_v7, 5 }
  0x23   : > { %1205 = vmatpush3.bf16.msra.mxu1 %v1333_v31  ;;  %v297_v16 = vshll.u32 %v1492_v9, 16  ;;  %v1077_v18 = vcombine.low %v1481_v1, %v1492_v9  ;;  %v291_v20 = vrot.slane %v289_v8, 5  ;;  %v1504_v23 = vsel %vm1477_vm8, %v273_v14, %v277_v10  ;;  %v1337_v31 = vld [vmem:[%s1614_s1 + $0x8] sm:$0xff]  }
  0x24   : > { %1253 = vmatpush3.bf16.msra.mxu0 %v1334_v40  ;;  %1214 = vmatprep.subr.bf16.mxu1 %v1467_v50  ;;  %v286_v19 = vor.u32 %v285_v15, %v282_v12  ;;  %v296_v21 = vrot.slane %v294_v13, 4  ;;  %vm174_vm13 = vcmp.ge.bf16.partialorder %v156_v32, 0  ;;  %vm175_vm14 = vcmp.ge.bf16.partialorder %v157_v33, 0  ;;  %v1346_v14 = vld [vmem:[%s1614_s1 + $0xe8] sm:$0xff]  }
  0x25   : > { %1262 = vmatprep.subr.bf16.mxu0 %v1336_v56  ;;  %1206 = vmatprep.mubr.bf16.mxu1 %v1036_v11  ;;  %v299_v22 = vrot.slane %v297_v16, 5  ;;  %v191_v36 = vmul.bf16 1009007652, %v155_v27  ;;  %v192_v39 = vmul.bf16 1009007652, %v156_v32  ;;  %vm176_vm15 = vcmp.ge.bf16.partialorder %v158_v37, 0 }
  0x26   : > { %v287_v24 = vrot.slane %v286_v19, 4  ;;  %v193_v40 = vmul.bf16 1009007652, %v157_v33  ;;  %v194_v42 = vmul.bf16 1009007652, %v158_v37  ;;  %vm177_vm0 = vcmp.ge.bf16.partialorder %v159_v43, 0 }
  0x27   : > { %1255 = vmatmul.mubr.bf16.vlgmr.msra.gmra.mrb[0].mxu0 %v1077_v18  ;;  %v300_v34 = vor.u32 %v299_v22, %v296_v21  ;;  %v209_v41 = vsel %vm173_vm12, %v155_v27, %v191_v36  ;;  %v1529_v45 = vsel %vm174_vm13, %v156_v32, %v192_v39  ;;  %vm178_vm1 = vcmp.ge.bf16.partialorder %v160_v44, 0  ;;  %v1348_v39 = vld [vmem:[%s1614_s1 + $0xf0] sm:$0xff]  }
  0x28   : > { %1263 = vmatpush3.bf16.msra.mxu0 %v1336_v56  ;;  %v1512_v29 = vsel %vm1477_vm8, %v287_v24, %v291_v20  ;;  %v211_v46 = vsel %vm175_vm14, %v157_v33, %v193_v40  ;;  %v303_v48 = vshll.u32 %v209_v41, 16  ;;  %v308_v52 = vshrl.u32 %v1529_v45, 16  ;;  %v1343_v24 = vld [vmem:[%s1614_s1 + $0x20] sm:$0xff]  }
  0x29   : > { %1264 = vmatprep.subr.bf16.mxu0 %v1338_v17  ;;  %v1037_v35 = vcombine.low %v1504_v23, %v1512_v29  ;;  %v301_v47 = vrot.slane %v300_v34, 4  ;;  %v311_v53 = vshll.u32 %v1529_v45, 16  ;;  %v317_v54 = vshll.u32 %v211_v46, 16 }
  0x2a   : > { %v305_v56 = vrot.slane %v303_v48, 5  ;;  %v310_v62 = vrot.slane %v308_v52, 4  ;;  %vm179_vm2 = vcmp.ge.bf16.partialorder %v161_v49, 0  ;;  %v195_v2 = vmul.bf16 1009007652, %v159_v43 }
  0x2b   : > { %1207 = vmatmul.mubr.bf16.vlgmr.msra.gmra.mrb[0].mxu1 %v1037_v35  ;;  %v313_v63 = vrot.slane %v311_v53, 5  ;;  %v319_v0 = vrot.slane %v317_v54, 5  ;;  %v196_v3 = vmul.bf16 1009007652, %v160_v44  ;;  %v197_v8 = vmul.bf16 1009007652, %v161_v49 }
  0x2c   : > { %1265 = vmatpush3.bf16.msra.mxu0 %v1338_v17  ;;  %1215 = vmatpush3.bf16.msra.mxu1 %v1467_v50  ;;  %v1539_v50 = vsel %vm176_vm15, %v158_v37, %v194_v42  ;;  %v1554_v5 = vsel %vm1477_vm8, %v301_v47, %v305_v56  ;;  %v213_v11 = vsel %vm177_vm0, %v159_v43, %v195_v2  ;;  %vm180_vm3 = vcmp.ge.bf16.partialorder %v162_v61, 0 }
  0x2d   : > { %1266 = vmatprep.subr.bf16.mxu0 %v1340_v25  ;;  %1216 = vmatprep.subr.bf16.mxu1 %v1337_v31  ;;  %v322_v58 = vshrl.u32 %v1539_v50, 16  ;;  %v325_v59 = vshll.u32 %v1539_v50, 16  ;;  %v1078_v60 = vcombine.low %v1529_v45, %v1539_v50  ;;  %v314_v7 = vor.u32 %v313_v63, %v310_v62 }
  0x2e   : > { %v1556_v12 = vsel %vm178_vm1, %v160_v44, %v196_v3  ;;  %v215_v16 = vsel %vm179_vm2, %v161_v49, %v197_v8  ;;  %v331_v17 = vshll.u32 %v213_v11, 16  ;;  %v198_v22 = vmul.bf16 1009007652, %v162_v61  ;;  %v1350_v49 = vld [vmem:[%s1614_s1 + $0xf8] sm:$0xff]  }
  0x2f   : > { %1258 = vmatprep.mubr.bf16.mxu0 %v1078_v60  ;;  %v324_v10 = vrot.slane %v322_v58, 4  ;;  %v327_v13 = vrot.slane %v325_v59, 5  ;;  %v315_v15 = vrot.slane %v314_v7, 4  ;;  %v336_v18 = vshrl.u32 %v1556_v12, 16 }
  0x30   : > { %1267 = vmatpush3.bf16.msra.mxu0 %v1340_v25  ;;  %1217 = vmatpush3.bf16.msra.mxu1 %v1337_v31  ;;  %v339_v20 = vshll.u32 %v1556_v12, 16  ;;  %v345_v21 = vshll.u32 %v215_v16, 16  ;;  %v163_v31 = vld [vmem:[%s1418_s6 + $0x44] sm:$0x1]  ;;  %v333_v34 = vrot.slane %v331_v17, 5  ;;  %v1104_v36 = vcombine.low %v1488_v6, %v1504_v23  ;;  %v1345_v6 = vld [vmem:[%s1614_s1 + $0x28] sm:$0xff]  }
  0x31   : > { %1268 = vmatprep.subr.bf16.mxu0 %v1342_v38  ;;  %1218 = vmatprep.subr.bf16.mxu1 %v1339_v51  ;;  %v328_v19 = vor.u32 %v327_v13, %v324_v10  ;;  %v320_v25 = vsel %vm1477_vm8, %v315_v15, %v319_v0  ;;  %v338_v27 = vrot.slane %v336_v18, 4  ;;  %v199_v40 = vmul.bf16 1009007652, %v163_v31 }
  0x32   : > { %v1038_v32 = vcombine.low %v1554_v5, %v320_v25  ;;  %v341_v35 = vrot.slane %v339_v20, 5  ;;  %v347_v37 = vrot.slane %v345_v21, 5  ;;  %vm181_vm4 = vcmp.ge.bf16.partialorder %v163_v31, 0 }
  0x33   : > { %v329_v33 = vrot.slane %v328_v19, 4  ;;  %v1048_v53 = vcombine.low %v1439_v26, %v1443_v28  ;;  %v1105_v59 = vcombine.low %v1512_v29, %v1554_v5  ;;  %v1349_v26 = vld [vmem:[%s1614_s1 + $0x38] sm:$0xff]   ;;  %v1049_v63 = vcombine.low %v1447_v30, %v1481_v1 }
  0x34   : > { %1269 = vmatpush3.bf16.msra.mxu0 %v1342_v38  ;;  %1219 = vmatpush3.bf16.msra.mxu1 %v1339_v51  ;;  %v216_v38 = vsel %vm180_vm3, %v162_v61, %v198_v22  ;;  %v342_v41 = vor.u32 %v341_v35, %v338_v27  ;;  %v217_v51 = vsel %vm181_vm4, %v163_v31, %v199_v40 }
  0x35   : > { %1270 = vmatprep.subr.bf16.mxu0 %v1344_v55  ;;  %1220 = vmatprep.subr.bf16.mxu1 %v1341_v4  ;;  %v1079_v42 = vcombine.low %v1556_v12, %v216_v38  ;;  %v781_v43 = vshrl.u32 %v216_v38, 16  ;;  %v784_v23 = vshll.u32 %v216_v38, 16  ;;  %v334_v44 = vsel %vm1477_vm8, %v329_v33, %v333_v34 }
  0x36   : > { %1210 = vmatprep.mubr.bf16.mxu1 %v1038_v32  ;;  %v343_v46 = vrot.slane %v342_v41, 4  ;;  %v790_v58 = vshll.u32 %v217_v51, 16  ;;  %v1106_v28 = vcombine.low %v320_v25, %v334_v44  ;;  %v1050_v29 = vcombine.low %v1492_v9, %v1529_v45 }
  0x37   : > { %v783_v47 = vrot.slane %v781_v43, 4  ;;  %1259 = vmatmul.mubr.bf16.gmra.mrb[4].mxu0 %v1079_v42  ;;  %v786_v48 = vrot.slane %v784_v23, 5  ;;  %v1051_v2 = vcombine.low %v1539_v50, %v1556_v12 }
  0x38   : > { %1271 = vmatpush3.bf16.msra.mxu0 %v1344_v55  ;;  %1221 = vmatpush3.bf16.msra.mxu1 %v1341_v4  ;;  %v348_v52 = vsel %vm1477_vm8, %v343_v46, %v347_v37  ;;  %v1347_v55 = vld [vmem:[%s1614_s1 + $0x30] sm:$0xff]   ;;  %v792_v61 = vrot.slane %v790_v58, 5 }
  0x39   : > { %1272 = vmatprep.subr.bf16.mxu0 %v1346_v14  ;;  %1222 = vmatprep.subr.bf16.mxu1 %v1343_v24  ;;  %v1039_v54 = vcombine.low %v334_v44, %v348_v52  ;;  %v787_v56 = vor.u32 %v786_v48, %v783_v47 }
  0x3a   : > { %1278 = vmatprep.mubr.bf16.mxu0 %v1104_v36 }
  0x3b   : > { %1211 = vmatmul.mubr.bf16.gmra.mrb[4].mxu1 %v1039_v54  ;;  %v788_v60 = vrot.slane %v787_v56, 4 }
  0x3c   : > { %1273 = vmatpush3.bf16.msra.mxu0 %v1346_v14  ;;  %1223 = vmatpush3.bf16.msra.mxu1 %v1343_v24 }
  0x3d   : > { %1274 = vmatprep.subr.bf16.mxu0 %v1348_v39  ;;  %1224 = vmatprep.subr.bf16.mxu1 %v1345_v6  ;;  %v793_v62 = vsel %vm1477_vm8, %v788_v60, %v792_v61 }
  0x3e   : > { %1230 = vmatprep.mubr.bf16.mxu1 %v1048_v53  ;;  %v1107_v0 = vcombine.low %v348_v52, %v793_v62 }
  0x40   : > { %1275 = vmatpush3.bf16.msra.mxu0 %v1348_v39  ;;  %1225 = vmatpush3.bf16.msra.mxu1 %v1345_v6 }
  0x41   : > { %1276 = vmatprep.subr.bf16.mxu0 %v1350_v49  ;;  %1226 = vmatprep.subr.bf16.mxu1 %v1347_v55 }
  0x44   : > { %1277 = vmatpush3.bf16.msra.mxu0 %v1350_v49  ;;  %1227 = vmatpush3.bf16.msra.mxu1 %v1347_v55 }
  0x45   : > { %1228 = vmatprep.subr.bf16.mxu1 %v1349_v26 }
  0x47   : > { %1279 = vmatmul.mubr.bf16.vlgmr.msra.gmra.mrb[0].mxu0 %v1105_v59 }
  0x48   : > { %1282 = vmatprep.mubr.bf16.mxu0 %v1106_v28  ;;  %1229 = vmatpush3.bf16.msra.mxu1 %v1349_v26 }
  0x4b   : > { %1231 = vmatmul.mubr.bf16.vlgmr.msra.gmra.mrb[0].mxu1 %v1049_v63 }
  0x4c   : > { %1234 = vmatprep.mubr.bf16.mxu1 %v1050_v29 }
  0x4f   : > { %1283 = vmatmul.mubr.bf16.gmra.mrb[4].mxu0 %v1107_v0 }
  0x53   : > { %1235 = vmatmul.mubr.bf16.gmra.mrb[4].mxu1 %v1051_v2 }
 0x11a   : > { %v1280_v3 = vpop.f32.mrb[0].mxu0 }
 0x11b   : > { %v902_v4 = vpop.f32.mrb[1].mxu0 }
 0x11c   : > { %v1281_v57 = vpop.f32.mrb[2].mxu0 }
 0x11d   : > { %v905_v5 = vpop.f32.mrb[3].mxu0 }
 0x11e   : > { %v1232_v7 = vpop.f32.mrb[0].mxu1 }
 0x11f   : > { %v1286_v8 = vadd.f32 %v1280_v3, %v1232_v7  ;;  %v601_v30 = vpop.f32.mrb[1].mxu1 }
 0x120   : > { %v1287_v1 = vadd.f32 %v902_v4, %v601_v30  ;;  %v1233_v10 = vpop.f32.mrb[2].mxu1 }
 0x121   : > { %v1288_v9 = vadd.f32 %v1281_v57, %v1233_v10  ;;  %v604_v45 = vpop.f32.mrb[3].mxu1 }
 0x122   : > { %v1284_v11 = vpop.f32.mrb[4].mxu0  ;;  %v1289_v50 = vadd.f32 %v905_v5, %v604_v45 }
 0x123   : > { %v918_v13 = vpop.f32.mrb[5].mxu0  ;;  %v1127_v14 = vpack.c.bf16 %v1288_v9, %v1286_v8 }
 0x124   : > { %v1285_v12 = vpop.f32.mrb[6].mxu0  ;;  %v1122_v16 = vpack.c.bf16 %v1289_v50, %v1287_v1 }
 0x125   : > { %v921_v15 = vpop.f32.mrb[7].mxu0  ;;  %1139 = vst [vmem:[%s143_s30 + $0x8] sm:$0xff] %v1127_v14  }
 0x126   : > { %1123 = vst [vmem:[%s143_s30] sm:$0xff] %v1122_v16   ;;  %v1236_v17 = vpop.f32.mrb[4].mxu1 }
 0x127   : > { %v1290_v18 = vadd.f32 %v1284_v11, %v1236_v17  ;;  %v617_v19 = vpop.f32.mrb[5].mxu1 }
 0x128   : > { %v1291_v20 = vadd.f32 %v918_v13, %v617_v19  ;;  %v1237_v21 = vpop.f32.mrb[6].mxu1 }
 0x129   : > { %v1292_v22 = vadd.f32 %v1285_v12, %v1237_v21  ;;  %v620_v24 = vpop.f32.mrb[7].mxu1 }
 0x12a   : > { %v1293_v25 = vadd.f32 %v921_v15, %v620_v24 }
 0x12b   : > { %v1137_v27 = vpack.c.bf16 %v1292_v22, %v1290_v18 }
 0x12c   : > { %v1132_v31 = vpack.c.bf16 %v1293_v25, %v1291_v20 }
 0x12d   : > { %1141 = vst [vmem:[%s143_s30 + $0x18] sm:$0xff] %v1137_v27  }
 0x12e   : > { %1140 = vst [vmem:[%s143_s30 + $0x10] sm:$0xff] %v1132_v31  }
 0x12f PF: > { %s12_s9 = sadd.s32 1, %s1357_s9  }
 0x130   : > { %p9_p4 = scmp.ge.s32.totalorder %s12_s9, 4  }
 0x132   :  { %11 = sbr.rel (!%p9_p4) target bundleno = 1 (0x1), region = 61 }

// kernel: wide_block.8
= control target key start
LH: loop header
LB: loop body
LE: loop exit
PB: predicated region body
PF: predicated region fallthrough
CT: control target
= control target key end

     0   :  { %s2591_s9 = smov 0   ;;  %s3111_s0 = inlined_call_operand.vmem [shape: bf16[2,10,10,128], index: 0, kind: input, shape index: {}]   ;;  %s3112_s1 = inlined_call_operand.vmem [shape: bf16[9,128,128], index: 1, kind: input, shape index: {}]   ;;  %s3113_s2 = inlined_call_operand.vmem [shape: bf16[2,8,8,128], index: 2, kind: output, shape index: {}]  }
   0x1 LB: > { %s1812_s10 = sadd.s32 4294967295, %s2574_s9   ;;  %p1816_p0 = scmp.ge.s32.totalorder %s2574_s9, 1  ;;  %s2574_s9 = sphi %s2591_s9, %s12_s9  }
   0x2   : > { %p112_p1 = scmp.lt.s32.totalorder %s2574_s9, 3 }
   0x4   : > { %p113_p2 = pnand %p1816_p0, %p112_p1 }
   0x5   : > { %v2496_v0 = vld [vmem:[%s3112_s1 + $0x40] sm:$0xff] (!%p113_p2)   ;;  %p134_p3 = scmp.lt.s32.totalorder (!%p113_p2), %s1812_s10, 1  ;;  %v2498_v2 = vld [vmem:[%s3112_s1 + $0x48] sm:$0xff] (!%p113_p2)   ;;  %v2500_v4 = vld [vmem:[%s3112_s1 + $0x50] sm:$0xff] (!%p113_p2)   ;;  %vm242_vm4 = vsmask.f32 (!%p113_p2), 3328 }
   0x6   : > { %116 = sbr.rel (%p113_p2) target bundleno = 395 (0x18b), region = 28  ;;  %v2497_v1 = vld [vmem:[%s3112_s1 + $0x100] sm:$0xff] (!%p113_p2)   ;;  %2191 = vmatprep.subr.bf16.mxu1 (!%p113_p2), %v2496_v0  ;;  %v2499_v3 = vld [vmem:[%s3112_s1 + $0x108] sm:$0xff] (!%p113_p2)   ;;  %v2501_v5 = vld [vmem:[%s3112_s1 + $0x110] sm:$0xff] (!%p113_p2)   ;;  %vm243_vm5 = vsmask.f32 (!%p113_p2), 7440 }
   0x7   : > { %2287 = vmatprep.subr.bf16.mxu0 (!%p113_p2), %v2497_v1  ;;  %2192 = vmatpush3.bf16.msra.mxu1 (!%p113_p2), %v2496_v0  ;;  %v2502_v6 = vld [vmem:[%s3112_s1 + $0x58] sm:$0xff] (!%p113_p2)   ;;  %v2504_v8 = vld [vmem:[%s3112_s1 + $0x60] sm:$0xff] (!%p113_p2)   ;;  %v2506_v10 = vld [vmem:[%s3112_s1 + $0x68] sm:$0xff] (!%p113_p2)  }
   0x8   : > { %2288 = vmatpush3.bf16.msra.mxu0 (!%p113_p2), %v2497_v1  ;;  %2193 = vmatprep.subr.bf16.mxu1 (!%p113_p2), %v2498_v2  ;;  %v2503_v7 = vld [vmem:[%s3112_s1 + $0x118] sm:$0xff] (!%p113_p2)   ;;  %v2505_v9 = vld [vmem:[%s3112_s1 + $0x120] sm:$0xff] (!%p113_p2)   ;;  %v2507_v14 = vld [vmem:[%s3112_s1 + $0x128] sm:$0xff] (!%p113_p2)  }
   0x9   : > { %2289 = vmatprep.subr.bf16.mxu0 (!%p113_p2), %v2499_v3  ;;  %v2508_v18 = vld [vmem:[%s3112_s1 + $0x70] sm:$0xff] (!%p113_p2)   ;;  %v2510_v30 = vld [vmem:[%s3112_s1 + $0x78] sm:$0xff] (!%p113_p2)   ;;  %vm2679_vm9 = vmor (!%p113_p2), %vm242_vm4, %vm243_vm5 }
   0xa   : > { %v2509_v19 = vld [vmem:[%s3112_s1 + $0x130] sm:$0xff] (!%p113_p2)   ;;  %v2511_v43 = vld [vmem:[%s3112_s1 + $0x138] sm:$0xff] (!%p113_p2)   ;;  %v2512_v53 = vld [vmem:[%s3112_s1] sm:$0xff] (!%p113_p2)  }
   0xb   : > { %2194 = vmatpush3.bf16.msra.mxu1 (!%p113_p2), %v2498_v2  ;;  %v2705_v61 = vld [vmem:[%s3112_s1 + $0x140] sm:$0xff] (!%p113_p2)  }
   0xc   : > { %2290 = vmatpush3.bf16.msra.mxu0 (!%p113_p2), %v2499_v3  ;;  %2195 = vmatprep.subr.bf16.mxu1 (!%p113_p2), %v2500_v4  ;;  %v2537_v45 = vld [vmem:[%s3112_s1 + $0x1a0] sm:$0xff] (!%p113_p2)  }
   0xd   : > { %s3119_s10 = smov (!%p134_p3, %s1812_s10), 1  ;;  %2291 = vmatprep.subr.bf16.mxu0 %v2501_v5 }
   0xe   : > { %s2487_s27 = smul.u32 80, %s3119_s10  ;;  %s2059_s30 = sshll.u32 %s3119_s10, 5 }
   0xf   : > { %2196 = vmatpush3.bf16.msra.mxu1 %v2500_v4  ;;  %s143_s4 = scalar_lea.vmem %s3113_s2, %s2059_s30 }
  0x10   : > { %2292 = vmatpush3.bf16.msra.mxu0 %v2501_v5  ;;  %2197 = vmatprep.subr.bf16.mxu1 %v2502_v6  ;;  %s2635_s6 = scalar_lea.vmem %s3111_s0, %s2487_s27 }
  0x11   : > { %2293 = vmatprep.subr.bf16.mxu0 %v2503_v7  ;;  %v146_v11 = vld [vmem:[%s2635_s6] sm:$0xf]  ;;  %v147_v12 = vld [vmem:[%s2635_s6 + $0x4] sm:$0x1]  ;;  %v148_v13 = vld [vmem:[%s2635_s6 + $0x8] sm:$0xf] }
  0x12   : > { %v149_v15 = vld [vmem:[%s2635_s6 + $0xc] sm:$0x1]  ;;  %vm166_vm0 = vcmp.ge.bf16.partialorder %v146_v11, 0  ;;  %vm167_vm1 = vcmp.ge.bf16.partialorder %v147_v12, 0  ;;  %vm168_vm2 = vcmp.ge.bf16.partialorder %v148_v13, 0 }
  0x13   : > { %2198 = vmatpush3.bf16.msra.mxu1 %v2502_v6  ;;  %vm169_vm3 = vcmp.ge.bf16.partialorder %v149_v15, 0  ;;  %v186_v16 = vmul.bf16 1009007652, %v146_v11  ;;  %v187_v17 = vmul.bf16 1009007652, %v147_v12 }
  0x14   : > { %2294 = vmatpush3.bf16.msra.mxu0 %v2503_v7  ;;  %2199 = vmatprep.subr.bf16.mxu1 %v2504_v8  ;;  %v188_v20 = vmul.bf16 1009007652, %v148_v13  ;;  %v189_v21 = vmul.bf16 1009007652, %v149_v15  ;;  %v150_v28 = vld [vmem:[%s2635_s6 + $0x10] sm:$0xf] }
  0x15   : > { %2295 = vmatprep.subr.bf16.mxu0 %v2505_v9  ;;  %v2653_v22 = vsel %vm166_vm0, %v146_v11, %v186_v16  ;;  %v2655_v23 = vsel %vm167_vm1, %v147_v12, %v187_v17  ;;  %v151_v29 = vld [vmem:[%s2635_s6 + $0x14] sm:$0x1]  ;;  %v152_v35 = vld [vmem:[%s2635_s6 + $0x18] sm:$0xf]  ;;  %v153_v38 = vld [vmem:[%s2635_s6 + $0x1c] sm:$0x1] }
  0x16   : > { %v2657_v24 = vsel %vm168_vm2, %v148_v13, %v188_v20  ;;  %v2659_v25 = vsel %vm169_vm3, %v149_v15, %v189_v21  ;;  %v246_v26 = vshrl.u32 %v2653_v22, 16  ;;  %v249_v27 = vshll.u32 %v2653_v22, 16  ;;  %v154_v56 = vld [vmem:[%s2635_s6 + $0x20] sm:$0xf]  ;;  %v155_v62 = vld [vmem:[%s2635_s6 + $0x24] sm:$0x1] }
  0x17   : > { %2200 = vmatpush3.bf16.msra.mxu1 %v2504_v8  ;;  %v255_v31 = vshll.u32 %v2655_v23, 16  ;;  %v260_v32 = vshrl.u32 %v2657_v24, 16  ;;  %v263_v33 = vshll.u32 %v2657_v24, 16  ;;  %v269_v34 = vshll.u32 %v2659_v25, 16 }
  0x18   : > { %2296 = vmatpush3.bf16.msra.mxu0 %v2505_v9  ;;  %2201 = vmatprep.subr.bf16.mxu1 %v2506_v10  ;;  %v248_v36 = vrot.slane %v246_v26, 4  ;;  %v251_v37 = vrot.slane %v249_v27, 5  ;;  %vm170_vm6 = vcmp.ge.bf16.partialorder %v150_v28, 0  ;;  %vm171_vm7 = vcmp.ge.bf16.partialorder %v151_v29, 0 }
  0x19   : > { %2297 = vmatprep.subr.bf16.mxu0 %v2507_v14  ;;  %v257_v39 = vrot.slane %v255_v31, 5  ;;  %v262_v40 = vrot.slane %v260_v32, 4  ;;  %v265_v41 = vrot.slane %v263_v33, 5  ;;  %v271_v42 = vrot.slane %v269_v34, 5 }
  0x1a   : > { %v252_v44 = vor.u32 %v251_v37, %v248_v36  ;;  %vm172_vm8 = vcmp.ge.bf16.partialorder %v152_v35, 0  ;;  %vm173_vm10 = vcmp.ge.bf16.partialorder %v153_v38, 0  ;;  %v190_v47 = vmul.bf16 1009007652, %v150_v28  ;;  %v2514_v37 = vld [vmem:[%s3112_s1 + $0x8] sm:$0xff]  }
  0x1b   : > { %2202 = vmatpush3.bf16.msra.mxu1 %v2506_v10  ;;  %v266_v46 = vor.u32 %v265_v41, %v262_v40  ;;  %v191_v48 = vmul.bf16 1009007652, %v151_v29  ;;  %v192_v50 = vmul.bf16 1009007652, %v152_v35  ;;  %v193_v51 = vmul.bf16 1009007652, %v153_v38 }
  0x1c   : > { %2298 = vmatpush3.bf16.msra.mxu0 %v2507_v14  ;;  %2203 = vmatprep.subr.bf16.mxu1 %v2508_v18  ;;  %v253_v49 = vrot.slane %v252_v44, 4  ;;  %v2687_v54 = vsel %vm170_vm6, %v150_v28, %v190_v47  ;;  %vm174_vm11 = vcmp.ge.bf16.partialorder %v154_v56, 0  ;;  %vm175_vm12 = vcmp.ge.bf16.partialorder %v155_v62, 0  ;;  %v2516_v40 = vld [vmem:[%s3112_s1 + $0x10] sm:$0xff]   ;;  %v157_v41 = vld [vmem:[%s2635_s6 + $0x2c] sm:$0x1] }
  0x1d   : > { %2299 = vmatprep.subr.bf16.mxu0 %v2509_v19  ;;  %v267_v52 = vrot.slane %v266_v46, 4  ;;  %v2690_v55 = vsel %vm171_vm7, %v151_v29, %v191_v48  ;;  %v2696_v58 = vsel %vm172_vm8, %v152_v35, %v192_v50  ;;  %v2699_v59 = vsel %vm173_vm10, %v153_v38, %v193_v51  ;;  %v2515_v46 = vld [vmem:[%s3112_s1 + $0x148] sm:$0xff]   ;;  %v158_v48 = vld [vmem:[%s2635_s6 + $0x30] sm:$0xf] }
  0x1e   : > { %v258_v57 = vsel %vm2679_vm9, %v253_v49, %v257_v39  ;;  %v274_v60 = vshrl.u32 %v2687_v54, 16  ;;  %v277_v0 = vshll.u32 %v2687_v54, 16  ;;  %v283_v1 = vshll.u32 %v2690_v55, 16  ;;  %v156_v39 = vld [vmem:[%s2635_s6 + $0x28] sm:$0xf] }
  0x1f   : > { %2204 = vmatpush3.bf16.msra.mxu1 %v2508_v18  ;;  %v272_v63 = vsel %vm2679_vm9, %v267_v52, %v271_v42  ;;  %v288_v2 = vshrl.u32 %v2696_v58, 16  ;;  %v291_v5 = vshll.u32 %v2696_v58, 16  ;;  %v297_v6 = vshll.u32 %v2699_v59, 16  ;;  %v159_v49 = vld [vmem:[%s2635_s6 + $0x34] sm:$0x1] }
  0x20   : > { %2300 = vmatpush3.bf16.msra.mxu0 %v2509_v19  ;;  %2205 = vmatprep.subr.bf16.mxu1 %v2510_v30  ;;  %v1836_v3 = vcombine.low %v258_v57, %v272_v63  ;;  %v276_v4 = vrot.slane %v274_v60, 4  ;;  %v279_v7 = vrot.slane %v277_v0, 5  ;;  %v285_v9 = vrot.slane %v283_v1, 5  ;;  %v2518_v57 = vld [vmem:[%s3112_s1 + $0x18] sm:$0xff]  }
  0x21   : > { %2301 = vmatprep.subr.bf16.mxu0 %v2511_v43  ;;  %v290_v8 = vrot.slane %v288_v2, 4  ;;  %v293_v10 = vrot.slane %v291_v5, 5  ;;  %v299_v11 = vrot.slane %v297_v6, 5  ;;  %v194_v13 = vmul.bf16 1009007652, %v154_v56 }
  0x22   : > { %2207 = vmatprep.mubr.bf16.mxu1 %v1836_v3  ;;  %v280_v12 = vor.u32 %v279_v7, %v276_v4  ;;  %v195_v14 = vmul.bf16 1009007652, %v155_v62  ;;  %v1912_v16 = vcombine.low %v2657_v24, %v2687_v54  ;;  %v657_v28 = vrot.slane %v2659_v25, 5  ;;  %v161_v4 = vld [vmem:[%s2635_s6 + $0x3c] sm:$0x1] }
  0x23   : > { %2206 = vmatpush3.bf16.msra.mxu1 %v2510_v30  ;;  %v294_v15 = vor.u32 %v293_v10, %v290_v8  ;;  %v2718_v18 = vsel %vm174_vm11, %v154_v56, %v194_v13  ;;  %vm176_vm13 = vcmp.ge.bf16.partialorder %v156_v39, 0  ;;  %v196_v42 = vmul.bf16 1009007652, %v156_v39  ;;  %v163_v10 = vld [vmem:[%s2635_s6 + $0x44] sm:$0x1]  ;;  %v2526_v25 = vld [vmem:[%s3112_s1 + $0x38] sm:$0xff]  }
  0x24   : > { %2302 = vmatpush3.bf16.msra.mxu0 %v2511_v43  ;;  %2215 = vmatprep.subr.bf16.mxu1 %v2512_v53  ;;  %v281_v17 = vrot.slane %v280_v12, 4  ;;  %v2720_v19 = vsel %vm175_vm12, %v155_v62, %v195_v14  ;;  %v302_v21 = vshrl.u32 %v2718_v18, 16  ;;  %v305_v26 = vshll.u32 %v2718_v18, 16  ;;  %v160_v62 = vld [vmem:[%s2635_s6 + $0x38] sm:$0xf] }
  0x25   : > { %2311 = vmatprep.subr.bf16.mxu0 %v2705_v61  ;;  %v295_v20 = vrot.slane %v294_v15, 4  ;;  %v311_v27 = vshll.u32 %v2720_v19, 16  ;;  %v1913_v30 = vcombine.low %v2696_v58, %v2718_v18  ;;  %vm177_vm14 = vcmp.ge.bf16.partialorder %v157_v41, 0 }
  0x26   : > { %v286_v29 = vsel %vm2679_vm9, %v281_v17, %v285_v9  ;;  %v304_v33 = vrot.slane %v302_v21, 4  ;;  %v307_v34 = vrot.slane %v305_v26, 5  ;;  %v197_v44 = vmul.bf16 1009007652, %v157_v41  ;;  %v162_v9 = vld [vmem:[%s2635_s6 + $0x40] sm:$0xf] }
  0x27   : > { %v300_v31 = vsel %vm2679_vm9, %v295_v20, %v299_v11  ;;  %v1940_v32 = vcombine.low %v272_v63, %v286_v29  ;;  %v313_v36 = vrot.slane %v311_v27, 5  ;;  %v2746_v47 = vsel %vm176_vm13, %v156_v39, %v196_v42  ;;  %v2517_v11 = vld [vmem:[%s3112_s1 + $0x150] sm:$0xff]   ;;  %v2520_v20 = vld [vmem:[%s3112_s1 + $0x20] sm:$0xff]   ;;  %v2522_v42 = vld [vmem:[%s3112_s1 + $0x28] sm:$0xff]  }
  0x28   : > { %v2732_v35 = vcombine.low %v286_v29, %v300_v31  ;;  %v308_v38 = vor.u32 %v307_v34, %v304_v33  ;;  %v2752_v51 = vsel %vm177_vm14, %v157_v41, %v197_v44  ;;  %v316_v52 = vshrl.u32 %v2746_v47, 16 }
  0x29   : > { %2303 = vmatprep.mubr.bf16.mxu0 %v1940_v32  ;;  %v325_v60 = vshll.u32 %v2752_v51, 16  ;;  %vm178_vm15 = vcmp.ge.bf16.partialorder %v158_v48, 0  ;;  %vm179_vm0 = vcmp.ge.bf16.partialorder %v159_v49, 0  ;;  %v198_v1 = vmul.bf16 1009007652, %v158_v48 }
  0x2a   : > { %2208 = vmatmul.mubr.bf16.vlgmr.msra.gmra.mrb[0].mxu1 %v2732_v35  ;;  %v309_v43 = vrot.slane %v308_v38, 4  ;;  %v318_v63 = vrot.slane %v316_v52, 4  ;;  %v199_v2 = vmul.bf16 1009007652, %v159_v49  ;;  %vm180_vm1 = vcmp.ge.bf16.partialorder %v160_v62, 0 }
  0x2b   : > { %2216 = vmatpush3.bf16.msra.mxu1 %v2512_v53  ;;  %v319_v53 = vshll.u32 %v2746_v47, 16  ;;  %v327_v3 = vrot.slane %v325_v60, 5  ;;  %v200_v5 = vmul.bf16 1009007652, %v160_v62  ;;  %vm648_vm2 = vcmask 1042432  }
  0x2c   : > { %2217 = vmatprep.subr.bf16.mxu1 %v2514_v37  ;;  %v314_v50 = vsel %vm2679_vm9, %v309_v43, %v313_v36  ;;  %vm649_vm3 = vcmask 1046532   ;;  %v2764_v7 = vsel %vm178_vm15, %v158_v48, %v198_v1  ;;  %v2767_v8 = vsel %vm179_vm0, %v159_v49, %v199_v2 }
  0x2d   : > { %v1941_v56 = vcombine.low %v300_v31, %v314_v50  ;;  %v321_v0 = vrot.slane %v319_v53, 5  ;;  %vm181_vm4 = vcmp.ge.bf16.partialorder %v161_v4, 0  ;;  %v330_v12 = vshrl.u32 %v2764_v7, 16  ;;  %v2519_v31 = vld [vmem:[%s3112_s1 + $0x158] sm:$0xff]   ;;  %vm2819_vm7 = vmor %vm648_vm2, %vm649_vm3 }
  0x2e   : > { %v333_v13 = vshll.u32 %v2764_v7, 16  ;;  %v201_v14 = vmul.bf16 1009007652, %v161_v4  ;;  %v2778_v17 = vsel %vm180_vm1, %v160_v62, %v200_v5  ;;  %vm182_vm5 = vcmp.ge.bf16.partialorder %v162_v9, 0  ;;  %v2523_v5 = vld [vmem:[%s3112_s1 + $0x168] sm:$0xff]  }
  0x2f   : > { %2218 = vmatpush3.bf16.msra.mxu1 %v2514_v37  ;;  %2304 = vmatmul.mubr.bf16.vlgmr.msra.gmra.mrb[0].mxu0 %v1941_v56  ;;  %v322_v6 = vor.u32 %v321_v0, %v318_v63  ;;  %vm183_vm6 = vcmp.ge.bf16.partialorder %v163_v10, 0  ;;  %v332_v21 = vrot.slane %v330_v12, 4  ;;  %v344_v33 = vshrl.u32 %v2778_v17, 16 }
  0x30   : > { %2219 = vmatprep.subr.bf16.mxu1 %v2516_v40  ;;  %2312 = vmatpush3.bf16.msra.mxu0 %v2705_v61  ;;  %v339_v61 = vshll.u32 %v2767_v8, 16  ;;  %v335_v26 = vrot.slane %v333_v13, 5  ;;  %v2784_v29 = vsel %vm181_vm4, %v161_v4, %v201_v14  ;;  %v347_v34 = vshll.u32 %v2778_v17, 16 }
  0x31   : > { %2313 = vmatprep.subr.bf16.mxu0 %v2515_v46  ;;  %v323_v15 = vrot.slane %v322_v6, 4  ;;  %v353_v36 = vshll.u32 %v2784_v29, 16  ;;  %v202_v39 = vmul.bf16 1009007652, %v162_v9  ;;  %v661_v41 = vrot.slane %v2690_v55, 5  ;;  %v2521_v55 = vld [vmem:[%s3112_s1 + $0x160] sm:$0xff]  }
  0x32   : > { %v341_v27 = vrot.slane %v339_v61, 5  ;;  %v336_v38 = vor.u32 %v335_v26, %v332_v21  ;;  %v346_v43 = vrot.slane %v344_v33, 4  ;;  %v349_v44 = vrot.slane %v347_v34, 5  ;;  %v2524_v6 = vld [vmem:[%s3112_s1 + $0x30] sm:$0xff]  }
  0x33   : > { %2220 = vmatpush3.bf16.msra.mxu1 %v2516_v40  ;;  %v328_v32 = vsel %vm2679_vm9, %v323_v15, %v327_v3  ;;  %v203_v40 = vmul.bf16 1009007652, %v163_v10  ;;  %v355_v48 = vrot.slane %v353_v36, 5  ;;  %v2802_v49 = vsel %vm182_vm5, %v162_v9, %v202_v39  ;;  %v2525_v33 = vld [vmem:[%s3112_s1 + $0x170] sm:$0xff]  }
  0x34   : > { %2221 = vmatprep.subr.bf16.mxu1 %v2518_v57  ;;  %2314 = vmatpush3.bf16.msra.mxu0 %v2515_v46  ;;  %v2794_v37 = vcombine.low %v314_v50, %v328_v32  ;;  %v337_v46 = vrot.slane %v336_v38, 4  ;;  %v350_v52 = vor.u32 %v349_v44, %v346_v43  ;;  %v986_v53 = vshrl.u32 %v2802_v49, 16  ;;  %v2530_v43 = vld [vmem:[%s3112_s1 + $0x88] sm:$0xff]  }
  0x35   : > { %2315 = vmatprep.subr.bf16.mxu0 %v2517_v11  ;;  %v2805_v50 = vsel %vm183_vm6, %v163_v10, %v203_v40  ;;  %v989_v56 = vshll.u32 %v2802_v49, 16  ;;  %v1861_v62 = vrot.slane %v2657_v24, 9  ;;  %v1862_v63 = vrot.slane %v2687_v54, 9 }
  0x36   : > { %2211 = vmatprep.mubr.bf16.mxu1 %v2794_v37  ;;  %v342_v60 = vsel %vm2679_vm9, %v337_v46, %v341_v27  ;;  %v351_v1 = vrot.slane %v350_v52, 4  ;;  %v988_v2 = vrot.slane %v986_v53, 4  ;;  %v1848_v12 = vcombine.low %v2653_v22, %v2657_v24  ;;  %v2554_v24 = vld [vmem:[%s3112_s1 + $0xe8] sm:$0xff]  }
  0x37   : > { %2222 = vmatpush3.bf16.msra.mxu1 %v2518_v57  ;;  %v995_v57 = vshll.u32 %v2805_v50, 16  ;;  %v1942_v0 = vcombine.low %v328_v32, %v342_v60  ;;  %v991_v3 = vrot.slane %v989_v56, 5  ;;  %v2839_v61 = vsel %vm2819_vm7, %v1861_v62, %v657_v28 }
  0x38   : > { %2223 = vmatprep.subr.bf16.mxu1 %v2520_v20  ;;  %2316 = vmatpush3.bf16.msra.mxu0 %v2517_v11  ;;  %v356_v10 = vsel %vm2679_vm9, %v351_v1, %v355_v48  ;;  %v2843_v14 = vsel %vm2819_vm7, %v1862_v63, %v661_v41  ;;  %v1914_v15 = vcombine.low %v2746_v47, %v2764_v7  ;;  %v653_v28 = vrot.slane %v2655_v23, 5  ;;  %v165_v48 = vld [vmem:[%s2635_s6 + $0x4c] sm:$0x1] }
  0x39   : > { %2317 = vmatprep.subr.bf16.mxu0 %v2519_v31  ;;  %v997_v9 = vrot.slane %v995_v57, 5  ;;  %2307 = vmatprep.mubr.bf16.mxu0 %v1942_v0  ;;  %v992_v11 = vor.u32 %v991_v3, %v988_v2  ;;  %v2833_v13 = vcombine.low %v342_v60, %v356_v10  ;;  %v1915_v21 = vcombine.low %v2778_v17, %v2802_v49  ;;  %v2529_v0 = vld [vmem:[%s3112_s1 + $0x180] sm:$0xff]  }
  0x3a   : > { %v665_v26 = vrot.slane %v2699_v59, 5  ;;  %v669_v32 = vrot.slane %v2720_v19, 5  ;;  %v2528_v59 = vld [vmem:[%s3112_s1 + $0x80] sm:$0xff]   ;;  %v1863_v34 = vrot.slane %v2696_v58, 9  ;;  %v2527_v19 = vld [vmem:[%s3112_s1 + $0x178] sm:$0xff]   ;;  %v1864_v36 = vrot.slane %v2718_v18, 9 }
  0x3b   : > { %2224 = vmatpush3.bf16.msra.mxu1 %v2520_v20  ;;  %v993_v20 = vrot.slane %v992_v11, 4  ;;  %v1865_v38 = vrot.slane %v2746_v47, 9  ;;  %v2877_v39 = vcombine.low %v2687_v54, %v2696_v58  ;;  %v673_v40 = vrot.slane %v2752_v51, 5  ;;  %v2553_v54 = vld [vmem:[%s3112_s1 + $0x1e0] sm:$0xff]   ;;  %v2563_v58 = vld [vmem:[%s3112_s1 + $0x218] sm:$0xff]  }
  0x3c   : > { %2225 = vmatprep.subr.bf16.mxu1 %v2522_v42  ;;  %2318 = vmatpush3.bf16.msra.mxu0 %v2519_v31  ;;  %v1969_v31 = vcombine.low %v2839_v61, %v2843_v14  ;;  %v1866_v41 = vrot.slane %v2764_v7, 9  ;;  %v2887_v44 = vcombine.low %v2718_v18, %v2746_v47  ;;  %v677_v46 = vrot.slane %v2767_v8, 5  ;;  %v2564_v18 = vld [vmem:[%s3112_s1 + $0x220] sm:$0xff]   ;;  %v2566_v47 = vld [vmem:[%s3112_s1 + $0x230] sm:$0xff]  }
  0x3d   : > { %2319 = vmatprep.subr.bf16.mxu0 %v2521_v55  ;;  %2212 = vmatmul.mubr.bf16.gmra.mrb[4].mxu1 %v2833_v13  ;;  %v2857_v27 = vsel %vm2679_vm9, %v993_v20, %v997_v9  ;;  %v2893_v51 = vsel %vm2819_vm7, %v1863_v34, %v665_v26  ;;  %vm185_vm10 = vcmp.ge.bf16.partialorder %v165_v48, 0  ;;  %v205_v52 = vmul.bf16 1009007652, %v165_v48 }
  0x3e   : > { %2231 = vmatprep.mubr.bf16.mxu1 %v1848_v12  ;;  %v1943_v23 = vcombine.low %v356_v10, %v2857_v27  ;;  %v1952_v53 = vrot.slane %v2802_v49, 9  ;;  %v2898_v56 = vsel %vm2819_vm7, %v1864_v36, %v669_v32  ;;  %v1149_v8 = vrot.slane %v2805_v50, 5  ;;  %v2531_v32 = vld [vmem:[%s3112_s1 + $0x188] sm:$0xff]  }
  0x3f   : > { %2226 = vmatpush3.bf16.msra.mxu1 %v2522_v42  ;;  %v164_v42 = vld [vmem:[%s2635_s6 + $0x48] sm:$0xf]  ;;  %v1860_v60 = vrot.slane %v2653_v22, 9  ;;  %v225_v62 = vsel %vm185_vm10, %v165_v48, %v205_v52  ;;  %v2911_v1 = vsel %vm2819_vm7, %v1865_v38, %v673_v40  ;;  %v2915_v50 = vsel %vm2819_vm7, %v1866_v41, %v677_v46  ;;  %v2533_v38 = vld [vmem:[%s3112_s1 + $0x190] sm:$0xff]   ;;  %v2536_v40 = vld [vmem:[%s3112_s1 + $0xa0] sm:$0xff]  }
  0x40   : > { %2227 = vmatprep.subr.bf16.mxu1 %v2524_v6  ;;  %2320 = vmatpush3.bf16.msra.mxu0 %v2521_v55  ;;  %vm184_vm8 = vcmp.ge.bf16.partialorder %v164_v42, 0  ;;  %v204_v55 = vmul.bf16 1009007652, %v164_v42  ;;  %v1598_v22 = vrot.slane %v225_v62, 5  ;;  %v1970_v2 = vcombine.low %v2893_v51, %v2898_v56  ;;  %v2538_v46 = vld [vmem:[%s3112_s1 + $0xa8] sm:$0xff]   ;;  %v2544_v52 = vld [vmem:[%s3112_s1 + $0xc0] sm:$0xff]  }
  0x41   : > { %2321 = vmatprep.subr.bf16.mxu0 %v2523_v5  ;;  %2308 = vmatmul.mubr.bf16.gmra.mrb[4].mxu0 %v1943_v23  ;;  %v1867_v3 = vrot.slane %v2778_v17, 9  ;;  %v2927_v9 = vsel %vm2819_vm7, %v1952_v53, %v1149_v8  ;;  %v654_v11 = vsel %vm2819_vm7, %v1860_v60, %v653_v28  ;;  %v1971_v20 = vcombine.low %v2911_v1, %v2915_v50  ;;  %v2539_v48 = vld [vmem:[%s3112_s1 + $0x1a8] sm:$0xff]   ;;  %v2543_v8 = vld [vmem:[%s3112_s1 + $0x1b8] sm:$0xff]  }
  0x42   : > { %2327 = vmatprep.mubr.bf16.mxu0 %v1969_v31  ;;  %v2900_v57 = vsel %vm184_vm8, %v164_v42, %v204_v55  ;;  %v2946_v28 = vcombine.low %v2764_v7, %v2778_v17  ;;  %v1884_v23 = vcombine.low %v654_v11, %v2839_v61  ;;  %v2541_v55 = vld [vmem:[%s3112_s1 + $0x1b0] sm:$0xff]   ;;  %v2994_v53 = vcombine.low %v2843_v14, %v2893_v51  ;;  %v2545_v14 = vld [vmem:[%s3112_s1 + $0x1c0] sm:$0xff]   ;;  %v2567_v7 = vld [vmem:[%s3112_s1 + $0x238] sm:$0xff]  }
  0x43   : > { %2228 = vmatpush3.bf16.msra.mxu1 %v2524_v6  ;;  %v2031_v63 = vrot.slane %v2900_v57, 9  ;;  %v2532_v6 = vld [vmem:[%s3112_s1 + $0x90] sm:$0xff]   ;;  %v1444_v12 = vshll.u32 %v2900_v57, 16  ;;  %v3001_v60 = vcombine.low %v2898_v56, %v2911_v1  ;;  %v2547_v56 = vld [vmem:[%s3112_s1 + $0x1c8] sm:$0xff]  }
  0x44   : > { %2229 = vmatprep.subr.bf16.mxu1 %v2526_v25  ;;  %2322 = vmatpush3.bf16.msra.mxu0 %v2523_v5  ;;  %v1441_v5 = vshrl.u32 %v2900_v57, 16  ;;  %v2548_v51 = vld [vmem:[%s3112_s1 + $0xd0] sm:$0xff]  }
  0x45   : > { %2323 = vmatprep.subr.bf16.mxu0 %v2525_v33  ;;  %v2931_v10 = vsel %vm2819_vm7, %v2031_v63, %v1598_v22  ;;  %v2549_v1 = vld [vmem:[%s3112_s1 + $0x1d0] sm:$0xff]   ;;  %v2551_v22 = vld [vmem:[%s3112_s1 + $0x1d8] sm:$0xff]  }
  0x46   : > { %v2048_v26 = vcombine.low %v2927_v9, %v2931_v10  ;;  %v1443_v31 = vrot.slane %v1441_v5, 4  ;;  %v2559_v5 = vld [vmem:[%s3112_s1 + $0x1f8] sm:$0xff]   ;;  %v2562_v11 = vld [vmem:[%s3112_s1 + $0x210] sm:$0xff]  }
  0x47   : > { %2230 = vmatpush3.bf16.msra.mxu1 %v2526_v25  ;;  %v681_v25 = vrot.slane %v2784_v29, 5  ;;  %v2534_v29 = vld [vmem:[%s3112_s1 + $0x98] sm:$0xff]  }
  0x48   : > { %2239 = vmatprep.subr.bf16.mxu1 %v2528_v59  ;;  %2324 = vmatpush3.bf16.msra.mxu0 %v2525_v33  ;;  %v1446_v33 = vrot.slane %v1444_v12, 5 }
  0x49   : > { %2325 = vmatprep.subr.bf16.mxu0 %v2527_v19 }
  0x4a   : > { %2232 = vmatmul.mubr.bf16.vlgmr.msra.gmra.mrb[0].mxu1 %v2877_v39  ;;  %v1447_v34 = vor.u32 %v1446_v33, %v1443_v31 }
  0x4b   : > { %2240 = vmatpush3.bf16.msra.mxu1 %v2528_v59  ;;  %2235 = vmatprep.mubr.bf16.mxu1 %v2887_v44  ;;  %v1450_v59 = vshll.u32 %v225_v62, 16  ;;  %v2546_v62 = vld [vmem:[%s3112_s1 + $0xc8] sm:$0xff]  }
  0x4c   : > { %2241 = vmatprep.subr.bf16.mxu1 %v2530_v43  ;;  %2326 = vmatpush3.bf16.msra.mxu0 %v2527_v19  ;;  %v682_v19 = vsel %vm2819_vm7, %v1867_v3, %v681_v25  ;;  %v1448_v61 = vrot.slane %v1447_v34, 4  ;;  %v2560_v3 = vld [vmem:[%s3112_s1 + $0x200] sm:$0xff]  }
  0x4d   : > { %2335 = vmatprep.subr.bf16.mxu0 %v2529_v0  ;;  %v1452_v36 = vrot.slane %v1450_v59, 5  ;;  %v1972_v41 = vcombine.low %v682_v19, %v2927_v9  ;;  %v3018_v63 = vcombine.low %v2915_v50, %v682_v19  ;;  %v1997_v50 = vcombine.low %v2802_v49, %v2900_v57  ;;  %v2555_v57 = vld [vmem:[%s3112_s1 + $0x1e8] sm:$0xff]  }
  0x4f   : > { %2242 = vmatpush3.bf16.msra.mxu1 %v2530_v43  ;;  %2328 = vmatmul.mubr.bf16.vlgmr.msra.gmra.mrb[0].mxu0 %v1970_v2  ;;  %v1453_v4 = vsel %vm2679_vm9, %v1448_v61, %v1452_v36  ;;  %v2535_v43 = vld [vmem:[%s3112_s1 + $0x198] sm:$0xff]   ;;  %v2557_v2 = vld [vmem:[%s3112_s1 + $0x1f0] sm:$0xff]  }
  0x50   : > { %2243 = vmatprep.subr.bf16.mxu1 %v2532_v6  ;;  %2336 = vmatpush3.bf16.msra.mxu0 %v2529_v0  ;;  %v2965_v42 = vcombine.low %v2857_v27, %v1453_v4  ;;  %v2540_v27 = vld [vmem:[%s3112_s1 + $0xb0] sm:$0xff]   ;;  %v2550_v0 = vld [vmem:[%s3112_s1 + $0xd8] sm:$0xff]  }
  0x51   : > { %2331 = vmatprep.mubr.bf16.mxu0 %v1971_v20  ;;  %2337 = vmatprep.subr.bf16.mxu0 %v2531_v32 }
  0x52   : > { %2236 = vmatmul.mubr.bf16.gmra.mrb[4].mxu1 %v2946_v28 }
  0x53   : > { %2244 = vmatpush3.bf16.msra.mxu1 %v2532_v6  ;;  %2255 = vmatprep.mubr.bf16.mxu1 %v1884_v23  ;;  %v2561_v6 = vld [vmem:[%s3112_s1 + $0x208] sm:$0xff]  }
  0x54   : > { %2245 = vmatprep.subr.bf16.mxu1 %v2534_v29  ;;  %2338 = vmatpush3.bf16.msra.mxu0 %v2531_v32 }
  0x55   : > { %2339 = vmatprep.subr.bf16.mxu0 %v2533_v38 }
  0x57   : > { %2246 = vmatpush3.bf16.msra.mxu1 %v2534_v29  ;;  %2332 = vmatmul.mubr.bf16.gmra.mrb[4].mxu0 %v1972_v41 }
  0x58   : > { %2247 = vmatprep.subr.bf16.mxu1 %v2536_v40  ;;  %2340 = vmatpush3.bf16.msra.mxu0 %v2533_v38 }
  0x59   : > { %2351 = vmatprep.mubr.bf16.mxu0 %v2877_v39  ;;  %2341 = vmatprep.subr.bf16.mxu0 %v2535_v43  ;;  %v2542_v39 = vld [vmem:[%s3112_s1 + $0xb8] sm:$0xff]  }
  0x5b   : > { %2248 = vmatpush3.bf16.msra.mxu1 %v2536_v40 }
  0x5c   : > { %2249 = vmatprep.subr.bf16.mxu1 %v2538_v46  ;;  %2342 = vmatpush3.bf16.msra.mxu0 %v2535_v43 }
  0x5d   : > { %2343 = vmatprep.subr.bf16.mxu0 %v2537_v45 }
  0x5f   : > { %2250 = vmatpush3.bf16.msra.mxu1 %v2538_v46 }
  0x60   : > { %2251 = vmatprep.subr.bf16.mxu1 %v2540_v27  ;;  %2344 = vmatpush3.bf16.msra.mxu0 %v2537_v45 }
  0x61   : > { %2345 = vmatprep.subr.bf16.mxu0 %v2539_v48 }
  0x63   : > { %2252 = vmatpush3.bf16.msra.mxu1 %v2540_v27 }
  0x64   : > { %2253 = vmatprep.subr.bf16.mxu1 %v2542_v39  ;;  %2346 = vmatpush3.bf16.msra.mxu0 %v2539_v48 }
  0x65   : > { %2347 = vmatprep.subr.bf16.mxu0 %v2541_v55 }
  0x67   : > { %2254 = vmatpush3.bf16.msra.mxu1 %v2542_v39 }
  0x68   : > { %2263 = vmatprep.subr.bf16.mxu1 %v2544_v52  ;;  %2348 = vmatpush3.bf16.msra.mxu0 %v2541_v55 }
  0x69   : > { %2349 = vmatprep.subr.bf16.mxu0 %v2543_v8 }
  0x6a   : > { %2256 = vmatmul.mubr.bf16.vlgmr.msra.gmra.mrb[0].mxu1 %v2994_v53 }
  0x6b   : > { %2264 = vmatpush3.bf16.msra.mxu1 %v2544_v52  ;;  %2259 = vmatprep.mubr.bf16.mxu1 %v3001_v60 }
  0x6c   : > { %2265 = vmatprep.subr.bf16.mxu1 %v2546_v62  ;;  %2350 = vmatpush3.bf16.msra.mxu0 %v2543_v8 }
  0x6d   : > { %2359 = vmatprep.subr.bf16.mxu0 %v2545_v14 }
  0x6f   : > { %2266 = vmatpush3.bf16.msra.mxu1 %v2546_v62  ;;  %2352 = vmatmul.mubr.bf16.vlgmr.msra.gmra.mrb[0].mxu0 %v2887_v44  ;;  %v2552_v44 = vld [vmem:[%s3112_s1 + $0xe0] sm:$0xff]  }
  0x70   : > { %2267 = vmatprep.subr.bf16.mxu1 %v2548_v51  ;;  %2360 = vmatpush3.bf16.msra.mxu0 %v2545_v14 }
  0x71   : > { %2355 = vmatprep.mubr.bf16.mxu0 %v2946_v28  ;;  %2361 = vmatprep.subr.bf16.mxu0 %v2547_v56 }
  0x72   : > { %2260 = vmatmul.mubr.bf16.gmra.mrb[4].mxu1 %v3018_v63 }
  0x73   : > { %2268 = vmatpush3.bf16.msra.mxu1 %v2548_v51  ;;  %2279 = vmatprep.mubr.bf16.mxu1 %v1912_v16  ;;  %v2556_v16 = vld [vmem:[%s3112_s1 + $0xf0] sm:$0xff]  }
  0x74   : > { %2269 = vmatprep.subr.bf16.mxu1 %v2550_v0  ;;  %2362 = vmatpush3.bf16.msra.mxu0 %v2547_v56 }
  0x75   : > { %2363 = vmatprep.subr.bf16.mxu0 %v2549_v1 }
  0x77   : > { %2270 = vmatpush3.bf16.msra.mxu1 %v2550_v0  ;;  %2356 = vmatmul.mubr.bf16.gmra.mrb[4].mxu0 %v1997_v50 }
  0x78   : > { %2271 = vmatprep.subr.bf16.mxu1 %v2552_v44  ;;  %2364 = vmatpush3.bf16.msra.mxu0 %v2549_v1 }
  0x79   : > { %2375 = vmatprep.mubr.bf16.mxu0 %v2732_v35  ;;  %2365 = vmatprep.subr.bf16.mxu0 %v2551_v22  ;;  %v2558_v35 = vld [vmem:[%s3112_s1 + $0xf8] sm:$0xff]  }
  0x7b   : > { %2272 = vmatpush3.bf16.msra.mxu1 %v2552_v44 }
  0x7c   : > { %2273 = vmatprep.subr.bf16.mxu1 %v2554_v24  ;;  %2366 = vmatpush3.bf16.msra.mxu0 %v2551_v22 }
  0x7d   : > { %2367 = vmatprep.subr.bf16.mxu0 %v2553_v54 }
  0x7f   : > { %2274 = vmatpush3.bf16.msra.mxu1 %v2554_v24 }
  0x80   : > { %2275 = vmatprep.subr.bf16.mxu1 %v2556_v16  ;;  %2368 = vmatpush3.bf16.msra.mxu0 %v2553_v54 }
  0x81   : > { %2369 = vmatprep.subr.bf16.mxu0 %v2555_v57 }
  0x83   : > { %2276 = vmatpush3.bf16.msra.mxu1 %v2556_v16 }
  0x84   : > { %2277 = vmatprep.subr.bf16.mxu1 %v2558_v35  ;;  %2370 = vmatpush3.bf16.msra.mxu0 %v2555_v57 }
  0x85   : > { %2371 = vmatprep.subr.bf16.mxu0 %v2557_v2 }
  0x87   : > { %2278 = vmatpush3.bf16.msra.mxu1 %v2558_v35 }
  0x88   : > { %2407 = vmatprep.subr.bf16.mxu1 %v2560_v3  ;;  %2372 = vmatpush3.bf16.msra.mxu0 %v2557_v2 }
  0x89   : > { %2373 = vmatprep.subr.bf16.mxu0 %v2559_v5 }
  0x8a   : > { %2280 = vmatmul.mubr.bf16.vlgmr.msra.gmra.mrb[0].mxu1 %v1913_v30  ;;  %v2565_v30 = vld [vmem:[%s3112_s1 + $0x228] sm:$0xff]  }
  0x8b   : > { %2415 = vmatpush3.bf16.msra.mxu1 %v2560_v3  ;;  %2283 = vmatprep.mubr.bf16.mxu1 %v1914_v15 }
  0x8c   : > { %2408 = vmatprep.subr.bf16.mxu1 %v2561_v6  ;;  %2374 = vmatpush3.bf16.msra.mxu0 %v2559_v5 }
  0x8d   : > { %2383 = vmatprep.subr.bf16.mxu0 %v2560_v3 }
  0x8f   : > { %2416 = vmatpush3.bf16.msra.mxu1 %v2561_v6  ;;  %2376 = vmatmul.mubr.bf16.vlgmr.msra.gmra.mrb[0].mxu0 %v2794_v37 }
  0x90   : > { %2409 = vmatprep.subr.bf16.mxu1 %v2562_v11  ;;  %2384 = vmatpush3.bf16.msra.mxu0 %v2560_v3 }
  0x91   : > { %2379 = vmatprep.mubr.bf16.mxu0 %v2833_v13  ;;  %2385 = vmatprep.subr.bf16.mxu0 %v2561_v6 }
  0x92   : > { %2284 = vmatmul.mubr.bf16.gmra.mrb[4].mxu1 %v1915_v21 }
  0x93   : > { %2417 = vmatpush3.bf16.msra.mxu1 %v2562_v11  ;;  %2403 = vmatprep.mubr.bf16.mxu1 %v3018_v63 }
  0x94   : > { %2410 = vmatprep.subr.bf16.mxu1 %v2563_v58  ;;  %2386 = vmatpush3.bf16.msra.mxu0 %v2561_v6 }
  0x95   : > { %2387 = vmatprep.subr.bf16.mxu0 %v2562_v11 }
  0x97   : > { %2418 = vmatpush3.bf16.msra.mxu1 %v2563_v58  ;;  %2380 = vmatmul.mubr.bf16.gmra.mrb[4].mxu0 %v2965_v42 }
  0x98   : > { %2411 = vmatprep.subr.bf16.mxu1 %v2564_v18  ;;  %2388 = vmatpush3.bf16.msra.mxu0 %v2562_v11 }
  0x99   : > { %2399 = vmatprep.mubr.bf16.mxu0 %v2994_v53  ;;  %2389 = vmatprep.subr.bf16.mxu0 %v2563_v58 }
  0x9b   : > { %2419 = vmatpush3.bf16.msra.mxu1 %v2564_v18 }
  0x9c   : > { %2412 = vmatprep.subr.bf16.mxu1 %v2565_v30  ;;  %2390 = vmatpush3.bf16.msra.mxu0 %v2563_v58 }
  0x9d   : > { %2391 = vmatprep.subr.bf16.mxu0 %v2564_v18 }
  0x9f   : > { %2420 = vmatpush3.bf16.msra.mxu1 %v2565_v30 }
  0xa0   : > { %2413 = vmatprep.subr.bf16.mxu1 %v2566_v47  ;;  %2392 = vmatpush3.bf16.msra.mxu0 %v2564_v18 }
  0xa1   : > { %2393 = vmatprep.subr.bf16.mxu0 %v2565_v30 }
  0xa3   : > { %2421 = vmatpush3.bf16.msra.mxu1 %v2566_v47 }
  0xa4   : > { %2414 = vmatprep.subr.bf16.mxu1 %v2567_v7  ;;  %2394 = vmatpush3.bf16.msra.mxu0 %v2565_v30 }
  0xa5   : > { %2395 = vmatprep.subr.bf16.mxu0 %v2566_v47 }
  0xa7   : > { %2422 = vmatpush3.bf16.msra.mxu1 %v2567_v7 }
  0xa8   : > { %2396 = vmatpush3.bf16.msra.mxu0 %v2566_v47 }
  0xa9   : > { %2397 = vmatprep.subr.bf16.mxu0 %v2567_v7 }
  0xaa   : > { %2404 = vmatmul.mubr.bf16.vlgmr.msra.gmra.mrb[8].mxu1 %v2048_v26 }
  0xac   : > { %2398 = vmatpush3.bf16.msra.mxu0 %v2567_v7 }
  0xaf   : > { %2400 = vmatmul.mubr.bf16.vlgmr.msra.gmra.mrb[0].mxu0 %v3001_v60 }
 0x15d   : > { %v2281_v17 = vpop.f32.mrb[0].mxu1 }
 0x15e   : > { %v946_v37 = vpop.f32.mrb[1].mxu1 }
 0x15f   : > { %v2282_v49 = vpop.f32.mrb[2].mxu1 }
 0x160   : > { %v949_v13 = vpop.f32.mrb[3].mxu1 }
 0x165   : > { %v2285_v15 = vpop.f32.mrb[4].mxu1 }
 0x166   : > { %v962_v21 = vpop.f32.mrb[5].mxu1 }
 0x167   : > { %v2286_v12 = vpop.f32.mrb[6].mxu1 }
 0x168   : > { %v965_v20 = vpop.f32.mrb[7].mxu1 }
 0x16a   : > { %v2381_v25 = vpop.f32.mrb[4].mxu0 }
 0x16b   : > { %v2427_v31 = vadd.f32 %v2381_v25, %v2285_v15  ;;  %v1572_v32 = vpop.f32.mrb[5].mxu0 }
 0x16c   : > { %v2429_v28 = vadd.f32 %v1572_v32, %v962_v21  ;;  %v2382_v33 = vpop.f32.mrb[6].mxu0 }
 0x16d   : > { %v2431_v23 = vadd.f32 %v2382_v33, %v2286_v12  ;;  %v1575_v9 = vpop.f32.mrb[7].mxu0 }
 0x16e   : > { %v2433_v10 = vadd.f32 %v1575_v9, %v965_v20 }
 0x17d   : > { %v2405_v26 = vpop.f32.mrb[8].mxu1 }
 0x17e   : > { %v2428_v59 = vadd.f32 %v2427_v31, %v2405_v26  ;;  %v1718_v29 = vpop.f32.mrb[9].mxu1 }
 0x17f   : > { %v2430_v34 = vadd.f32 %v2429_v28, %v1718_v29  ;;  %v2406_v19 = vpop.f32.mrb[10].mxu1 }
 0x180   : > { %v2432_v36 = vadd.f32 %v2431_v23, %v2406_v19  ;;  %v1721_v38 = vpop.f32.mrb[11].mxu1 }
 0x181   : > { %v2434_v61 = vadd.f32 %v2433_v10, %v1721_v38 }
 0x182   : > { %v2078_v40 = vpack.c.bf16 %v2432_v36, %v2428_v59  ;;  %v2401_v41 = vpop.f32.mrb[0].mxu0 }
 0x183   : > { %v2073_v4 = vpack.c.bf16 %v2434_v61, %v2430_v34  ;;  %v2423_v42 = vadd.f32 %v2401_v41, %v2281_v17  ;;  %v1702_v43 = vpop.f32.mrb[1].mxu0 }
 0x184   : > { %2082 = vst [vmem:[%s143_s4 + $0x18] sm:$0xff] %v2078_v40   ;;  %v2424_v46 = vadd.f32 %v1702_v43, %v946_v37  ;;  %v2402_v45 = vpop.f32.mrb[2].mxu0 }
 0x185   : > { %2081 = vst [vmem:[%s143_s4 + $0x10] sm:$0xff] %v2073_v4   ;;  %v2425_v27 = vadd.f32 %v2402_v45, %v2282_v49  ;;  %v1705_v48 = vpop.f32.mrb[3].mxu0 }
 0x186   : > { %v2426_v39 = vadd.f32 %v1705_v48, %v949_v13 }
 0x187   : > { %v2068_v55 = vpack.c.bf16 %v2425_v27, %v2423_v42 }
 0x188   : > { %v2063_v52 = vpack.c.bf16 %v2426_v39, %v2424_v46 }
 0x189   : > { %2080 = vst [vmem:[%s143_s4 + $0x8] sm:$0xff] %v2068_v55  }
 0x18a   : > { %2064 = vst [vmem:[%s143_s4] sm:$0xff] %v2063_v52  }
 0x18b PF: > { %s12_s9 = sadd.s32 1, %s2574_s9  }
 0x18c   : > { %p9_p4 = scmp.ge.s32.totalorder %s12_s9, 4  }
 0x18e   :  { %11 = sbr.rel (!%p9_p4) target bundleno = 1 (0x1), region = 66 }

// kernel: wide_block.7
= control target key start
LH: loop header
LB: loop body
LE: loop exit
PB: predicated region body
PF: predicated region fallthrough
CT: control target
= control target key end

     0   :  { %s2701_s12 = smov 0   ;;  %s3224_s0 = inlined_call_operand.vmem [shape: bf16[2,10,10,128], index: 0, kind: input, shape index: {}]   ;;  %s3225_s1 = inlined_call_operand.vmem [shape: bf16[9,128,128], index: 1, kind: input, shape index: {}]   ;;  %s3226_s2 = inlined_call_operand.vmem [shape: bf16[2,8,8,128], index: 2, kind: input, shape index: {}]   ;;  %s3227_s3 = inlined_call_operand.vmem [shape: bf16[2,8,8,128], index: 3, kind: output, shape index: {}]  }
   0x1 LB: > { %s1895_s13 = sadd.s32 4294967295, %s2679_s12   ;;  %p1899_p0 = scmp.ge.s32.totalorder %s2679_s12, 1  ;;  %s2679_s12 = sphi %s2701_s12, %s13_s12  }
   0x2   : > { %p147_p1 = scmp.lt.s32.totalorder %s2679_s12, 3 }
   0x4   : > { %p148_p2 = pnand %p1899_p0, %p147_p1 }
   0x5   : > { %v2601_v0 = vld [vmem:[%s3225_s1 + $0x40] sm:$0xff] (!%p148_p2)   ;;  %p176_p3 = scmp.lt.s32.totalorder (!%p148_p2), %s1895_s13, 1  ;;  %v2603_v2 = vld [vmem:[%s3225_s1 + $0x48] sm:$0xff] (!%p148_p2)   ;;  %v2605_v4 = vld [vmem:[%s3225_s1 + $0x50] sm:$0xff] (!%p148_p2)   ;;  %vm289_vm4 = vsmask.f32 (!%p148_p2), 3328 }
   0x6   : > { %151 = sbr.rel (%p148_p2) target bundleno = 397 (0x18d), region = 32  ;;  %v2602_v1 = vld [vmem:[%s3225_s1 + $0x100] sm:$0xff] (!%p148_p2)   ;;  %2296 = vmatprep.subr.bf16.mxu1 (!%p148_p2), %v2601_v0  ;;  %v2604_v3 = vld [vmem:[%s3225_s1 + $0x108] sm:$0xff] (!%p148_p2)   ;;  %v2606_v5 = vld [vmem:[%s3225_s1 + $0x110] sm:$0xff] (!%p148_p2)   ;;  %vm290_vm5 = vsmask.f32 (!%p148_p2), 7440 }
   0x7   : > { %2392 = vmatprep.subr.bf16.mxu0 (!%p148_p2), %v2602_v1  ;;  %2297 = vmatpush3.bf16.msra.mxu1 (!%p148_p2), %v2601_v0  ;;  %v2607_v6 = vld [vmem:[%s3225_s1 + $0x58] sm:$0xff] (!%p148_p2)   ;;  %v2609_v8 = vld [vmem:[%s3225_s1 + $0x60] sm:$0xff] (!%p148_p2)   ;;  %v2611_v10 = vld [vmem:[%s3225_s1 + $0x68] sm:$0xff] (!%p148_p2)  }
   0x8   : > { %2393 = vmatpush3.bf16.msra.mxu0 (!%p148_p2), %v2602_v1  ;;  %2298 = vmatprep.subr.bf16.mxu1 (!%p148_p2), %v2603_v2  ;;  %v2608_v7 = vld [vmem:[%s3225_s1 + $0x118] sm:$0xff] (!%p148_p2)   ;;  %v2610_v9 = vld [vmem:[%s3225_s1 + $0x120] sm:$0xff] (!%p148_p2)   ;;  %v2612_v14 = vld [vmem:[%s3225_s1 + $0x128] sm:$0xff] (!%p148_p2)  }
   0x9   : > { %2394 = vmatprep.subr.bf16.mxu0 (!%p148_p2), %v2604_v3  ;;  %v2613_v18 = vld [vmem:[%s3225_s1 + $0x70] sm:$0xff] (!%p148_p2)   ;;  %v2615_v30 = vld [vmem:[%s3225_s1 + $0x78] sm:$0xff] (!%p148_p2)   ;;  %vm2789_vm9 = vmor (!%p148_p2), %vm289_vm4, %vm290_vm5 }
   0xa   : > { %v2614_v19 = vld [vmem:[%s3225_s1 + $0x130] sm:$0xff] (!%p148_p2)   ;;  %v2616_v43 = vld [vmem:[%s3225_s1 + $0x138] sm:$0xff] (!%p148_p2)   ;;  %v2617_v53 = vld [vmem:[%s3225_s1] sm:$0xff] (!%p148_p2)  }
   0xb   : > { %2299 = vmatpush3.bf16.msra.mxu1 (!%p148_p2), %v2603_v2  ;;  %v2815_v61 = vld [vmem:[%s3225_s1 + $0x140] sm:$0xff] (!%p148_p2)  }
   0xc   : > { %2395 = vmatpush3.bf16.msra.mxu0 (!%p148_p2), %v2604_v3  ;;  %2300 = vmatprep.subr.bf16.mxu1 (!%p148_p2), %v2605_v4  ;;  %v2642_v45 = vld [vmem:[%s3225_s1 + $0x1a0] sm:$0xff] (!%p148_p2)  }
   0xd   : > { %s3233_s13 = smov (!%p176_p3, %s1895_s13), 1  ;;  %2396 = vmatprep.subr.bf16.mxu0 %v2606_v5 }
   0xe   : > { %s2592_s30 = smul.u32 80, %s3233_s13  ;;  %s2144_s11 = sshll.u32 %s3233_s13, 5 }
   0xf   : > { %2301 = vmatpush3.bf16.msra.mxu1 %v2605_v4  ;;  %s185_s16 = scalar_lea.vmem %s3226_s2, %s2144_s11  ;;  %s190_s18 = scalar_lea.vmem %s3227_s3, %s2144_s11 }
  0x10   : > { %2397 = vmatpush3.bf16.msra.mxu0 %v2606_v5  ;;  %2302 = vmatprep.subr.bf16.mxu1 %v2607_v6  ;;  %s2745_s10 = scalar_lea.vmem %s3224_s0, %s2592_s30 }
  0x11   : > { %2398 = vmatprep.subr.bf16.mxu0 %v2608_v7  ;;  %v193_v11 = vld [vmem:[%s2745_s10] sm:$0xf]  ;;  %v194_v12 = vld [vmem:[%s2745_s10 + $0x4] sm:$0x1]  ;;  %v195_v13 = vld [vmem:[%s2745_s10 + $0x8] sm:$0xf] }
  0x12   : > { %v196_v15 = vld [vmem:[%s2745_s10 + $0xc] sm:$0x1]  ;;  %vm213_vm0 = vcmp.ge.bf16.partialorder %v193_v11, 0  ;;  %vm214_vm1 = vcmp.ge.bf16.partialorder %v194_v12, 0  ;;  %vm215_vm2 = vcmp.ge.bf16.partialorder %v195_v13, 0 }
  0x13   : > { %2303 = vmatpush3.bf16.msra.mxu1 %v2607_v6  ;;  %vm216_vm3 = vcmp.ge.bf16.partialorder %v196_v15, 0  ;;  %v233_v16 = vmul.bf16 1009007652, %v193_v11  ;;  %v234_v17 = vmul.bf16 1009007652, %v194_v12 }
  0x14   : > { %2399 = vmatpush3.bf16.msra.mxu0 %v2608_v7  ;;  %2304 = vmatprep.subr.bf16.mxu1 %v2609_v8  ;;  %v235_v20 = vmul.bf16 1009007652, %v195_v13  ;;  %v236_v21 = vmul.bf16 1009007652, %v196_v15  ;;  %v197_v28 = vld [vmem:[%s2745_s10 + $0x10] sm:$0xf] }
  0x15   : > { %2400 = vmatprep.subr.bf16.mxu0 %v2610_v9  ;;  %v2763_v22 = vsel %vm213_vm0, %v193_v11, %v233_v16  ;;  %v2765_v23 = vsel %vm214_vm1, %v194_v12, %v234_v17  ;;  %v198_v29 = vld [vmem:[%s2745_s10 + $0x14] sm:$0x1]  ;;  %v199_v35 = vld [vmem:[%s2745_s10 + $0x18] sm:$0xf]  ;;  %v200_v38 = vld [vmem:[%s2745_s10 + $0x1c] sm:$0x1] }
  0x16   : > { %v2767_v24 = vsel %vm215_vm2, %v195_v13, %v235_v20  ;;  %v2769_v25 = vsel %vm216_vm3, %v196_v15, %v236_v21  ;;  %v293_v26 = vshrl.u32 %v2763_v22, 16  ;;  %v296_v27 = vshll.u32 %v2763_v22, 16  ;;  %v201_v56 = vld [vmem:[%s2745_s10 + $0x20] sm:$0xf]  ;;  %v202_v62 = vld [vmem:[%s2745_s10 + $0x24] sm:$0x1] }
  0x17   : > { %2305 = vmatpush3.bf16.msra.mxu1 %v2609_v8  ;;  %v302_v31 = vshll.u32 %v2765_v23, 16  ;;  %v307_v32 = vshrl.u32 %v2767_v24, 16  ;;  %v310_v33 = vshll.u32 %v2767_v24, 16  ;;  %v316_v34 = vshll.u32 %v2769_v25, 16 }
  0x18   : > { %2401 = vmatpush3.bf16.msra.mxu0 %v2610_v9  ;;  %2306 = vmatprep.subr.bf16.mxu1 %v2611_v10  ;;  %v295_v36 = vrot.slane %v293_v26, 4  ;;  %v298_v37 = vrot.slane %v296_v27, 5  ;;  %vm217_vm6 = vcmp.ge.bf16.partialorder %v197_v28, 0  ;;  %vm218_vm7 = vcmp.ge.bf16.partialorder %v198_v29, 0 }
  0x19   : > { %2402 = vmatprep.subr.bf16.mxu0 %v2612_v14  ;;  %v304_v39 = vrot.slane %v302_v31, 5  ;;  %v309_v40 = vrot.slane %v307_v32, 4  ;;  %v312_v41 = vrot.slane %v310_v33, 5  ;;  %v318_v42 = vrot.slane %v316_v34, 5 }
  0x1a   : > { %v299_v44 = vor.u32 %v298_v37, %v295_v36  ;;  %vm219_vm8 = vcmp.ge.bf16.partialorder %v199_v35, 0  ;;  %vm220_vm10 = vcmp.ge.bf16.partialorder %v200_v38, 0  ;;  %v237_v47 = vmul.bf16 1009007652, %v197_v28  ;;  %v2619_v37 = vld [vmem:[%s3225_s1 + $0x8] sm:$0xff]  }
  0x1b   : > { %2307 = vmatpush3.bf16.msra.mxu1 %v2611_v10  ;;  %v313_v46 = vor.u32 %v312_v41, %v309_v40  ;;  %v238_v48 = vmul.bf16 1009007652, %v198_v29  ;;  %v239_v50 = vmul.bf16 1009007652, %v199_v35  ;;  %v240_v51 = vmul.bf16 1009007652, %v200_v38 }
  0x1c   : > { %2403 = vmatpush3.bf16.msra.mxu0 %v2612_v14  ;;  %2308 = vmatprep.subr.bf16.mxu1 %v2613_v18  ;;  %v300_v49 = vrot.slane %v299_v44, 4  ;;  %v2797_v54 = vsel %vm217_vm6, %v197_v28, %v237_v47  ;;  %vm221_vm11 = vcmp.ge.bf16.partialorder %v201_v56, 0  ;;  %vm222_vm12 = vcmp.ge.bf16.partialorder %v202_v62, 0  ;;  %v2621_v40 = vld [vmem:[%s3225_s1 + $0x10] sm:$0xff]   ;;  %v204_v41 = vld [vmem:[%s2745_s10 + $0x2c] sm:$0x1] }
  0x1d   : > { %2404 = vmatprep.subr.bf16.mxu0 %v2614_v19  ;;  %v314_v52 = vrot.slane %v313_v46, 4  ;;  %v2800_v55 = vsel %vm218_vm7, %v198_v29, %v238_v48  ;;  %v2806_v58 = vsel %vm219_vm8, %v199_v35, %v239_v50  ;;  %v2809_v59 = vsel %vm220_vm10, %v200_v38, %v240_v51  ;;  %v2620_v46 = vld [vmem:[%s3225_s1 + $0x148] sm:$0xff]   ;;  %v205_v48 = vld [vmem:[%s2745_s10 + $0x30] sm:$0xf] }
  0x1e   : > { %v305_v57 = vsel %vm2789_vm9, %v300_v49, %v304_v39  ;;  %v321_v60 = vshrl.u32 %v2797_v54, 16  ;;  %v324_v0 = vshll.u32 %v2797_v54, 16  ;;  %v330_v1 = vshll.u32 %v2800_v55, 16  ;;  %v203_v39 = vld [vmem:[%s2745_s10 + $0x28] sm:$0xf] }
  0x1f   : > { %2309 = vmatpush3.bf16.msra.mxu1 %v2613_v18  ;;  %v319_v63 = vsel %vm2789_vm9, %v314_v52, %v318_v42  ;;  %v335_v2 = vshrl.u32 %v2806_v58, 16  ;;  %v338_v5 = vshll.u32 %v2806_v58, 16  ;;  %v344_v6 = vshll.u32 %v2809_v59, 16  ;;  %v206_v49 = vld [vmem:[%s2745_s10 + $0x34] sm:$0x1] }
  0x20   : > { %2405 = vmatpush3.bf16.msra.mxu0 %v2614_v19  ;;  %2310 = vmatprep.subr.bf16.mxu1 %v2615_v30  ;;  %v1921_v3 = vcombine.low %v305_v57, %v319_v63  ;;  %v323_v4 = vrot.slane %v321_v60, 4  ;;  %v326_v7 = vrot.slane %v324_v0, 5  ;;  %v332_v9 = vrot.slane %v330_v1, 5  ;;  %v2623_v57 = vld [vmem:[%s3225_s1 + $0x18] sm:$0xff]  }
  0x21   : > { %2406 = vmatprep.subr.bf16.mxu0 %v2616_v43  ;;  %v337_v8 = vrot.slane %v335_v2, 4  ;;  %v340_v10 = vrot.slane %v338_v5, 5  ;;  %v346_v11 = vrot.slane %v344_v6, 5  ;;  %v241_v13 = vmul.bf16 1009007652, %v201_v56 }
  0x22   : > { %2312 = vmatprep.mubr.bf16.mxu1 %v1921_v3  ;;  %v327_v12 = vor.u32 %v326_v7, %v323_v4  ;;  %v242_v14 = vmul.bf16 1009007652, %v202_v62  ;;  %v1997_v16 = vcombine.low %v2767_v24, %v2797_v54  ;;  %v704_v28 = vrot.slane %v2769_v25, 5  ;;  %v208_v4 = vld [vmem:[%s2745_s10 + $0x3c] sm:$0x1] }
  0x23   : > { %2311 = vmatpush3.bf16.msra.mxu1 %v2615_v30  ;;  %v341_v15 = vor.u32 %v340_v10, %v337_v8  ;;  %v2828_v18 = vsel %vm221_vm11, %v201_v56, %v241_v13  ;;  %vm223_vm13 = vcmp.ge.bf16.partialorder %v203_v39, 0  ;;  %v243_v42 = vmul.bf16 1009007652, %v203_v39  ;;  %v210_v10 = vld [vmem:[%s2745_s10 + $0x44] sm:$0x1]  ;;  %v2631_v25 = vld [vmem:[%s3225_s1 + $0x38] sm:$0xff]  }
  0x24   : > { %2407 = vmatpush3.bf16.msra.mxu0 %v2616_v43  ;;  %2320 = vmatprep.subr.bf16.mxu1 %v2617_v53  ;;  %v328_v17 = vrot.slane %v327_v12, 4  ;;  %v2830_v19 = vsel %vm222_vm12, %v202_v62, %v242_v14  ;;  %v349_v21 = vshrl.u32 %v2828_v18, 16  ;;  %v352_v26 = vshll.u32 %v2828_v18, 16  ;;  %v207_v62 = vld [vmem:[%s2745_s10 + $0x38] sm:$0xf] }
  0x25   : > { %2416 = vmatprep.subr.bf16.mxu0 %v2815_v61  ;;  %v342_v20 = vrot.slane %v341_v15, 4  ;;  %v358_v27 = vshll.u32 %v2830_v19, 16  ;;  %v1998_v30 = vcombine.low %v2806_v58, %v2828_v18  ;;  %vm224_vm14 = vcmp.ge.bf16.partialorder %v204_v41, 0 }
  0x26   : > { %v333_v29 = vsel %vm2789_vm9, %v328_v17, %v332_v9  ;;  %v351_v33 = vrot.slane %v349_v21, 4  ;;  %v354_v34 = vrot.slane %v352_v26, 5  ;;  %v244_v44 = vmul.bf16 1009007652, %v204_v41  ;;  %v209_v9 = vld [vmem:[%s2745_s10 + $0x40] sm:$0xf] }
  0x27   : > { %v347_v31 = vsel %vm2789_vm9, %v342_v20, %v346_v11  ;;  %v2025_v32 = vcombine.low %v319_v63, %v333_v29  ;;  %v360_v36 = vrot.slane %v358_v27, 5  ;;  %v2856_v47 = vsel %vm223_vm13, %v203_v39, %v243_v42  ;;  %v2622_v11 = vld [vmem:[%s3225_s1 + $0x150] sm:$0xff]   ;;  %v2625_v20 = vld [vmem:[%s3225_s1 + $0x20] sm:$0xff]   ;;  %v2627_v42 = vld [vmem:[%s3225_s1 + $0x28] sm:$0xff]  }
  0x28   : > { %v2842_v35 = vcombine.low %v333_v29, %v347_v31  ;;  %v355_v38 = vor.u32 %v354_v34, %v351_v33  ;;  %v2862_v51 = vsel %vm224_vm14, %v204_v41, %v244_v44  ;;  %v363_v52 = vshrl.u32 %v2856_v47, 16 }
  0x29   : > { %2408 = vmatprep.mubr.bf16.mxu0 %v2025_v32  ;;  %v372_v60 = vshll.u32 %v2862_v51, 16  ;;  %vm225_vm15 = vcmp.ge.bf16.partialorder %v205_v48, 0  ;;  %vm226_vm0 = vcmp.ge.bf16.partialorder %v206_v49, 0  ;;  %v245_v1 = vmul.bf16 1009007652, %v205_v48 }
  0x2a   : > { %2313 = vmatmul.mubr.bf16.vlgmr.msra.gmra.mrb[0].mxu1 %v2842_v35  ;;  %v356_v43 = vrot.slane %v355_v38, 4  ;;  %v365_v63 = vrot.slane %v363_v52, 4  ;;  %v246_v2 = vmul.bf16 1009007652, %v206_v49  ;;  %vm227_vm1 = vcmp.ge.bf16.partialorder %v207_v62, 0 }
  0x2b   : > { %2321 = vmatpush3.bf16.msra.mxu1 %v2617_v53  ;;  %v366_v53 = vshll.u32 %v2856_v47, 16  ;;  %v374_v3 = vrot.slane %v372_v60, 5  ;;  %v247_v5 = vmul.bf16 1009007652, %v207_v62  ;;  %vm695_vm2 = vcmask 1042432  }
  0x2c   : > { %2322 = vmatprep.subr.bf16.mxu1 %v2619_v37  ;;  %v361_v50 = vsel %vm2789_vm9, %v356_v43, %v360_v36  ;;  %vm696_vm3 = vcmask 1046532   ;;  %v2874_v7 = vsel %vm225_vm15, %v205_v48, %v245_v1  ;;  %v2877_v8 = vsel %vm226_vm0, %v206_v49, %v246_v2 }
  0x2d   : > { %v2026_v56 = vcombine.low %v347_v31, %v361_v50  ;;  %v368_v0 = vrot.slane %v366_v53, 5  ;;  %vm228_vm4 = vcmp.ge.bf16.partialorder %v208_v4, 0  ;;  %v377_v12 = vshrl.u32 %v2874_v7, 16  ;;  %v2624_v31 = vld [vmem:[%s3225_s1 + $0x158] sm:$0xff]   ;;  %vm2929_vm7 = vmor %vm695_vm2, %vm696_vm3 }
  0x2e   : > { %v380_v13 = vshll.u32 %v2874_v7, 16  ;;  %v248_v14 = vmul.bf16 1009007652, %v208_v4  ;;  %v2888_v17 = vsel %vm227_vm1, %v207_v62, %v247_v5  ;;  %vm229_vm5 = vcmp.ge.bf16.partialorder %v209_v9, 0  ;;  %v2628_v5 = vld [vmem:[%s3225_s1 + $0x168] sm:$0xff]  }
  0x2f   : > { %2323 = vmatpush3.bf16.msra.mxu1 %v2619_v37  ;;  %2409 = vmatmul.mubr.bf16.vlgmr.msra.gmra.mrb[0].mxu0 %v2026_v56  ;;  %v369_v6 = vor.u32 %v368_v0, %v365_v63  ;;  %vm230_vm6 = vcmp.ge.bf16.partialorder %v210_v10, 0  ;;  %v379_v21 = vrot.slane %v377_v12, 4  ;;  %v391_v33 = vshrl.u32 %v2888_v17, 16 }
  0x30   : > { %2324 = vmatprep.subr.bf16.mxu1 %v2621_v40  ;;  %2417 = vmatpush3.bf16.msra.mxu0 %v2815_v61  ;;  %v386_v61 = vshll.u32 %v2877_v8, 16  ;;  %v382_v26 = vrot.slane %v380_v13, 5  ;;  %v2894_v29 = vsel %vm228_vm4, %v208_v4, %v248_v14  ;;  %v394_v34 = vshll.u32 %v2888_v17, 16 }
  0x31   : > { %2418 = vmatprep.subr.bf16.mxu0 %v2620_v46  ;;  %v370_v15 = vrot.slane %v369_v6, 4  ;;  %v400_v36 = vshll.u32 %v2894_v29, 16  ;;  %v249_v39 = vmul.bf16 1009007652, %v209_v9  ;;  %v708_v41 = vrot.slane %v2800_v55, 5  ;;  %v2626_v55 = vld [vmem:[%s3225_s1 + $0x160] sm:$0xff]  }
  0x32   : > { %v388_v27 = vrot.slane %v386_v61, 5  ;;  %v383_v38 = vor.u32 %v382_v26, %v379_v21  ;;  %v393_v43 = vrot.slane %v391_v33, 4  ;;  %v396_v44 = vrot.slane %v394_v34, 5  ;;  %v2629_v6 = vld [vmem:[%s3225_s1 + $0x30] sm:$0xff]  }
  0x33   : > { %2325 = vmatpush3.bf16.msra.mxu1 %v2621_v40  ;;  %v375_v32 = vsel %vm2789_vm9, %v370_v15, %v374_v3  ;;  %v250_v40 = vmul.bf16 1009007652, %v210_v10  ;;  %v402_v48 = vrot.slane %v400_v36, 5  ;;  %v2912_v49 = vsel %vm229_vm5, %v209_v9, %v249_v39  ;;  %v2630_v33 = vld [vmem:[%s3225_s1 + $0x170] sm:$0xff]  }
  0x34   : > { %2326 = vmatprep.subr.bf16.mxu1 %v2623_v57  ;;  %2419 = vmatpush3.bf16.msra.mxu0 %v2620_v46  ;;  %v2904_v37 = vcombine.low %v361_v50, %v375_v32  ;;  %v384_v46 = vrot.slane %v383_v38, 4  ;;  %v397_v52 = vor.u32 %v396_v44, %v393_v43  ;;  %v1033_v53 = vshrl.u32 %v2912_v49, 16  ;;  %v2635_v43 = vld [vmem:[%s3225_s1 + $0x88] sm:$0xff]  }
  0x35   : > { %2420 = vmatprep.subr.bf16.mxu0 %v2622_v11  ;;  %v2915_v50 = vsel %vm230_vm6, %v210_v10, %v250_v40  ;;  %v1036_v56 = vshll.u32 %v2912_v49, 16  ;;  %v1946_v62 = vrot.slane %v2767_v24, 9  ;;  %v1947_v63 = vrot.slane %v2797_v54, 9 }
  0x36   : > { %2316 = vmatprep.mubr.bf16.mxu1 %v2904_v37  ;;  %v389_v60 = vsel %vm2789_vm9, %v384_v46, %v388_v27  ;;  %v398_v1 = vrot.slane %v397_v52, 4  ;;  %v1035_v2 = vrot.slane %v1033_v53, 4  ;;  %v1933_v12 = vcombine.low %v2763_v22, %v2767_v24  ;;  %v2659_v24 = vld [vmem:[%s3225_s1 + $0xe8] sm:$0xff]  }
  0x37   : > { %2327 = vmatpush3.bf16.msra.mxu1 %v2623_v57  ;;  %v1042_v57 = vshll.u32 %v2915_v50, 16  ;;  %v2027_v0 = vcombine.low %v375_v32, %v389_v60  ;;  %v1038_v3 = vrot.slane %v1036_v56, 5  ;;  %v2949_v61 = vsel %vm2929_vm7, %v1946_v62, %v704_v28 }
  0x38   : > { %2328 = vmatprep.subr.bf16.mxu1 %v2625_v20  ;;  %2421 = vmatpush3.bf16.msra.mxu0 %v2622_v11  ;;  %v403_v10 = vsel %vm2789_vm9, %v398_v1, %v402_v48  ;;  %v2953_v14 = vsel %vm2929_vm7, %v1947_v63, %v708_v41  ;;  %v1999_v15 = vcombine.low %v2856_v47, %v2874_v7  ;;  %v700_v28 = vrot.slane %v2765_v23, 5  ;;  %v212_v48 = vld [vmem:[%s2745_s10 + $0x4c] sm:$0x1] }
  0x39   : > { %2422 = vmatprep.subr.bf16.mxu0 %v2624_v31  ;;  %v1044_v9 = vrot.slane %v1042_v57, 5  ;;  %2412 = vmatprep.mubr.bf16.mxu0 %v2027_v0  ;;  %v1039_v11 = vor.u32 %v1038_v3, %v1035_v2  ;;  %v2943_v13 = vcombine.low %v389_v60, %v403_v10  ;;  %v2000_v21 = vcombine.low %v2888_v17, %v2912_v49  ;;  %v2634_v0 = vld [vmem:[%s3225_s1 + $0x180] sm:$0xff]  }
  0x3a   : > { %v712_v26 = vrot.slane %v2809_v59, 5  ;;  %v716_v32 = vrot.slane %v2830_v19, 5  ;;  %v2633_v59 = vld [vmem:[%s3225_s1 + $0x80] sm:$0xff]   ;;  %v1948_v34 = vrot.slane %v2806_v58, 9  ;;  %v2632_v19 = vld [vmem:[%s3225_s1 + $0x178] sm:$0xff]   ;;  %v1949_v36 = vrot.slane %v2828_v18, 9 }
  0x3b   : > { %2329 = vmatpush3.bf16.msra.mxu1 %v2625_v20  ;;  %v1040_v20 = vrot.slane %v1039_v11, 4  ;;  %v1950_v38 = vrot.slane %v2856_v47, 9  ;;  %v2987_v39 = vcombine.low %v2797_v54, %v2806_v58  ;;  %v720_v40 = vrot.slane %v2862_v51, 5  ;;  %v2658_v54 = vld [vmem:[%s3225_s1 + $0x1e0] sm:$0xff]   ;;  %v2668_v58 = vld [vmem:[%s3225_s1 + $0x218] sm:$0xff]  }
  0x3c   : > { %2330 = vmatprep.subr.bf16.mxu1 %v2627_v42  ;;  %2423 = vmatpush3.bf16.msra.mxu0 %v2624_v31  ;;  %v2054_v31 = vcombine.low %v2949_v61, %v2953_v14  ;;  %v1951_v41 = vrot.slane %v2874_v7, 9  ;;  %v2997_v44 = vcombine.low %v2828_v18, %v2856_v47  ;;  %v724_v46 = vrot.slane %v2877_v8, 5  ;;  %v2669_v18 = vld [vmem:[%s3225_s1 + $0x220] sm:$0xff]   ;;  %v2671_v47 = vld [vmem:[%s3225_s1 + $0x230] sm:$0xff]  }
  0x3d   : > { %2424 = vmatprep.subr.bf16.mxu0 %v2626_v55  ;;  %2317 = vmatmul.mubr.bf16.gmra.mrb[4].mxu1 %v2943_v13  ;;  %v2967_v27 = vsel %vm2789_vm9, %v1040_v20, %v1044_v9  ;;  %v3003_v51 = vsel %vm2929_vm7, %v1948_v34, %v712_v26  ;;  %vm232_vm10 = vcmp.ge.bf16.partialorder %v212_v48, 0  ;;  %v252_v52 = vmul.bf16 1009007652, %v212_v48 }
  0x3e   : > { %2336 = vmatprep.mubr.bf16.mxu1 %v1933_v12  ;;  %v2028_v23 = vcombine.low %v403_v10, %v2967_v27  ;;  %v2037_v53 = vrot.slane %v2912_v49, 9  ;;  %v3008_v56 = vsel %vm2929_vm7, %v1949_v36, %v716_v32  ;;  %v1196_v8 = vrot.slane %v2915_v50, 5  ;;  %v2636_v32 = vld [vmem:[%s3225_s1 + $0x188] sm:$0xff]  }
  0x3f   : > { %2331 = vmatpush3.bf16.msra.mxu1 %v2627_v42  ;;  %v211_v42 = vld [vmem:[%s2745_s10 + $0x48] sm:$0xf]  ;;  %v1945_v60 = vrot.slane %v2763_v22, 9  ;;  %v272_v62 = vsel %vm232_vm10, %v212_v48, %v252_v52  ;;  %v3021_v1 = vsel %vm2929_vm7, %v1950_v38, %v720_v40  ;;  %v3025_v50 = vsel %vm2929_vm7, %v1951_v41, %v724_v46  ;;  %v2638_v38 = vld [vmem:[%s3225_s1 + $0x190] sm:$0xff]   ;;  %v2641_v40 = vld [vmem:[%s3225_s1 + $0xa0] sm:$0xff]  }
  0x40   : > { %2332 = vmatprep.subr.bf16.mxu1 %v2629_v6  ;;  %2425 = vmatpush3.bf16.msra.mxu0 %v2626_v55  ;;  %vm231_vm8 = vcmp.ge.bf16.partialorder %v211_v42, 0  ;;  %v251_v55 = vmul.bf16 1009007652, %v211_v42  ;;  %v1645_v22 = vrot.slane %v272_v62, 5  ;;  %v2055_v2 = vcombine.low %v3003_v51, %v3008_v56  ;;  %v2643_v46 = vld [vmem:[%s3225_s1 + $0xa8] sm:$0xff]   ;;  %v2649_v52 = vld [vmem:[%s3225_s1 + $0xc0] sm:$0xff]  }
  0x41   : > { %2426 = vmatprep.subr.bf16.mxu0 %v2628_v5  ;;  %2413 = vmatmul.mubr.bf16.gmra.mrb[4].mxu0 %v2028_v23  ;;  %v1952_v3 = vrot.slane %v2888_v17, 9  ;;  %v3037_v9 = vsel %vm2929_vm7, %v2037_v53, %v1196_v8  ;;  %v701_v11 = vsel %vm2929_vm7, %v1945_v60, %v700_v28  ;;  %v2056_v20 = vcombine.low %v3021_v1, %v3025_v50  ;;  %v2644_v48 = vld [vmem:[%s3225_s1 + $0x1a8] sm:$0xff]   ;;  %v2648_v8 = vld [vmem:[%s3225_s1 + $0x1b8] sm:$0xff]  }
  0x42   : > { %2432 = vmatprep.mubr.bf16.mxu0 %v2054_v31  ;;  %v3010_v57 = vsel %vm231_vm8, %v211_v42, %v251_v55  ;;  %v3056_v28 = vcombine.low %v2874_v7, %v2888_v17  ;;  %v1969_v23 = vcombine.low %v701_v11, %v2949_v61  ;;  %v2646_v55 = vld [vmem:[%s3225_s1 + $0x1b0] sm:$0xff]   ;;  %v3104_v53 = vcombine.low %v2953_v14, %v3003_v51  ;;  %v2650_v14 = vld [vmem:[%s3225_s1 + $0x1c0] sm:$0xff]   ;;  %v2672_v7 = vld [vmem:[%s3225_s1 + $0x238] sm:$0xff]  }
  0x43   : > { %2333 = vmatpush3.bf16.msra.mxu1 %v2629_v6  ;;  %v2116_v63 = vrot.slane %v3010_v57, 9  ;;  %v2637_v6 = vld [vmem:[%s3225_s1 + $0x90] sm:$0xff]   ;;  %v1491_v12 = vshll.u32 %v3010_v57, 16  ;;  %v3111_v60 = vcombine.low %v3008_v56, %v3021_v1  ;;  %v2652_v56 = vld [vmem:[%s3225_s1 + $0x1c8] sm:$0xff]  }
  0x44   : > { %2334 = vmatprep.subr.bf16.mxu1 %v2631_v25  ;;  %2427 = vmatpush3.bf16.msra.mxu0 %v2628_v5  ;;  %v1488_v5 = vshrl.u32 %v3010_v57, 16  ;;  %v2653_v51 = vld [vmem:[%s3225_s1 + $0xd0] sm:$0xff]  }
  0x45   : > { %2428 = vmatprep.subr.bf16.mxu0 %v2630_v33  ;;  %v3041_v10 = vsel %vm2929_vm7, %v2116_v63, %v1645_v22  ;;  %v2654_v1 = vld [vmem:[%s3225_s1 + $0x1d0] sm:$0xff]   ;;  %v2656_v22 = vld [vmem:[%s3225_s1 + $0x1d8] sm:$0xff]  }
  0x46   : > { %v2133_v26 = vcombine.low %v3037_v9, %v3041_v10  ;;  %v1490_v31 = vrot.slane %v1488_v5, 4  ;;  %v2664_v5 = vld [vmem:[%s3225_s1 + $0x1f8] sm:$0xff]   ;;  %v2667_v11 = vld [vmem:[%s3225_s1 + $0x210] sm:$0xff]  }
  0x47   : > { %2335 = vmatpush3.bf16.msra.mxu1 %v2631_v25  ;;  %v728_v25 = vrot.slane %v2894_v29, 5  ;;  %v2639_v29 = vld [vmem:[%s3225_s1 + $0x98] sm:$0xff]  }
  0x48   : > { %2344 = vmatprep.subr.bf16.mxu1 %v2633_v59  ;;  %2429 = vmatpush3.bf16.msra.mxu0 %v2630_v33  ;;  %v1493_v33 = vrot.slane %v1491_v12, 5 }
  0x49   : > { %2430 = vmatprep.subr.bf16.mxu0 %v2632_v19 }
  0x4a   : > { %2337 = vmatmul.mubr.bf16.vlgmr.msra.gmra.mrb[0].mxu1 %v2987_v39  ;;  %v1494_v34 = vor.u32 %v1493_v33, %v1490_v31 }
  0x4b   : > { %2345 = vmatpush3.bf16.msra.mxu1 %v2633_v59  ;;  %2340 = vmatprep.mubr.bf16.mxu1 %v2997_v44  ;;  %v1497_v59 = vshll.u32 %v272_v62, 16  ;;  %v2651_v62 = vld [vmem:[%s3225_s1 + $0xc8] sm:$0xff]  }
  0x4c   : > { %2346 = vmatprep.subr.bf16.mxu1 %v2635_v43  ;;  %2431 = vmatpush3.bf16.msra.mxu0 %v2632_v19  ;;  %v729_v19 = vsel %vm2929_vm7, %v1952_v3, %v728_v25  ;;  %v1495_v61 = vrot.slane %v1494_v34, 4  ;;  %v2665_v3 = vld [vmem:[%s3225_s1 + $0x200] sm:$0xff]  }
  0x4d   : > { %2440 = vmatprep.subr.bf16.mxu0 %v2634_v0  ;;  %v1499_v36 = vrot.slane %v1497_v59, 5  ;;  %v2057_v41 = vcombine.low %v729_v19, %v3037_v9  ;;  %v3128_v63 = vcombine.low %v3025_v50, %v729_v19  ;;  %v2082_v50 = vcombine.low %v2912_v49, %v3010_v57  ;;  %v2660_v57 = vld [vmem:[%s3225_s1 + $0x1e8] sm:$0xff]   ;;  %v2183_v59 = vld [vmem:[%s185_s16 + $0x10] sm:$0xff]  }
  0x4f   : > { %2347 = vmatpush3.bf16.msra.mxu1 %v2635_v43  ;;  %2433 = vmatmul.mubr.bf16.vlgmr.msra.gmra.mrb[0].mxu0 %v2055_v2  ;;  %v1500_v4 = vsel %vm2789_vm9, %v1495_v61, %v1499_v36  ;;  %v2640_v43 = vld [vmem:[%s3225_s1 + $0x198] sm:$0xff]   ;;  %v2662_v2 = vld [vmem:[%s3225_s1 + $0x1f0] sm:$0xff]  }
  0x50   : > { %2348 = vmatprep.subr.bf16.mxu1 %v2637_v6  ;;  %2441 = vmatpush3.bf16.msra.mxu0 %v2634_v0  ;;  %v3075_v42 = vcombine.low %v2967_v27, %v1500_v4  ;;  %v2645_v27 = vld [vmem:[%s3225_s1 + $0xb0] sm:$0xff]   ;;  %v2655_v0 = vld [vmem:[%s3225_s1 + $0xd8] sm:$0xff]   ;;  %v2157_v4 = vunpack.c.h.bf16 %v2183_v59 }
  0x51   : > { %2436 = vmatprep.mubr.bf16.mxu0 %v2056_v20  ;;  %2442 = vmatprep.subr.bf16.mxu0 %v2636_v32 }
  0x52   : > { %2341 = vmatmul.mubr.bf16.gmra.mrb[4].mxu1 %v3056_v28 }
  0x53   : > { %2349 = vmatpush3.bf16.msra.mxu1 %v2637_v6  ;;  %2360 = vmatprep.mubr.bf16.mxu1 %v1969_v23  ;;  %v2666_v6 = vld [vmem:[%s3225_s1 + $0x208] sm:$0xff]  }
  0x54   : > { %2350 = vmatprep.subr.bf16.mxu1 %v2639_v29  ;;  %2443 = vmatpush3.bf16.msra.mxu0 %v2636_v32 }
  0x55   : > { %2444 = vmatprep.subr.bf16.mxu0 %v2638_v38 }
  0x57   : > { %2351 = vmatpush3.bf16.msra.mxu1 %v2639_v29  ;;  %2437 = vmatmul.mubr.bf16.gmra.mrb[4].mxu0 %v2057_v41 }
  0x58   : > { %2352 = vmatprep.subr.bf16.mxu1 %v2641_v40  ;;  %2445 = vmatpush3.bf16.msra.mxu0 %v2638_v38 }
  0x59   : > { %2456 = vmatprep.mubr.bf16.mxu0 %v2987_v39  ;;  %2446 = vmatprep.subr.bf16.mxu0 %v2640_v43  ;;  %v2647_v39 = vld [vmem:[%s3225_s1 + $0xb8] sm:$0xff]  }
  0x5b   : > { %2353 = vmatpush3.bf16.msra.mxu1 %v2641_v40  ;;  %v2156_v40 = vunpack.c.l.bf16 %v2183_v59 }
  0x5c   : > { %2354 = vmatprep.subr.bf16.mxu1 %v2643_v46  ;;  %2447 = vmatpush3.bf16.msra.mxu0 %v2640_v43 }
  0x5d   : > { %2448 = vmatprep.subr.bf16.mxu0 %v2642_v45 }
  0x5f   : > { %2355 = vmatpush3.bf16.msra.mxu1 %v2643_v46  ;;  %v2182_v46 = vld [vmem:[%s185_s16 + $0x8] sm:$0xff]  }
  0x60   : > { %2356 = vmatprep.subr.bf16.mxu1 %v2645_v27  ;;  %2449 = vmatpush3.bf16.msra.mxu0 %v2642_v45 }
  0x61   : > { %2450 = vmatprep.subr.bf16.mxu0 %v2644_v48 }
  0x63   : > { %2357 = vmatpush3.bf16.msra.mxu1 %v2645_v27 }
  0x64   : > { %2358 = vmatprep.subr.bf16.mxu1 %v2647_v39  ;;  %2451 = vmatpush3.bf16.msra.mxu0 %v2644_v48  ;;  %v2147_v48 = vld [vmem:[%s185_s16] sm:$0xff]  }
  0x65   : > { %2452 = vmatprep.subr.bf16.mxu0 %v2646_v55 }
  0x67   : > { %2359 = vmatpush3.bf16.msra.mxu1 %v2647_v39 }
  0x68   : > { %2368 = vmatprep.subr.bf16.mxu1 %v2649_v52  ;;  %2453 = vmatpush3.bf16.msra.mxu0 %v2646_v55 }
  0x69   : > { %2454 = vmatprep.subr.bf16.mxu0 %v2648_v8 }
  0x6a   : > { %2361 = vmatmul.mubr.bf16.vlgmr.msra.gmra.mrb[0].mxu1 %v3104_v53 }
  0x6b   : > { %2369 = vmatpush3.bf16.msra.mxu1 %v2649_v52  ;;  %2364 = vmatprep.mubr.bf16.mxu1 %v3111_v60 }
  0x6c   : > { %2370 = vmatprep.subr.bf16.mxu1 %v2651_v62  ;;  %2455 = vmatpush3.bf16.msra.mxu0 %v2648_v8 }
  0x6d   : > { %2464 = vmatprep.subr.bf16.mxu0 %v2650_v14 }
  0x6f   : > { %2371 = vmatpush3.bf16.msra.mxu1 %v2651_v62  ;;  %2457 = vmatmul.mubr.bf16.vlgmr.msra.gmra.mrb[0].mxu0 %v2997_v44  ;;  %v2657_v44 = vld [vmem:[%s3225_s1 + $0xe0] sm:$0xff]  }
  0x70   : > { %2372 = vmatprep.subr.bf16.mxu1 %v2653_v51  ;;  %2465 = vmatpush3.bf16.msra.mxu0 %v2650_v14  ;;  %v2153_v14 = vunpack.c.h.bf16 %v2182_v46 }
  0x71   : > { %2460 = vmatprep.mubr.bf16.mxu0 %v3056_v28  ;;  %2466 = vmatprep.subr.bf16.mxu0 %v2652_v56 }
  0x72   : > { %2365 = vmatmul.mubr.bf16.gmra.mrb[4].mxu1 %v3128_v63 }
  0x73   : > { %2373 = vmatpush3.bf16.msra.mxu1 %v2653_v51  ;;  %2384 = vmatprep.mubr.bf16.mxu1 %v1997_v16  ;;  %v2661_v16 = vld [vmem:[%s3225_s1 + $0xf0] sm:$0xff]  }
  0x74   : > { %2374 = vmatprep.subr.bf16.mxu1 %v2655_v0  ;;  %2467 = vmatpush3.bf16.msra.mxu0 %v2652_v56 }
  0x75   : > { %2468 = vmatprep.subr.bf16.mxu0 %v2654_v1 }
  0x77   : > { %2375 = vmatpush3.bf16.msra.mxu1 %v2655_v0  ;;  %2461 = vmatmul.mubr.bf16.gmra.mrb[4].mxu0 %v2082_v50 }
  0x78   : > { %2376 = vmatprep.subr.bf16.mxu1 %v2657_v44  ;;  %2469 = vmatpush3.bf16.msra.mxu0 %v2654_v1  ;;  %v2149_v1 = vunpack.c.h.bf16 %v2147_v48 }
  0x79   : > { %2480 = vmatprep.mubr.bf16.mxu0 %v2842_v35  ;;  %2470 = vmatprep.subr.bf16.mxu0 %v2656_v22  ;;  %v2663_v35 = vld [vmem:[%s3225_s1 + $0xf8] sm:$0xff]  }
  0x7b   : > { %2377 = vmatpush3.bf16.msra.mxu1 %v2657_v44 }
  0x7c   : > { %2378 = vmatprep.subr.bf16.mxu1 %v2659_v24  ;;  %2471 = vmatpush3.bf16.msra.mxu0 %v2656_v22 }
  0x7d   : > { %2472 = vmatprep.subr.bf16.mxu0 %v2658_v54 }
  0x7f   : > { %2379 = vmatpush3.bf16.msra.mxu1 %v2659_v24 }
  0x80   : > { %2380 = vmatprep.subr.bf16.mxu1 %v2661_v16  ;;  %2473 = vmatpush3.bf16.msra.mxu0 %v2658_v54 }
  0x81   : > { %2474 = vmatprep.subr.bf16.mxu0 %v2660_v57 }
  0x83   : > { %2381 = vmatpush3.bf16.msra.mxu1 %v2661_v16 }
  0x84   : > { %2382 = vmatprep.subr.bf16.mxu1 %v2663_v35  ;;  %2475 = vmatpush3.bf16.msra.mxu0 %v2660_v57 }
  0x85   : > { %2476 = vmatprep.subr.bf16.mxu0 %v2662_v2 }
  0x87   : > { %2383 = vmatpush3.bf16.msra.mxu1 %v2663_v35 }
  0x88   : > { %2512 = vmatprep.subr.bf16.mxu1 %v2665_v3  ;;  %2477 = vmatpush3.bf16.msra.mxu0 %v2662_v2 }
  0x89   : > { %2478 = vmatprep.subr.bf16.mxu0 %v2664_v5 }
  0x8a   : > { %2385 = vmatmul.mubr.bf16.vlgmr.msra.gmra.mrb[0].mxu1 %v1998_v30  ;;  %v2670_v30 = vld [vmem:[%s3225_s1 + $0x228] sm:$0xff]  }
  0x8b   : > { %2520 = vmatpush3.bf16.msra.mxu1 %v2665_v3  ;;  %2388 = vmatprep.mubr.bf16.mxu1 %v1999_v15 }
  0x8c   : > { %2513 = vmatprep.subr.bf16.mxu1 %v2666_v6  ;;  %2479 = vmatpush3.bf16.msra.mxu0 %v2664_v5 }
  0x8d   : > { %2488 = vmatprep.subr.bf16.mxu0 %v2665_v3 }
  0x8f   : > { %2521 = vmatpush3.bf16.msra.mxu1 %v2666_v6  ;;  %2481 = vmatmul.mubr.bf16.vlgmr.msra.gmra.mrb[0].mxu0 %v2904_v37 }
  0x90   : > { %2514 = vmatprep.subr.bf16.mxu1 %v2667_v11  ;;  %2489 = vmatpush3.bf16.msra.mxu0 %v2665_v3 }
  0x91   : > { %2484 = vmatprep.mubr.bf16.mxu0 %v2943_v13  ;;  %2490 = vmatprep.subr.bf16.mxu0 %v2666_v6 }
  0x92   : > { %2389 = vmatmul.mubr.bf16.gmra.mrb[4].mxu1 %v2000_v21 }
  0x93   : > { %2522 = vmatpush3.bf16.msra.mxu1 %v2667_v11  ;;  %2508 = vmatprep.mubr.bf16.mxu1 %v3128_v63  ;;  %v2148_v63 = vunpack.c.l.bf16 %v2147_v48 }
  0x94   : > { %2515 = vmatprep.subr.bf16.mxu1 %v2668_v58  ;;  %2491 = vmatpush3.bf16.msra.mxu0 %v2666_v6 }
  0x95   : > { %2492 = vmatprep.subr.bf16.mxu0 %v2667_v11 }
  0x97   : > { %2523 = vmatpush3.bf16.msra.mxu1 %v2668_v58  ;;  %2485 = vmatmul.mubr.bf16.gmra.mrb[4].mxu0 %v3075_v42 }
  0x98   : > { %2516 = vmatprep.subr.bf16.mxu1 %v2669_v18  ;;  %2493 = vmatpush3.bf16.msra.mxu0 %v2667_v11 }
  0x99   : > { %2504 = vmatprep.mubr.bf16.mxu0 %v3104_v53  ;;  %2494 = vmatprep.subr.bf16.mxu0 %v2668_v58 }
  0x9b   : > { %2524 = vmatpush3.bf16.msra.mxu1 %v2669_v18 }
  0x9c   : > { %2517 = vmatprep.subr.bf16.mxu1 %v2670_v30  ;;  %2495 = vmatpush3.bf16.msra.mxu0 %v2668_v58 }
  0x9d   : > { %2496 = vmatprep.subr.bf16.mxu0 %v2669_v18 }
  0x9f   : > { %2525 = vmatpush3.bf16.msra.mxu1 %v2670_v30 }
  0xa0   : > { %2518 = vmatprep.subr.bf16.mxu1 %v2671_v47  ;;  %2497 = vmatpush3.bf16.msra.mxu0 %v2669_v18 }
  0xa1   : > { %2498 = vmatprep.subr.bf16.mxu0 %v2670_v30 }
  0xa3   : > { %2526 = vmatpush3.bf16.msra.mxu1 %v2671_v47 }
  0xa4   : > { %2519 = vmatprep.subr.bf16.mxu1 %v2672_v7  ;;  %2499 = vmatpush3.bf16.msra.mxu0 %v2670_v30 }
  0xa5   : > { %2500 = vmatprep.subr.bf16.mxu0 %v2671_v47 }
  0xa7   : > { %2527 = vmatpush3.bf16.msra.mxu1 %v2672_v7 }
  0xa8   : > { %2501 = vmatpush3.bf16.msra.mxu0 %v2671_v47 }
  0xa9   : > { %2502 = vmatprep.subr.bf16.mxu0 %v2672_v7 }
  0xaa   : > { %2509 = vmatmul.mubr.bf16.vlgmr.msra.gmra.mrb[8].mxu1 %v2133_v26  ;;  %v2184_v26 = vld [vmem:[%s185_s16 + $0x18] sm:$0xff]  }
  0xab   : > { %v2160_v19 = vunpack.c.l.bf16 %v2184_v26  ;;  %v2161_v38 = vunpack.c.h.bf16 %v2184_v26 }
  0xac   : > { %2503 = vmatpush3.bf16.msra.mxu0 %v2672_v7 }
  0xaf   : > { %2505 = vmatmul.mubr.bf16.vlgmr.msra.gmra.mrb[0].mxu0 %v3111_v60  ;;  %v2152_v60 = vunpack.c.l.bf16 %v2182_v46 }
 0x15d   : > { %v2386_v17 = vpop.f32.mrb[0].mxu1 }
 0x15e   : > { %v993_v37 = vpop.f32.mrb[1].mxu1 }
 0x15f   : > { %v2387_v49 = vpop.f32.mrb[2].mxu1 }
 0x160   : > { %v996_v13 = vpop.f32.mrb[3].mxu1 }
 0x165   : > { %v2390_v15 = vpop.f32.mrb[4].mxu1 }
 0x166   : > { %v1009_v21 = vpop.f32.mrb[5].mxu1 }
 0x167   : > { %v2391_v12 = vpop.f32.mrb[6].mxu1 }
 0x168   : > { %v1012_v20 = vpop.f32.mrb[7].mxu1 }
 0x16a   : > { %v2486_v25 = vpop.f32.mrb[4].mxu0 }
 0x16b   : > { %v2532_v31 = vadd.f32 %v2486_v25, %v2390_v15  ;;  %v1619_v32 = vpop.f32.mrb[5].mxu0 }
 0x16c   : > { %v2534_v28 = vadd.f32 %v1619_v32, %v1009_v21  ;;  %v2487_v33 = vpop.f32.mrb[6].mxu0 }
 0x16d   : > { %v2536_v23 = vadd.f32 %v2487_v33, %v2391_v12  ;;  %v1622_v9 = vpop.f32.mrb[7].mxu0 }
 0x16e   : > { %v2538_v10 = vadd.f32 %v1622_v9, %v1012_v20 }
 0x17d   : > { %v2510_v29 = vpop.f32.mrb[8].mxu1 }
 0x17e   : > { %v2533_v34 = vadd.f32 %v2532_v31, %v2510_v29  ;;  %v1765_v36 = vpop.f32.mrb[9].mxu1 }
 0x17f   : > { %v2535_v61 = vadd.f32 %v2534_v28, %v1765_v36  ;;  %v2511_v41 = vpop.f32.mrb[10].mxu1 }
 0x180   : > { %v2537_v42 = vadd.f32 %v2536_v23, %v2511_v41  ;;  %v1768_v43 = vpop.f32.mrb[11].mxu1  ;;  %v1810_v27 = vadd.f32 %v2533_v34, %v2160_v19 }
 0x181   : > { %v2539_v45 = vadd.f32 %v2538_v10, %v1768_v43  ;;  %v1808_v52 = vadd.f32 %v2535_v61, %v2156_v40 }
 0x182   : > { %v1811_v39 = vadd.f32 %v2537_v42, %v2161_v38  ;;  %v2506_v55 = vpop.f32.mrb[0].mxu0 }
 0x183   : > { %v1809_v53 = vadd.f32 %v2539_v45, %v2157_v4  ;;  %v2528_v8 = vadd.f32 %v2506_v55, %v2386_v17  ;;  %v1749_v62 = vpop.f32.mrb[1].mxu0 }
 0x184   : > { %v2180_v51 = vpack.c.bf16 %v1811_v39, %v1810_v27  ;;  %v2529_v56 = vadd.f32 %v1749_v62, %v993_v37  ;;  %v2507_v0 = vpop.f32.mrb[2].mxu0 }
 0x185   : > { %v2175_v44 = vpack.c.bf16 %v1809_v53, %v1808_v52  ;;  %v2530_v50 = vadd.f32 %v2507_v0, %v2387_v49  ;;  %v1752_v22 = vpop.f32.mrb[3].mxu0  ;;  %v1806_v54 = vadd.f32 %v2528_v8, %v2152_v60 }
 0x186   : > { %2187 = vst [vmem:[%s190_s18 + $0x18] sm:$0xff] %v2180_v51   ;;  %v2531_v24 = vadd.f32 %v1752_v22, %v996_v13  ;;  %v1804_v57 = vadd.f32 %v2529_v56, %v2148_v63 }
 0x187   : > { %2186 = vst [vmem:[%s190_s18 + $0x10] sm:$0xff] %v2175_v44   ;;  %v1807_v16 = vadd.f32 %v2530_v50, %v2153_v14 }
 0x188   : > { %v1805_v35 = vadd.f32 %v2531_v24, %v2149_v1 }
 0x189   : > { %v2170_v2 = vpack.c.bf16 %v1807_v16, %v1806_v54 }
 0x18a   : > { %v2165_v3 = vpack.c.bf16 %v1805_v35, %v1804_v57 }
 0x18b   : > { %2185 = vst [vmem:[%s190_s18 + $0x8] sm:$0xff] %v2170_v2  }
 0x18c   : > { %2166 = vst [vmem:[%s190_s18] sm:$0xff] %v2165_v3  }
 0x18d PF: > { %s13_s12 = sadd.s32 1, %s2679_s12  }
 0x18e   : > { %p10_p4 = scmp.ge.s32.totalorder %s13_s12, 4  }
 0x190   :  { %12 = sbr.rel (!%p10_p4) target bundleno = 1 (0x1), region = 73 }

</bundles_post_ra>
